<compile_context>
chip_gen: v7x
topology: tpu7x:2x2x1
jax: 0.10.0
libtpu: 0.0.40
codegen_flags: <defaults>
</compile_context>

<pallas_src>
import functools

import jax
import jax.numpy as jnp
from jax import lax
from jax.experimental import pallas as pl
from jax.experimental.pallas import tpu as pltpu

EPS = 1e-5
LANE = 128

# Inter-stage activation / MXU-operand dtype: bf16 is MXU-native on v6e/v7x and
# halves HBM/DMA traffic.  Accumulation and all BN / stat math stay f32.
ACT_DTYPE = jnp.bfloat16
ACT_BYTES = jnp.dtype(ACT_DTYPE).itemsize


def _round_up(x, m):
    return (x + m - 1) // m * m


def _vmem_budget_bytes():
    """Per-generation VMEM budget for block sizing (v7x has only 64 MiB)."""
    try:
        cap = int(pltpu.get_tpu_info().vmem_capacity_bytes)
    except Exception:
        cap = 64 * 1024 * 1024          # conservative (v7x) fallback
    return int(cap * 0.7)


def _pick_row_tile(m, per_row_bytes, fixed_bytes, budget, cap=1024):
    """Largest multiple-of-8 divisor of m (<= cap) whose double-buffered blocks
    fit the VMEM budget; prefers >= 2 grid steps so the DMA pipeline has depth.
    (Fixes the old fallback that returned a single full-M block.)"""
    divs = [d for d in range(8, min(m, cap) + 1, 8) if m % d == 0]
    if not divs:
        return m                         # block == full array dims (still legal)
    fitting = [t for t in sorted(divs, reverse=True)
               if 2 * t * per_row_bytes + fixed_bytes + (8 << 20) <= budget]
    if not fitting:
        return divs[0]                   # smallest tile: always fits, still correct
    for t in fitting:
        if m // t >= 2:
            return t
    return fitting[0]


def _vmem_limit(est_bytes, budget):
    return int(min(max(est_bytes + (16 << 20), 32 << 20), budget))


# ---------------------------------------------------------------------------
# Kernels
# ---------------------------------------------------------------------------
def _matmul_stats_kernel(x_ref, w_ref, y_ref, sum_ref, sq_ref):
    """1x1 conv as a matmul; per-tile partial BN stats (parallel grid axis)."""
    y = jnp.dot(x_ref[...], w_ref[...], preferred_element_type=jnp.float32)
    y_ref[...] = y.astype(y_ref.dtype)
    sum_ref[...] = jnp.sum(y, axis=0, keepdims=True)[None]
    sq_ref[...] = jnp.sum(y * y, axis=0, keepdims=True)[None]


def _bn_relu_matmul_stats_kernel(y_ref, sc_ref, bi_ref, w_ref,
                                 z_ref, sum_ref, sq_ref):
    """Fused: bn (precomputed scale/bias) + relu -> 1x1 matmul + partial stats."""
    a = jnp.maximum(
        y_ref[...].astype(jnp.float32) * sc_ref[...] + bi_ref[...], 0.0)
    z = jnp.dot(a.astype(w_ref.dtype), w_ref[...],
                preferred_element_type=jnp.float32)
    z_ref[...] = z.astype(z_ref.dtype)
    sum_ref[...] = jnp.sum(z, axis=0, keepdims=True)[None]
    sq_ref[...] = jnp.sum(z * z, axis=0, keepdims=True)[None]


def _bn_relu_conv3x3_stats_kernel(y_ref, sc_ref, bi_ref, w_ref,
                                  o_ref, sum_ref, sq_ref, xp_ref, *, H, W):
    """Fused: bn1+relu on the input tile, then 3x3 conv (pad=1) as 9 shifted
    matmuls over an in-VMEM zero-halo buffer, plus partial bn2 stats.

    The halo must be exactly zero AFTER bn+relu (relu(0*scale+bias) != 0), so
    the padded buffer is rebuilt from zeros every step — no cross-step scratch
    state is relied on, which keeps the grid axis safely "parallel"."""
    c_in = y_ref.shape[-1]
    c_out = w_ref.shape[-1]

    a = jnp.maximum(
        y_ref[0].astype(jnp.float32) * sc_ref[0] + bi_ref[0], 0.0
    ).astype(xp_ref.dtype)
    zc = jnp.zeros((H, 1, c_in), xp_ref.dtype)
    zr = jnp.zeros((1, W + 2, c_in), xp_ref.dtype)
    xp_ref[...] = jnp.concatenate(
        [zr, jnp.concatenate([zc, a, zc], axis=1), zr], axis=0)

    acc = jnp.zeros((H * W, c_out), jnp.float32)
    # TODO(synk): hoist the kx shift / build an in-VMEM im2col (K = 9*C) to cut
    # the 9 slice materializations; not binding at these channel counts.
    for ky in range(3):
        for kx in range(3):
            patch = xp_ref[ky:ky + H, kx:kx + W, :].reshape(H * W, c_in)
            acc = acc + jnp.dot(patch, w_ref[ky, kx],
                                preferred_element_type=jnp.float32)
    o_ref[...] = acc.astype(o_ref.dtype)
    sum_ref[...] = jnp.sum(acc, axis=0, keepdims=True)[None]
    sq_ref[...] = jnp.sum(acc * acc, axis=0, keepdims=True)[None]


def _bn_add_relu_kernel(y_ref, sc_ref, bi_ref, res_ref, o_ref):
    """bn3 (precomputed scale/bias) + identity residual + relu."""
    v = (y_ref[...].astype(jnp.float32) * sc_ref[...] + bi_ref[...]
         + res_ref[...].astype(jnp.float32))
    o_ref[...] = jnp.maximum(v, 0.0).astype(o_ref.dtype)


# ---------------------------------------------------------------------------
# pallas_call wrappers
# ---------------------------------------------------------------------------
def _matmul_stats_call(x, w, tm, vmem_limit):
    m, k = x.shape
    n = w.shape[1]
    t = m // tm
    return pl.pallas_call(
        _matmul_stats_kernel,
        out_shape=(jax.ShapeDtypeStruct((m, n), ACT_DTYPE),
                   jax.ShapeDtypeStruct((t, 1, n), jnp.float32),
                   jax.ShapeDtypeStruct((t, 1, n), jnp.float32)),
        grid=(t,),
        in_specs=[pl.BlockSpec((tm, k), lambda i: (i, 0)),
                  pl.BlockSpec((k, n), lambda i: (0, 0))],
        out_specs=(pl.BlockSpec((tm, n), lambda i: (i, 0)),
                   pl.BlockSpec((1, 1, n), lambda i: (i, 0, 0)),
                   pl.BlockSpec((1, 1, n), lambda i: (i, 0, 0))),
        compiler_params=pltpu.CompilerParams(
            dimension_semantics=("parallel",),
            vmem_limit_bytes=vmem_limit),
    )(x, w)


def _bn_relu_matmul_stats_call(y, scale, bias, w, tm, vmem_limit):
    m, k = y.shape
    n = w.shape[1]
    t = m // tm
    return pl.pallas_call(
        _bn_relu_matmul_stats_kernel,
        out_shape=(jax.ShapeDtypeStruct((m, n), ACT_DTYPE),
                   jax.ShapeDtypeStruct((t, 1, n), jnp.float32),
                   jax.ShapeDtypeStruct((t, 1, n), jnp.float32)),
        grid=(t,),
        in_specs=[pl.BlockSpec((tm, k), lambda i: (i, 0)),
                  pl.BlockSpec((1, k), lambda i: (0, 0)),
                  pl.BlockSpec((1, k), lambda i: (0, 0)),
                  pl.BlockSpec((k, n), lambda i: (0, 0))],
        out_specs=(pl.BlockSpec((tm, n), lambda i: (i, 0)),
                   pl.BlockSpec((1, 1, n), lambda i: (i, 0, 0)),
                   pl.BlockSpec((1, 1, n), lambda i: (i, 0, 0))),
        compiler_params=pltpu.CompilerParams(
            dimension_semantics=("parallel",),
            vmem_limit_bytes=vmem_limit),
    )(y, scale, bias, w)


def _bn_relu_conv3x3_stats_call(y_img, scale, bias, w, vmem_limit):
    n_img, H, W, c_in = y_img.shape
    c_out = w.shape[-1]
    m = n_img * H * W
    kern = functools.partial(_bn_relu_conv3x3_stats_kernel, H=H, W=W)
    return pl.pallas_call(
        kern,
        out_shape=(jax.ShapeDtypeStruct((m, c_out), ACT_DTYPE),
                   jax.ShapeDtypeStruct((n_img, 1, c_out), jnp.float32),
                   jax.ShapeDtypeStruct((n_img, 1, c_out), jnp.float32)),
        grid=(n_img,),
        in_specs=[pl.BlockSpec((1, H, W, c_in), lambda i: (i, 0, 0, 0)),
                  pl.BlockSpec((1, c_in), lambda i: (0, 0)),
                  pl.BlockSpec((1, c_in), lambda i: (0, 0)),
                  pl.BlockSpec((3, 3, c_in, c_out), lambda i: (0, 0, 0, 0))],
        out_specs=(pl.BlockSpec((H * W, c_out), lambda i: (i, 0)),
                   pl.BlockSpec((1, 1, c_out), lambda i: (i, 0, 0)),
                   pl.BlockSpec((1, 1, c_out), lambda i: (i, 0, 0))),
        scratch_shapes=[pltpu.VMEM((H + 2, W + 2, c_in), ACT_DTYPE)],
        compiler_params=pltpu.CompilerParams(
            dimension_semantics=("parallel",),
            vmem_limit_bytes=vmem_limit),
    )(y_img, scale, bias, w)


def _bn_add_relu_call(y, scale, bias, res, tm, vmem_limit):
    m, c = y.shape
    return pl.pallas_call(
        _bn_add_relu_kernel,
        out_shape=jax.ShapeDtypeStruct((m, c), jnp.float32),
        grid=(m // tm,),
        in_specs=[pl.BlockSpec((tm, c), lambda i: (i, 0)),
                  pl.BlockSpec((1, c), lambda i: (0, 0)),
                  pl.BlockSpec((1, c), lambda i: (0, 0)),
                  pl.BlockSpec((tm, c), lambda i: (i, 0))],
        out_specs=pl.BlockSpec((tm, c), lambda i: (i, 0)),
        compiler_params=pltpu.CompilerParams(
            dimension_semantics=("parallel",),
            vmem_limit_bytes=vmem_limit),
    )(y, scale, bias, res)


# ---------------------------------------------------------------------------
# Glue (layout plumbing only — no heavy compute in XLA)
# ---------------------------------------------------------------------------
def _pad_last(a, target):
    pad = target - a.shape[-1]
    if pad == 0:
        return a
    return jnp.pad(a, [(0, 0)] * (a.ndim - 1) + [(0, pad)])


def _pad_last2(a, t_in, t_out):
    cfg = ([(0, 0)] * (a.ndim - 2)
           + [(0, t_in - a.shape[-2]), (0, t_out - a.shape[-1])])
    return jnp.pad(a, cfg)


def _affine_from_stats(psum, psq, gamma, beta, count):
    """Reduce per-tile partial (sum, sumsq), fold into one scale/bias FMA."""
    # TODO(synk): for very large M switch to chunked (count, mean, M2) to avoid
    # E[x^2]-E[x]^2 cancellation; f32 partial sums are fine at these sizes.
    ssum = jnp.sum(psum, axis=0)[0]          # (C,)
    ssq = jnp.sum(psq, axis=0)[0]
    mean = ssum / count
    var = jnp.maximum(ssq / count - mean * mean, 0.0)
    scale = gamma * lax.rsqrt(var + EPS)
    bias = beta - mean * scale
    return scale[None, :].astype(jnp.float32), bias[None, :].astype(jnp.float32)


def bottleneck_pallas(x_nchw, params):
    """x_nchw: (N, inplanes, H, W) float32; params hold torch-layout weights."""
    (w1, g1, b1, w2, g2, b2, w3, g3, b3) = params
    n_img, c_in, H, W = x_nchw.shape
    width = w1.shape[0]
    c_out = w3.shape[0]
    assert c_in == c_out, "identity residual needs inplanes == planes*expansion"

    cin_p = _round_up(c_in, LANE)            # lane-dense channel padding
    cmid_p = _round_up(width, LANE)
    cout_p = _round_up(c_out, LANE)
    m = n_img * H * W

    # VMEM-budget-aware tiling (v7x: 64 MiB physical; v5e/v6e: 128 MiB).
    budget = _vmem_budget_bytes()
    per_row = ((cin_p + 2 * cmid_p + cout_p) * ACT_BYTES   # act in/out blocks
               + (cin_p + 2 * cout_p) * 4                  # residual + final f32
               + max(cmid_p, cout_p) * 4)                  # f32 matmul accumulator
    fixed = 2 * (cin_p * cmid_p + cmid_p * cout_p) * ACT_BYTES
    tm = _pick_row_tile(m, per_row, fixed, budget)
    lim_rows = _vmem_limit(2 * tm * per_row + fixed, budget)

    conv_est = (2 * (2 * H * W * cmid_p * ACT_BYTES        # act in/out (x2 buffers)
                     + 9 * cmid_p * cmid_p * ACT_BYTES)    # weight block
                + (H + 2) * (W + 2) * cmid_p * ACT_BYTES   # zero-halo scratch
                + 2 * H * W * cmid_p * 4)                  # f32 acc + patch temps
    lim_conv = _vmem_limit(conv_est, budget)
    # TODO(synk): for large H*W, strip the 3x3 conv spatially (halo rows from
    # neighbouring strips) instead of one whole image per grid step.

    # Layout glue (XLA): NCHW -> (M, C) channels-last, channels padded to 128.
    # TODO(synk): keep NHWC end-to-end / fold these transposes into the first
    # and last kernels' index_maps when composing into a full network.
    x_nhwc = jnp.transpose(x_nchw, (0, 2, 3, 1))
    x2d = _pad_last(x_nhwc.reshape(m, c_in), cin_p)        # f32 residual path
    x2d_act = x2d.astype(ACT_DTYPE)

    # Weights -> matmul layout, zero-padded, bf16 MXU operands.
    w1m = _pad_last2(jnp.transpose(w1[:, :, 0, 0]), cin_p, cmid_p).astype(ACT_DTYPE)
    w2m = _pad_last2(jnp.transpose(w2, (2, 3, 1, 0)), cmid_p, cmid_p).astype(ACT_DTYPE)
    w3m = _pad_last2(jnp.transpose(w3[:, :, 0, 0]), cmid_p, cout_p).astype(ACT_DTYPE)
    g1p, b1p = _pad_last(g1, cmid_p), _pad_last(b1, cmid_p)
    g2p, b2p = _pad_last(g2, cmid_p), _pad_last(b2, cmid_p)
    g3p, b3p = _pad_last(g3, cout_p), _pad_last(b3, cout_p)

    # Stage 1: conv1 (1x1) matmul + bn1 partial stats.
    y1, s1, q1 = _matmul_stats_call(x2d_act, w1m, tm, lim_rows)
    sc1, bi1 = _affine_from_stats(s1, q1, g1p, b1p, m)

    # Stage 2: fused [bn1+relu -> conv2 (3x3, zero halo in VMEM)] + bn2 stats.
    y1_img = y1.reshape(n_img, H, W, cmid_p)               # free reshape
    y2, s2, q2 = _bn_relu_conv3x3_stats_call(y1_img, sc1, bi1, w2m, lim_conv)
    sc2, bi2 = _affine_from_stats(s2, q2, g2p, b2p, m)

    # Stage 3: fused [bn2+relu -> conv3 (1x1)] + bn3 partial stats.
    y3, s3, q3 = _bn_relu_matmul_stats_call(y2, sc2, bi2, w3m, tm, lim_rows)
    sc3, bi3 = _affine_from_stats(s3, q3, g3p, b3p, m)

    # Stage 4: bn3 + identity residual + relu.
    out2d = _bn_add_relu_call(y3, sc3, bi3, x2d, tm, lim_rows)

    out = out2d[:, :c_out].reshape(n_img, H, W, c_out)
    return jnp.transpose(out, (0, 3, 1, 2))


# ---------------------------------------------------------------------------
# Pure-JAX reference (NCHW, training-mode BN), f32 HIGHEST precision.
# ---------------------------------------------------------------------------
def bottleneck_ref(x, params):
    (w1, g1, b1, w2, g2, b2, w3, g3, b3) = params

    def bn(y, gamma, beta):
        mean = y.mean(axis=(0, 2, 3), keepdims=True)
        var = ((y - mean) ** 2).mean(axis=(0, 2, 3), keepdims=True)
        return (gamma[None, :, None, None] * (y - mean) * lax.rsqrt(var + EPS)
                + beta[None, :, None, None])

    dn = ("NCHW", "OIHW", "NCHW")
    hi = lax.Precision.HIGHEST
    out = lax.conv_general_dilated(x, w1, (1, 1), "VALID",
                                   dimension_numbers=dn, precision=hi)
    out = jax.nn.relu(bn(out, g1, b1))
    out = lax.conv_general_dilated(out, w2, (1, 1), ((1, 1), (1, 1)),
                                   dimension_numbers=dn, precision=hi)
    out = jax.nn.relu(bn(out, g2, b2))
    out = lax.conv_general_dilated(out, w3, (1, 1), "VALID",
                                   dimension_numbers=dn, precision=hi)
    out = bn(out, g3, b3) + x
    return jax.nn.relu(out)


# ---------------------------------------------------------------------------
if __name__ == "__main__":
    N, H, W = 2, 16, 16
    planes = 4
    expansion = 4
    inplanes = planes * expansion          # 16
    width = int(planes * (64 / 64.0)) * 1  # 4

    key = jax.random.PRNGKey(0)
    ks = jax.random.split(key, 10)

    x = jax.random.normal(ks[0], (N, inplanes, H, W), jnp.float32)

    # Deterministic parameter init (torch conv weight layout: OIHW).
    w1 = jax.random.normal(ks[1], (width, inplanes, 1, 1), jnp.float32) / jnp.sqrt(inplanes)
    w2 = jax.random.normal(ks[2], (width, width, 3, 3), jnp.float32) / jnp.sqrt(9 * width)
    w3 = jax.random.normal(ks[3], (planes * expansion, width, 1, 1), jnp.float32) / jnp.sqrt(width)
    g1 = 1.0 + 0.1 * jax.random.normal(ks[4], (width,), jnp.float32)
    b1 = 0.1 * jax.random.normal(ks[5], (width,), jnp.float32)
    g2 = 1.0 + 0.1 * jax.random.normal(ks[6], (width,), jnp.float32)
    b2 = 0.1 * jax.random.normal(ks[7], (width,), jnp.float32)
    g3 = 1.0 + 0.1 * jax.random.normal(ks[8], (planes * expansion,), jnp.float32)
    b3 = 0.1 * jax.random.normal(ks[9], (planes * expansion,), jnp.float32)

    params = (w1, g1, b1, w2, g2, b2, w3, g3, b3)

    out = jax.block_until_ready(jax.jit(bottleneck_pallas)(x, params))
    ref = jax.block_until_ready(jax.jit(bottleneck_ref)(x, params))

    assert out.shape == ref.shape == (N, inplanes, H, W)
    # bf16 MXU operands / activations (with f32 accumulation + f32 BN math) =>
    # tolerance is bf16-level, not f32-level, vs the HIGHEST-precision f32 ref.
    diff = out.astype(jnp.float32) - ref
    max_err = float(jnp.max(jnp.abs(diff)))
    rel_err = float(jnp.sqrt(jnp.sum(diff * diff) / (jnp.sum(ref * ref) + 1e-12)))
    assert rel_err < 2.5e-2 and max_err < 1.25e-1, (
        f"rel_err={rel_err:.4e} max_err={max_err:.4e}")

    print("KERNEL_OK")
</pallas_src>

<mosaic_0001>
module attributes {stable_mosaic.version = 11 : i64} {
  func.func @_matmul_stats_kernel(%arg0: i32, %arg1: memref<256x128xbf16, #tpu.memory_space<vmem>>, %arg2: memref<128x128xbf16, #tpu.memory_space<vmem>>, %arg3: memref<256x128xbf16, #tpu.memory_space<vmem>>, %arg4: memref<1x1x128xf32, #tpu.memory_space<vmem>>, %arg5: memref<1x1x128xf32, #tpu.memory_space<vmem>>) attributes {dimension_semantics = [#tpu.dimension_semantics<parallel>], iteration_bounds = array<i64: 2>, scalar_prefetch = 0 : i64, scratch_operands = 0 : i64, tpu.core_type = #tpu.core_type<tc>, window_params = [{transform_indices = @transform_0, window_bounds = array<i64: 256, 128>}, {pipeline_mode = #tpu.pipeline_mode<synchronous>, transform_indices = @transform_1, window_bounds = array<i64: 128, 128>}, {transform_indices = @transform_2, window_bounds = array<i64: 256, 128>}, {transform_indices = @transform_3, window_bounds = array<i64: 1, 1, 128>}, {transform_indices = @transform_4, window_bounds = array<i64: 1, 1, 128>}]} {
    %c0 = arith.constant 0 : index
    %c0_0 = arith.constant 0 : index
    %0 = vector.load %arg1[%c0, %c0_0] : memref<256x128xbf16, #tpu.memory_space<vmem>>, vector<256x128xbf16>
    %c0_1 = arith.constant 0 : index
    %c0_2 = arith.constant 0 : index
    %1 = vector.load %arg2[%c0_1, %c0_2] : memref<128x128xbf16, #tpu.memory_space<vmem>>, vector<128x128xbf16>
    %cst = arith.constant dense<0.000000e+00> : vector<256x128xf32>
    %2 = tpu.matmul %0, %1, %cst {dimension_numbers = #tpu.dot_dimension_numbers<[1], [0], [0], [1], [0, 0, 1, 1], [], []>} : vector<256x128xbf16>, vector<128x128xbf16>, vector<256x128xf32> -> vector<256x128xf32>
    %3 = arith.truncf %2 : vector<256x128xf32> to vector<256x128xbf16>
    %c0_3 = arith.constant 0 : index
    %c0_4 = arith.constant 0 : index
    %4 = vector.load %arg3[%c0_3, %c0_4] : memref<256x128xbf16, #tpu.memory_space<vmem>>, vector<256x128xbf16>
    tpu.vector_store %arg3[%c0_3, %c0_4], %3 {strides = array<i32>} : memref<256x128xbf16, #tpu.memory_space<vmem>>, vector<256x128xbf16>,
    %cst_5 = arith.constant dense<0.000000e+00> : vector<128xf32>
    %5 = vector.multi_reduction <add>, %2, %cst_5 [0] : vector<256x128xf32> to vector<128xf32>
    %6 = vector.shape_cast %5 : vector<128xf32> to vector<1x128xf32>
    %7 = vector.shape_cast %6 : vector<1x128xf32> to vector<1x1x128xf32>
    %c0_6 = arith.constant 0 : index
    %c0_7 = arith.constant 0 : index
    %c0_8 = arith.constant 0 : index
    %8 = vector.load %arg4[%c0_6, %c0_7, %c0_8] : memref<1x1x128xf32, #tpu.memory_space<vmem>>, vector<1x1x128xf32>
    tpu.vector_store %arg4[%c0_6, %c0_7, %c0_8], %7 {strides = array<i32>} : memref<1x1x128xf32, #tpu.memory_space<vmem>>, vector<1x1x128xf32>,
    %9 = arith.mulf %2, %2 : vector<256x128xf32>
    %cst_9 = arith.constant dense<0.000000e+00> : vector<128xf32>
    %10 = vector.multi_reduction <add>, %9, %cst_9 [0] : vector<256x128xf32> to vector<128xf32>
    %11 = vector.shape_cast %10 : vector<128xf32> to vector<1x128xf32>
    %12 = vector.shape_cast %11 : vector<1x128xf32> to vector<1x1x128xf32>
    %c0_10 = arith.constant 0 : index
    %c0_11 = arith.constant 0 : index
    %c0_12 = arith.constant 0 : index
    %13 = vector.load %arg5[%c0_10, %c0_11, %c0_12] : memref<1x1x128xf32, #tpu.memory_space<vmem>>, vector<1x1x128xf32>
    tpu.vector_store %arg5[%c0_10, %c0_11, %c0_12], %12 {strides = array<i32>} : memref<1x1x128xf32, #tpu.memory_space<vmem>>, vector<1x1x128xf32>,
    return
  }
  func.func @transform_0(%arg0: i32) -> (i32, i32) {
    %c0_i32 = arith.constant 0 : i32
    %c0_i32_0 = arith.constant 0 : i32
    return %arg0, %c0_i32 : i32, i32
  }
  func.func @transform_1(%arg0: i32) -> (i32, i32) {
    %c0_i32 = arith.constant 0 : i32
    %c0_i32_0 = arith.constant 0 : i32
    %c0_i32_1 = arith.constant 0 : i32
    return %c0_i32, %c0_i32_0 : i32, i32
  }
  func.func @transform_2(%arg0: i32) -> (i32, i32) {
    %c0_i32 = arith.constant 0 : i32
    %c0_i32_0 = arith.constant 0 : i32
    return %arg0, %c0_i32 : i32, i32
  }
  func.func @transform_3(%arg0: i32) -> (i32, i32, i32) {
    %c0_i32 = arith.constant 0 : i32
    %c0_i32_0 = arith.constant 0 : i32
    %c0_i32_1 = arith.constant 0 : i32
    return %arg0, %c0_i32, %c0_i32_0 : i32, i32, i32
  }
  func.func @transform_4(%arg0: i32) -> (i32, i32, i32) {
    %c0_i32 = arith.constant 0 : i32
    %c0_i32_0 = arith.constant 0 : i32
    %c0_i32_1 = arith.constant 0 : i32
    return %arg0, %c0_i32, %c0_i32_0 : i32, i32, i32
  }
}

module attributes {stable_mosaic.version = 11 : i64} {
  func.func @_bn_relu_conv3x3_stats_kernel(%arg0: i32, %arg1: memref<1x16x16x128xbf16, #tpu.memory_space<vmem>>, %arg2: memref<1x128xf32, #tpu.memory_space<vmem>>, %arg3: memref<1x128xf32, #tpu.memory_space<vmem>>, %arg4: memref<3x3x128x128xbf16, #tpu.memory_space<vmem>>, %arg5: memref<256x128xbf16, #tpu.memory_space<vmem>>, %arg6: memref<1x1x128xf32, #tpu.memory_space<vmem>>, %arg7: memref<1x1x128xf32, #tpu.memory_space<vmem>>, %arg8: memref<18x18x128xbf16, #tpu.memory_space<vmem>>) attributes {dimension_semantics = [#tpu.dimension_semantics<parallel>], iteration_bounds = array<i64: 2>, scalar_prefetch = 0 : i64, scratch_operands = 1 : i64, tpu.core_type = #tpu.core_type<tc>, window_params = [{transform_indices = @transform_0, window_bounds = array<i64: 1, 16, 16, 128>}, {pipeline_mode = #tpu.pipeline_mode<synchronous>, transform_indices = @transform_1, window_bounds = array<i64: 1, 128>}, {pipeline_mode = #tpu.pipeline_mode<synchronous>, transform_indices = @transform_2, window_bounds = array<i64: 1, 128>}, {pipeline_mode = #tpu.pipeline_mode<synchronous>, transform_indices = @transform_3, window_bounds = array<i64: 3, 3, 128, 128>}, {transform_indices = @transform_4, window_bounds = array<i64: 256, 128>}, {transform_indices = @transform_5, window_bounds = array<i64: 1, 1, 128>}, {transform_indices = @transform_6, window_bounds = array<i64: 1, 1, 128>}]} {
    %c0 = arith.constant 0 : index
    %c0_0 = arith.constant 0 : index
    %c0_1 = arith.constant 0 : index
    %c0_2 = arith.constant 0 : index
    %0 = vector.load %arg1[%c0, %c0_0, %c0_1, %c0_2] : memref<1x16x16x128xbf16, #tpu.memory_space<vmem>>, vector<1x16x16x128xbf16>
    %1 = vector.shape_cast %0 : vector<1x16x16x128xbf16> to vector<16x16x128xbf16>
    %2 = arith.extf %1 : vector<16x16x128xbf16> to vector<16x16x128xf32>
    %c0_3 = arith.constant 0 : index
    %c0_4 = arith.constant 0 : index
    %3 = vector.load %arg2[%c0_3, %c0_4] : memref<1x128xf32, #tpu.memory_space<vmem>>, vector<1x128xf32>
    %4 = vector.shape_cast %3 : vector<1x128xf32> to vector<128xf32>
    %5 = vector.shape_cast %4 : vector<128xf32> to vector<1x1x128xf32>
    %6 = vector.broadcast %5 : vector<1x1x128xf32> to vector<16x16x128xf32>
    %7 = arith.mulf %2, %6 : vector<16x16x128xf32>
    %c0_5 = arith.constant 0 : index
    %c0_6 = arith.constant 0 : index
    %8 = vector.load %arg3[%c0_5, %c0_6] : memref<1x128xf32, #tpu.memory_space<vmem>>, vector<1x128xf32>
    %9 = vector.shape_cast %8 : vector<1x128xf32> to vector<128xf32>
    %10 = vector.shape_cast %9 : vector<128xf32> to vector<1x1x128xf32>
    %11 = vector.broadcast %10 : vector<1x1x128xf32> to vector<16x16x128xf32>
    %12 = arith.addf %7, %11 : vector<16x16x128xf32>
    %cst = arith.constant 0.000000e+00 : f32
    %13 = vector.broadcast %cst : f32 to vector<16x16x128xf32>
    %14 = arith.maximumf %12, %13 : vector<16x16x128xf32>
    %15 = arith.truncf %14 : vector<16x16x128xf32> to vector<16x16x128xbf16>
    %cst_7 = arith.constant 0.000000e+00 : bf16
    %16 = vector.broadcast %cst_7 : bf16 to vector<16x1x128xbf16>
    %cst_8 = arith.constant 0.000000e+00 : bf16
    %17 = vector.broadcast %cst_8 : bf16 to vector<1x18x128xbf16>
    %18 = tpu.concatenate %16, %15, %16 in 1 : vector<16x1x128xbf16>, vector<16x16x128xbf16>, vector<16x1x128xbf16> -> vector<16x18x128xbf16>
    %19 = tpu.concatenate %17, %18, %17 in 0 : vector<1x18x128xbf16>, vector<16x18x128xbf16>, vector<1x18x128xbf16> -> vector<18x18x128xbf16>
    %c0_9 = arith.constant 0 : index
    %c0_10 = arith.constant 0 : index
    %c0_11 = arith.constant 0 : index
    %20 = vector.load %arg8[%c0_9, %c0_10, %c0_11] : memref<18x18x128xbf16, #tpu.memory_space<vmem>>, vector<18x18x128xbf16>
    tpu.vector_store %arg8[%c0_9, %c0_10, %c0_11], %19 {strides = array<i32>} : memref<18x18x128xbf16, #tpu.memory_space<vmem>>, vector<18x18x128xbf16>,
    %cst_12 = arith.constant 0.000000e+00 : f32
    %21 = vector.broadcast %cst_12 : f32 to vector<256x128xf32>
    %c0_13 = arith.constant 0 : index
    %c0_14 = arith.constant 0 : index
    %c0_15 = arith.constant 0 : index
    %22 = vector.load %arg8[%c0_13, %c0_14, %c0_15] : memref<18x18x128xbf16, #tpu.memory_space<vmem>>, vector<16x16x128xbf16>
    %23 = vector.shape_cast %22 : vector<16x16x128xbf16> to vector<256x128xbf16>
    %c0_16 = arith.constant 0 : index
    %c0_17 = arith.constant 0 : index
    %c0_18 = arith.constant 0 : index
    %c0_19 = arith.constant 0 : index
    %24 = vector.load %arg4[%c0_16, %c0_17, %c0_18, %c0_19] : memref<3x3x128x128xbf16, #tpu.memory_space<vmem>>, vector<1x1x128x128xbf16>
    %25 = vector.shape_cast %24 : vector<1x1x128x128xbf16> to vector<128x128xbf16>
    %cst_20 = arith.constant dense<0.000000e+00> : vector<256x128xf32>
    %26 = tpu.matmul %23, %25, %cst_20 {dimension_numbers = #tpu.dot_dimension_numbers<[1], [0], [0], [1], [0, 0, 1, 1], [], []>} : vector<256x128xbf16>, vector<128x128xbf16>, vector<256x128xf32> -> vector<256x128xf32>
    %27 = arith.addf %21, %26 : vector<256x128xf32>
    %c0_21 = arith.constant 0 : index
    %c1 = arith.constant 1 : index
    %c0_22 = arith.constant 0 : index
    %28 = vector.load %arg8[%c0_21, %c1, %c0_22] : memref<18x18x128xbf16, #tpu.memory_space<vmem>>, vector<16x16x128xbf16>
    %29 = vector.shape_cast %28 : vector<16x16x128xbf16> to vector<256x128xbf16>
    %c0_23 = arith.constant 0 : index
    %c1_24 = arith.constant 1 : index
    %c0_25 = arith.constant 0 : index
    %c0_26 = arith.constant 0 : index
    %30 = vector.load %arg4[%c0_23, %c1_24, %c0_25, %c0_26] : memref<3x3x128x128xbf16, #tpu.memory_space<vmem>>, vector<1x1x128x128xbf16>
    %31 = vector.shape_cast %30 : vector<1x1x128x128xbf16> to vector<128x128xbf16>
    %cst_27 = arith.constant dense<0.000000e+00> : vector<256x128xf32>
    %32 = tpu.matmul %29, %31, %cst_27 {dimension_numbers = #tpu.dot_dimension_numbers<[1], [0], [0], [1], [0, 0, 1, 1], [], []>} : vector<256x128xbf16>, vector<128x128xbf16>, vector<256x128xf32> -> vector<256x128xf32>
    %33 = arith.addf %27, %32 : vector<256x128xf32>
    %c0_28 = arith.constant 0 : index
    %c2 = arith.constant 2 : index
    %c0_29 = arith.constant 0 : index
    %34 = vector.load %arg8[%c0_28, %c2, %c0_29] : memref<18x18x128xbf16, #tpu.memory_space<vmem>>, vector<16x16x128xbf16>
    %35 = vector.shape_cast %34 : vector<16x16x128xbf16> to vector<256x128xbf16>
    %c0_30 = arith.constant 0 : index
    %c2_31 = arith.constant 2 : index
    %c0_32 = arith.constant 0 : index
    %c0_33 = arith.constant 0 : index
    %36 = vector.load %arg4[%c0_30, %c2_31, %c0_32, %c0_33] : memref<3x3x128x128xbf16, #tpu.memory_space<vmem>>, vector<1x1x128x128xbf16>
    %37 = vector.shape_cast %36 : vector<1x1x128x128xbf16> to vector<128x128xbf16>
    %cst_34 = arith.constant dense<0.000000e+00> : vector<256x128xf32>
    %38 = tpu.matmul %35, %37, %cst_34 {dimension_numbers = #tpu.dot_dimension_numbers<[1], [0], [0], [1], [0, 0, 1, 1], [], []>} : vector<256x128xbf16>, vector<128x128xbf16>, vector<256x128xf32> -> vector<256x128xf32>
    %39 = arith.addf %33, %38 : vector<256x128xf32>
    %c1_35 = arith.constant 1 : index
    %c0_36 = arith.constant 0 : index
    %c0_37 = arith.constant 0 : index
    %40 = vector.load %arg8[%c1_35, %c0_36, %c0_37] : memref<18x18x128xbf16, #tpu.memory_space<vmem>>, vector<16x16x128xbf16>
    %41 = vector.shape_cast %40 : vector<16x16x128xbf16> to vector<256x128xbf16>
    %c1_38 = arith.constant 1 : index
    %c0_39 = arith.constant 0 : index
    %c0_40 = arith.constant 0 : index
    %c0_41 = arith.constant 0 : index
    %42 = vector.load %arg4[%c1_38, %c0_39, %c0_40, %c0_41] : memref<3x3x128x128xbf16, #tpu.memory_space<vmem>>, vector<1x1x128x128xbf16>
    %43 = vector.shape_cast %42 : vector<1x1x128x128xbf16> to vector<128x128xbf16>
    %cst_42 = arith.constant dense<0.000000e+00> : vector<256x128xf32>
    %44 = tpu.matmul %41, %43, %cst_42 {dimension_numbers = #tpu.dot_dimension_numbers<[1], [0], [0], [1], [0, 0, 1, 1], [], []>} : vector<256x128xbf16>, vector<128x128xbf16>, vector<256x128xf32> -> vector<256x128xf32>
    %45 = arith.addf %39, %44 : vector<256x128xf32>
    %c1_43 = arith.constant 1 : index
    %c1_44 = arith.constant 1 : index
    %c0_45 = arith.constant 0 : index
    %46 = vector.load %arg8[%c1_43, %c1_44, %c0_45] : memref<18x18x128xbf16, #tpu.memory_space<vmem>>, vector<16x16x128xbf16>
    %47 = vector.shape_cast %46 : vector<16x16x128xbf16> to vector<256x128xbf16>
    %c1_46 = arith.constant 1 : index
    %c1_47 = arith.constant 1 : index
    %c0_48 = arith.constant 0 : index
    %c0_49 = arith.constant 0 : index
    %48 = vector.load %arg4[%c1_46, %c1_47, %c0_48, %c0_49] : memref<3x3x128x128xbf16, #tpu.memory_space<vmem>>, vector<1x1x128x128xbf16>
    %49 = vector.shape_cast %48 : vector<1x1x128x128xbf16> to vector<128x128xbf16>
    %cst_50 = arith.constant dense<0.000000e+00> : vector<256x128xf32>
    %50 = tpu.matmul %47, %49, %cst_50 {dimension_numbers = #tpu.dot_dimension_numbers<[1], [0], [0], [1], [0, 0, 1, 1], [], []>} : vector<256x128xbf16>, vector<128x128xbf16>, vector<256x128xf32> -> vector<256x128xf32>
    %51 = arith.addf %45, %50 : vector<256x128xf32>
    %c1_51 = arith.constant 1 : index
    %c2_52 = arith.constant 2 : index
    %c0_53 = arith.constant 0 : index
    %52 = vector.load %arg8[%c1_51, %c2_52, %c0_53] : memref<18x18x128xbf16, #tpu.memory_space<vmem>>, vector<16x16x128xbf16>
    %53 = vector.shape_cast %52 : vector<16x16x128xbf16> to vector<256x128xbf16>
    %c1_54 = arith.constant 1 : index
    %c2_55 = arith.constant 2 : index
    %c0_56 = arith.constant 0 : index
    %c0_57 = arith.constant 0 : index
    %54 = vector.load %arg4[%c1_54, %c2_55, %c0_56, %c0_57] : memref<3x3x128x128xbf16, #tpu.memory_space<vmem>>, vector<1x1x128x128xbf16>
    %55 = vector.shape_cast %54 : vector<1x1x128x128xbf16> to vector<128x128xbf16>
    %cst_58 = arith.constant dense<0.000000e+00> : vector<256x128xf32>
    %56 = tpu.matmul %53, %55, %cst_58 {dimension_numbers = #tpu.dot_dimension_numbers<[1], [0], [0], [1], [0, 0, 1, 1], [], []>} : vector<256x128xbf16>, vector<128x128xbf16>, vector<256x128xf32> -> vector<256x128xf32>
    %57 = arith.addf %51, %56 : vector<256x128xf32>
    %c2_59 = arith.constant 2 : index
    %c0_60 = arith.constant 0 : index
    %c0_61 = arith.constant 0 : index
    %58 = vector.load %arg8[%c2_59, %c0_60, %c0_61] : memref<18x18x128xbf16, #tpu.memory_space<vmem>>, vector<16x16x128xbf16>
    %59 = vector.shape_cast %58 : vector<16x16x128xbf16> to vector<256x128xbf16>
    %c2_62 = arith.constant 2 : index
    %c0_63 = arith.constant 0 : index
    %c0_64 = arith.constant 0 : index
    %c0_65 = arith.constant 0 : index
    %60 = vector.load %arg4[%c2_62, %c0_63, %c0_64, %c0_65] : memref<3x3x128x128xbf16, #tpu.memory_space<vmem>>, vector<1x1x128x128xbf16>
    %61 = vector.shape_cast %60 : vector<1x1x128x128xbf16> to vector<128x128xbf16>
    %cst_66 = arith.constant dense<0.000000e+00> : vector<256x128xf32>
    %62 = tpu.matmul %59, %61, %cst_66 {dimension_numbers = #tpu.dot_dimension_numbers<[1], [0], [0], [1], [0, 0, 1, 1], [], []>} : vector<256x128xbf16>, vector<128x128xbf16>, vector<256x128xf32> -> vector<256x128xf32>
    %63 = arith.addf %57, %62 : vector<256x128xf32>
    %c2_67 = arith.constant 2 : index
    %c1_68 = arith.constant 1 : index
    %c0_69 = arith.constant 0 : index
    %64 = vector.load %arg8[%c2_67, %c1_68, %c0_69] : memref<18x18x128xbf16, #tpu.memory_space<vmem>>, vector<16x16x128xbf16>
    %65 = vector.shape_cast %64 : vector<16x16x128xbf16> to vector<256x128xbf16>
    %c2_70 = arith.constant 2 : index
    %c1_71 = arith.constant 1 : index
    %c0_72 = arith.constant 0 : index
    %c0_73 = arith.constant 0 : index
    %66 = vector.load %arg4[%c2_70, %c1_71, %c0_72, %c0_73] : memref<3x3x128x128xbf16, #tpu.memory_space<vmem>>, vector<1x1x128x128xbf16>
    %67 = vector.shape_cast %66 : vector<1x1x128x128xbf16> to vector<128x128xbf16>
    %cst_74 = arith.constant dense<0.000000e+00> : vector<256x128xf32>
    %68 = tpu.matmul %65, %67, %cst_74 {dimension_numbers = #tpu.dot_dimension_numbers<[1], [0], [0], [1], [0, 0, 1, 1], [], []>} : vector<256x128xbf16>, vector<128x128xbf16>, vector<256x128xf32> -> vector<256x128xf32>
    %69 = arith.addf %63, %68 : vector<256x128xf32>
    %c2_75 = arith.constant 2 : index
    %c2_76 = arith.constant 2 : index
    %c0_77 = arith.constant 0 : index
    %70 = vector.load %arg8[%c2_75, %c2_76, %c0_77] : memref<18x18x128xbf16, #tpu.memory_space<vmem>>, vector<16x16x128xbf16>
    %71 = vector.shape_cast %70 : vector<16x16x128xbf16> to vector<256x128xbf16>
    %c2_78 = arith.constant 2 : index
    %c2_79 = arith.constant 2 : index
    %c0_80 = arith.constant 0 : index
    %c0_81 = arith.constant 0 : index
    %72 = vector.load %arg4[%c2_78, %c2_79, %c0_80, %c0_81] : memref<3x3x128x128xbf16, #tpu.memory_space<vmem>>, vector<1x1x128x128xbf16>
    %73 = vector.shape_cast %72 : vector<1x1x128x128xbf16> to vector<128x128xbf16>
    %cst_82 = arith.constant dense<0.000000e+00> : vector<256x128xf32>
    %74 = tpu.matmul %71, %73, %cst_82 {dimension_numbers = #tpu.dot_dimension_numbers<[1], [0], [0], [1], [0, 0, 1, 1], [], []>} : vector<256x128xbf16>, vector<128x128xbf16>, vector<256x128xf32> -> vector<256x128xf32>
    %75 = arith.addf %69, %74 : vector<256x128xf32>
    %76 = arith.truncf %75 : vector<256x128xf32> to vector<256x128xbf16>
    %c0_83 = arith.constant 0 : index
    %c0_84 = arith.constant 0 : index
    %77 = vector.load %arg5[%c0_83, %c0_84] : memref<256x128xbf16, #tpu.memory_space<vmem>>, vector<256x128xbf16>
    tpu.vector_store %arg5[%c0_83, %c0_84], %76 {strides = array<i32>} : memref<256x128xbf16, #tpu.memory_space<vmem>>, vector<256x128xbf16>,
    %cst_85 = arith.constant dense<0.000000e+00> : vector<128xf32>
    %78 = vector.multi_reduction <add>, %75, %cst_85 [0] : vector<256x128xf32> to vector<128xf32>
    %79 = vector.shape_cast %78 : vector<128xf32> to vector<1x128xf32>
    %80 = vector.shape_cast %79 : vector<1x128xf32> to vector<1x1x128xf32>
    %c0_86 = arith.constant 0 : index
    %c0_87 = arith.constant 0 : index
    %c0_88 = arith.constant 0 : index
    %81 = vector.load %arg6[%c0_86, %c0_87, %c0_88] : memref<1x1x128xf32, #tpu.memory_space<vmem>>, vector<1x1x128xf32>
    tpu.vector_store %arg6[%c0_86, %c0_87, %c0_88], %80 {strides = array<i32>} : memref<1x1x128xf32, #tpu.memory_space<vmem>>, vector<1x1x128xf32>,
    %82 = arith.mulf %75, %75 : vector<256x128xf32>
    %cst_89 = arith.constant dense<0.000000e+00> : vector<128xf32>
    %83 = vector.multi_reduction <add>, %82, %cst_89 [0] : vector<256x128xf32> to vector<128xf32>
    %84 = vector.shape_cast %83 : vector<128xf32> to vector<1x128xf32>
    %85 = vector.shape_cast %84 : vector<1x128xf32> to vector<1x1x128xf32>
    %c0_90 = arith.constant 0 : index
    %c0_91 = arith.constant 0 : index
    %c0_92 = arith.constant 0 : index
    %86 = vector.load %arg7[%c0_90, %c0_91, %c0_92] : memref<1x1x128xf32, #tpu.memory_space<vmem>>, vector<1x1x128xf32>
    tpu.vector_store %arg7[%c0_90, %c0_91, %c0_92], %85 {strides = array<i32>} : memref<1x1x128xf32, #tpu.memory_space<vmem>>, vector<1x1x128xf32>,
    return
  }
  func.func @transform_0(%arg0: i32) -> (i32, i32, i32, i32) {
    %c0_i32 = arith.constant 0 : i32
    %c0_i32_0 = arith.constant 0 : i32
    %c0_i32_1 = arith.constant 0 : i32
    %c0_i32_2 = arith.constant 0 : i32
    return %arg0, %c0_i32, %c0_i32_0, %c0_i32_1 : i32, i32, i32, i32
  }
  func.func @transform_1(%arg0: i32) -> (i32, i32) {
    %c0_i32 = arith.constant 0 : i32
    %c0_i32_0 = arith.constant 0 : i32
    %c0_i32_1 = arith.constant 0 : i32
    return %c0_i32, %c0_i32_0 : i32, i32
  }
  func.func @transform_2(%arg0: i32) -> (i32, i32) {
    %c0_i32 = arith.constant 0 : i32
    %c0_i32_0 = arith.constant 0 : i32
    %c0_i32_1 = arith.constant 0 : i32
    return %c0_i32, %c0_i32_0 : i32, i32
  }
  func.func @transform_3(%arg0: i32) -> (i32, i32, i32, i32) {
    %c0_i32 = arith.constant 0 : i32
    %c0_i32_0 = arith.constant 0 : i32
    %c0_i32_1 = arith.constant 0 : i32
    %c0_i32_2 = arith.constant 0 : i32
    %c0_i32_3 = arith.constant 0 : i32
    return %c0_i32, %c0_i32_0, %c0_i32_1, %c0_i32_2 : i32, i32, i32, i32
  }
  func.func @transform_4(%arg0: i32) -> (i32, i32) {
    %c0_i32 = arith.constant 0 : i32
    %c0_i32_0 = arith.constant 0 : i32
    return %arg0, %c0_i32 : i32, i32
  }
  func.func @transform_5(%arg0: i32) -> (i32, i32, i32) {
    %c0_i32 = arith.constant 0 : i32
    %c0_i32_0 = arith.constant 0 : i32
    %c0_i32_1 = arith.constant 0 : i32
    return %arg0, %c0_i32, %c0_i32_0 : i32, i32, i32
  }
  func.func @transform_6(%arg0: i32) -> (i32, i32, i32) {
    %c0_i32 = arith.constant 0 : i32
    %c0_i32_0 = arith.constant 0 : i32
    %c0_i32_1 = arith.constant 0 : i32
    return %arg0, %c0_i32, %c0_i32_0 : i32, i32, i32
  }
}

module attributes {stable_mosaic.version = 11 : i64} {
  func.func @_bn_relu_matmul_stats_kernel(%arg0: i32, %arg1: memref<256x128xbf16, #tpu.memory_space<vmem>>, %arg2: memref<1x128xf32, #tpu.memory_space<vmem>>, %arg3: memref<1x128xf32, #tpu.memory_space<vmem>>, %arg4: memref<128x128xbf16, #tpu.memory_space<vmem>>, %arg5: memref<256x128xbf16, #tpu.memory_space<vmem>>, %arg6: memref<1x1x128xf32, #tpu.memory_space<vmem>>, %arg7: memref<1x1x128xf32, #tpu.memory_space<vmem>>) attributes {dimension_semantics = [#tpu.dimension_semantics<parallel>], iteration_bounds = array<i64: 2>, scalar_prefetch = 0 : i64, scratch_operands = 0 : i64, tpu.core_type = #tpu.core_type<tc>, window_params = [{transform_indices = @transform_0, window_bounds = array<i64: 256, 128>}, {pipeline_mode = #tpu.pipeline_mode<synchronous>, transform_indices = @transform_1, window_bounds = array<i64: 1, 128>}, {pipeline_mode = #tpu.pipeline_mode<synchronous>, transform_indices = @transform_2, window_bounds = array<i64: 1, 128>}, {pipeline_mode = #tpu.pipeline_mode<synchronous>, transform_indices = @transform_3, window_bounds = array<i64: 128, 128>}, {transform_indices = @transform_4, window_bounds = array<i64: 256, 128>}, {transform_indices = @transform_5, window_bounds = array<i64: 1, 1, 128>}, {transform_indices = @transform_6, window_bounds = array<i64: 1, 1, 128>}]} {
    %c0 = arith.constant 0 : index
    %c0_0 = arith.constant 0 : index
    %0 = vector.load %arg1[%c0, %c0_0] : memref<256x128xbf16, #tpu.memory_space<vmem>>, vector<256x128xbf16>
    %1 = arith.extf %0 : vector<256x128xbf16> to vector<256x128xf32>
    %c0_1 = arith.constant 0 : index
    %c0_2 = arith.constant 0 : index
    %2 = vector.load %arg2[%c0_1, %c0_2] : memref<1x128xf32, #tpu.memory_space<vmem>>, vector<1x128xf32>
    %3 = vector.broadcast %2 : vector<1x128xf32> to vector<256x128xf32>
    %4 = arith.mulf %1, %3 : vector<256x128xf32>
    %c0_3 = arith.constant 0 : index
    %c0_4 = arith.constant 0 : index
    %5 = vector.load %arg3[%c0_3, %c0_4] : memref<1x128xf32, #tpu.memory_space<vmem>>, vector<1x128xf32>
    %6 = vector.broadcast %5 : vector<1x128xf32> to vector<256x128xf32>
    %7 = arith.addf %4, %6 : vector<256x128xf32>
    %cst = arith.constant 0.000000e+00 : f32
    %8 = vector.broadcast %cst : f32 to vector<256x128xf32>
    %9 = arith.maximumf %7, %8 : vector<256x128xf32>
    %10 = arith.truncf %9 : vector<256x128xf32> to vector<256x128xbf16>
    %c0_5 = arith.constant 0 : index
    %c0_6 = arith.constant 0 : index
    %11 = vector.load %arg4[%c0_5, %c0_6] : memref<128x128xbf16, #tpu.memory_space<vmem>>, vector<128x128xbf16>
    %cst_7 = arith.constant dense<0.000000e+00> : vector<256x128xf32>
    %12 = tpu.matmul %10, %11, %cst_7 {dimension_numbers = #tpu.dot_dimension_numbers<[1], [0], [0], [1], [0, 0, 1, 1], [], []>} : vector<256x128xbf16>, vector<128x128xbf16>, vector<256x128xf32> -> vector<256x128xf32>
    %13 = arith.truncf %12 : vector<256x128xf32> to vector<256x128xbf16>
    %c0_8 = arith.constant 0 : index
    %c0_9 = arith.constant 0 : index
    %14 = vector.load %arg5[%c0_8, %c0_9] : memref<256x128xbf16, #tpu.memory_space<vmem>>, vector<256x128xbf16>
    tpu.vector_store %arg5[%c0_8, %c0_9], %13 {strides = array<i32>} : memref<256x128xbf16, #tpu.memory_space<vmem>>, vector<256x128xbf16>,
    %cst_10 = arith.constant dense<0.000000e+00> : vector<128xf32>
    %15 = vector.multi_reduction <add>, %12, %cst_10 [0] : vector<256x128xf32> to vector<128xf32>
    %16 = vector.shape_cast %15 : vector<128xf32> to vector<1x128xf32>
    %17 = vector.shape_cast %16 : vector<1x128xf32> to vector<1x1x128xf32>
    %c0_11 = arith.constant 0 : index
    %c0_12 = arith.constant 0 : index
    %c0_13 = arith.constant 0 : index
    %18 = vector.load %arg6[%c0_11, %c0_12, %c0_13] : memref<1x1x128xf32, #tpu.memory_space<vmem>>, vector<1x1x128xf32>
    tpu.vector_store %arg6[%c0_11, %c0_12, %c0_13], %17 {strides = array<i32>} : memref<1x1x128xf32, #tpu.memory_space<vmem>>, vector<1x1x128xf32>,
    %19 = arith.mulf %12, %12 : vector<256x128xf32>
    %cst_14 = arith.constant dense<0.000000e+00> : vector<128xf32>
    %20 = vector.multi_reduction <add>, %19, %cst_14 [0] : vector<256x128xf32> to vector<128xf32>
    %21 = vector.shape_cast %20 : vector<128xf32> to vector<1x128xf32>
    %22 = vector.shape_cast %21 : vector<1x128xf32> to vector<1x1x128xf32>
    %c0_15 = arith.constant 0 : index
    %c0_16 = arith.constant 0 : index
    %c0_17 = arith.constant 0 : index
    %23 = vector.load %arg7[%c0_15, %c0_16, %c0_17] : memref<1x1x128xf32, #tpu.memory_space<vmem>>, vector<1x1x128xf32>
    tpu.vector_store %arg7[%c0_15, %c0_16, %c0_17], %22 {strides = array<i32>} : memref<1x1x128xf32, #tpu.memory_space<vmem>>, vector<1x1x128xf32>,
    return
  }
  func.func @transform_0(%arg0: i32) -> (i32, i32) {
    %c0_i32 = arith.constant 0 : i32
    %c0_i32_0 = arith.constant 0 : i32
    return %arg0, %c0_i32 : i32, i32
  }
  func.func @transform_1(%arg0: i32) -> (i32, i32) {
    %c0_i32 = arith.constant 0 : i32
    %c0_i32_0 = arith.constant 0 : i32
    %c0_i32_1 = arith.constant 0 : i32
    return %c0_i32, %c0_i32_0 : i32, i32
  }
  func.func @transform_2(%arg0: i32) -> (i32, i32) {
    %c0_i32 = arith.constant 0 : i32
    %c0_i32_0 = arith.constant 0 : i32
    %c0_i32_1 = arith.constant 0 : i32
    return %c0_i32, %c0_i32_0 : i32, i32
  }
  func.func @transform_3(%arg0: i32) -> (i32, i32) {
    %c0_i32 = arith.constant 0 : i32
    %c0_i32_0 = arith.constant 0 : i32
    %c0_i32_1 = arith.constant 0 : i32
    return %c0_i32, %c0_i32_0 : i32, i32
  }
  func.func @transform_4(%arg0: i32) -> (i32, i32) {
    %c0_i32 = arith.constant 0 : i32
    %c0_i32_0 = arith.constant 0 : i32
    return %arg0, %c0_i32 : i32, i32
  }
  func.func @transform_5(%arg0: i32) -> (i32, i32, i32) {
    %c0_i32 = arith.constant 0 : i32
    %c0_i32_0 = arith.constant 0 : i32
    %c0_i32_1 = arith.constant 0 : i32
    return %arg0, %c0_i32, %c0_i32_0 : i32, i32, i32
  }
  func.func @transform_6(%arg0: i32) -> (i32, i32, i32) {
    %c0_i32 = arith.constant 0 : i32
    %c0_i32_0 = arith.constant 0 : i32
    %c0_i32_1 = arith.constant 0 : i32
    return %arg0, %c0_i32, %c0_i32_0 : i32, i32, i32
  }
}

module attributes {stable_mosaic.version = 11 : i64} {
  func.func @_bn_add_relu_kernel(%arg0: i32, %arg1: memref<256x128xbf16, #tpu.memory_space<vmem>>, %arg2: memref<1x128xf32, #tpu.memory_space<vmem>>, %arg3: memref<1x128xf32, #tpu.memory_space<vmem>>, %arg4: memref<256x128xf32, #tpu.memory_space<vmem>>, %arg5: memref<256x128xf32, #tpu.memory_space<vmem>>) attributes {dimension_semantics = [#tpu.dimension_semantics<parallel>], iteration_bounds = array<i64: 2>, scalar_prefetch = 0 : i64, scratch_operands = 0 : i64, tpu.core_type = #tpu.core_type<tc>, window_params = [{transform_indices = @transform_0, window_bounds = array<i64: 256, 128>}, {pipeline_mode = #tpu.pipeline_mode<synchronous>, transform_indices = @transform_1, window_bounds = array<i64: 1, 128>}, {pipeline_mode = #tpu.pipeline_mode<synchronous>, transform_indices = @transform_2, window_bounds = array<i64: 1, 128>}, {transform_indices = @transform_3, window_bounds = array<i64: 256, 128>}, {transform_indices = @transform_4, window_bounds = array<i64: 256, 128>}]} {
    %c0 = arith.constant 0 : index
    %c0_0 = arith.constant 0 : index
    %0 = vector.load %arg1[%c0, %c0_0] : memref<256x128xbf16, #tpu.memory_space<vmem>>, vector<256x128xbf16>
    %1 = arith.extf %0 : vector<256x128xbf16> to vector<256x128xf32>
    %c0_1 = arith.constant 0 : index
    %c0_2 = arith.constant 0 : index
    %2 = vector.load %arg2[%c0_1, %c0_2] : memref<1x128xf32, #tpu.memory_space<vmem>>, vector<1x128xf32>
    %3 = vector.broadcast %2 : vector<1x128xf32> to vector<256x128xf32>
    %4 = arith.mulf %1, %3 : vector<256x128xf32>
    %c0_3 = arith.constant 0 : index
    %c0_4 = arith.constant 0 : index
    %5 = vector.load %arg3[%c0_3, %c0_4] : memref<1x128xf32, #tpu.memory_space<vmem>>, vector<1x128xf32>
    %6 = vector.broadcast %5 : vector<1x128xf32> to vector<256x128xf32>
    %7 = arith.addf %4, %6 : vector<256x128xf32>
    %c0_5 = arith.constant 0 : index
    %c0_6 = arith.constant 0 : index
    %8 = vector.load %arg4[%c0_5, %c0_6] : memref<256x128xf32, #tpu.memory_space<vmem>>, vector<256x128xf32>
    %9 = arith.addf %7, %8 : vector<256x128xf32>
    %cst = arith.constant 0.000000e+00 : f32
    %10 = vector.broadcast %cst : f32 to vector<256x128xf32>
    %11 = arith.maximumf %9, %10 : vector<256x128xf32>
    %c0_7 = arith.constant 0 : index
    %c0_8 = arith.constant 0 : index
    %12 = vector.load %arg5[%c0_7, %c0_8] : memref<256x128xf32, #tpu.memory_space<vmem>>, vector<256x128xf32>
    tpu.vector_store %arg5[%c0_7, %c0_8], %11 {strides = array<i32>} : memref<256x128xf32, #tpu.memory_space<vmem>>, vector<256x128xf32>,
    return
  }
  func.func @transform_0(%arg0: i32) -> (i32, i32) {
    %c0_i32 = arith.constant 0 : i32
    %c0_i32_0 = arith.constant 0 : i32
    return %arg0, %c0_i32 : i32, i32
  }
  func.func @transform_1(%arg0: i32) -> (i32, i32) {
    %c0_i32 = arith.constant 0 : i32
    %c0_i32_0 = arith.constant 0 : i32
    %c0_i32_1 = arith.constant 0 : i32
    return %c0_i32, %c0_i32_0 : i32, i32
  }
  func.func @transform_2(%arg0: i32) -> (i32, i32) {
    %c0_i32 = arith.constant 0 : i32
    %c0_i32_0 = arith.constant 0 : i32
    %c0_i32_1 = arith.constant 0 : i32
    return %c0_i32, %c0_i32_0 : i32, i32
  }
  func.func @transform_3(%arg0: i32) -> (i32, i32) {
    %c0_i32 = arith.constant 0 : i32
    %c0_i32_0 = arith.constant 0 : i32
    return %arg0, %c0_i32 : i32, i32
  }
  func.func @transform_4(%arg0: i32) -> (i32, i32) {
    %c0_i32 = arith.constant 0 : i32
    %c0_i32_0 = arith.constant 0 : i32
    return %arg0, %c0_i32 : i32, i32
  }
}

</mosaic_0001>

<bundles_post_ra>
// kernel: bottleneck_pallas.4
= control target key start
LH: loop header
LB: loop body
LE: loop exit
PB: predicated region body
PF: predicated region fallthrough
CT: control target
= control target key end

     0   :  { %s1293_s15 = smov 0   ;;  %s1472_s0 = inlined_call_operand.vmem [shape: bf16[512,128], index: 0, kind: input, shape index: {}]   ;;  %s1473_s1 = inlined_call_operand.vmem [shape: bf16[128,128], index: 1, kind: input, shape index: {}]   ;;  %s1474_s2 = inlined_call_operand.vmem [shape: bf16[512,128], index: 2, kind: output, shape index: {0}]   ;;  %s1475_s3 = inlined_call_operand.vmem [shape: f32[2,1,128], index: 3, kind: output, shape index: {1}]   ;;  %s1476_s4 = inlined_call_operand.vmem [shape: f32[2,1,128], index: 4, kind: output, shape index: {2}]  }
   0x1 LB: > { %s1299_s16 = sadd.s32 4294967295, %s1266_s15   ;;  %p950_p0 = scmp.ge.s32.totalorder %s1266_s15, 1  ;;  %s1266_s15 = sphi %s1293_s15, %s15_s15  }
   0x2   : > { %p168_p1 = scmp.lt.s32.totalorder %s1266_s15, 3 }
   0x4   : > { %p169_p2 = pnand %p950_p0, %p168_p1 }
   0x5   : > { %v1236_v0 = vld [vmem:[%s1473_s1] sm:$0xff] (!%p169_p2)   ;;  %s951_s19 = sshll.u32 (!%p169_p2), %s1299_s16, 5  ;;  %v1237_v1 = vld [vmem:[%s1473_s1 + $0x8] sm:$0xff] (!%p169_p2)   ;;  %v1238_v2 = vld [vmem:[%s1473_s1 + $0x10] sm:$0xff] (!%p169_p2)   ;;  %p212_p4 = scmp.lt.s32.totalorder (!%p169_p2), %s1299_s16, 1 }
   0x6   : > { %172 = sbr.rel (%p169_p2) target bundleno = 330 (0x14a), region = 28  ;;  %p201_p3 = scmp.lt.s32.totalorder (!%p169_p2), %s951_s19, 63  ;;  %1164 = vmatprep.subr.bf16.mxu0 (!%p169_p2), %v1236_v0  ;;  %1212 = vmatprep.subr.bf16.mxu1 (!%p169_p2), %v1236_v0  ;;  %v1239_v3 = vld [vmem:[%s1473_s1 + $0x18] sm:$0xff] (!%p169_p2)   ;;  %v1240_v5 = vld [vmem:[%s1473_s1 + $0x20] sm:$0xff] (!%p169_p2)   ;;  %v1241_v6 = vld [vmem:[%s1473_s1 + $0x28] sm:$0xff] (!%p169_p2)  }
   0x7   : > { %1165 = vmatpush3.bf16.msra.mxu0 (!%p169_p2), %v1236_v0  ;;  %1220 = vmatpush3.bf16.msra.mxu1 (!%p169_p2), %v1236_v0  ;;  %v1242_v8 = vld [vmem:[%s1473_s1 + $0x30] sm:$0xff] (!%p169_p2)   ;;  %v1243_v9 = vld [vmem:[%s1473_s1 + $0x38] sm:$0xff] (!%p169_p2)  }
   0x8   : > { %1166 = vmatprep.subr.bf16.mxu0 (!%p169_p2), %v1237_v1  ;;  %1213 = vmatprep.subr.bf16.mxu1 (!%p169_p2), %v1237_v1 }
   0xb   : > { %1167 = vmatpush3.bf16.msra.mxu0 (!%p169_p2), %v1237_v1  ;;  %1221 = vmatpush3.bf16.msra.mxu1 (!%p169_p2), %v1237_v1 }
   0xc   : > { %1168 = vmatprep.subr.bf16.mxu0 (!%p169_p2), %v1238_v2  ;;  %1214 = vmatprep.subr.bf16.mxu1 (!%p169_p2), %v1238_v2 }
   0xd   : > { %s1478_s19 = smov (!%p201_p3, %s951_s19), 63  ;;  %s1480_s16 = smov (!%p212_p4, %s1299_s16), 1 }
   0xe   : > { %s952_s24 = sshll.u32 %s1478_s19, 2  ;;  %s214_s19 = scalar_lea.vmem %s1475_s3, %s1480_s16 }
   0xf   : > { %s1321_s27 = scalar_lea.vmem %s1472_s0, %s952_s24  ;;  %1169 = vmatpush3.bf16.msra.mxu0 %v1238_v2  ;;  %1222 = vmatpush3.bf16.msra.mxu1 %v1238_v2  ;;  %s1363_s14 = scalar_lea.vmem %s1474_s2, %s952_s24 }
  0x10   : > { %v1244_v4 = vld [vmem:[%s1321_s27] sm:$0xff]   ;;  %1170 = vmatprep.subr.bf16.mxu0 %v1239_v3  ;;  %1215 = vmatprep.subr.bf16.mxu1 %v1239_v3  ;;  %v1245_v10 = vld [vmem:[%s1321_s27 + $0x8] sm:$0xff]   ;;  %v1246_v12 = vld [vmem:[%s1321_s27 + $0x10] sm:$0xff]   ;;  %s217_s22 = scalar_lea.vmem %s1476_s4, %s1480_s16 }
  0x11   : > { %1180 = vmatprep.mubr.bf16.mxu0 %v1244_v4  ;;  %v1252_v7 = vld [vmem:[%s1321_s27 + $0x40] sm:$0xff]   ;;  %v1253_v11 = vld [vmem:[%s1321_s27 + $0x48] sm:$0xff]   ;;  %v1254_v13 = vld [vmem:[%s1321_s27 + $0x50] sm:$0xff]  }
  0x12   : > { %1196 = vmatprep.mubr.bf16.mxu1 %v1252_v7  ;;  %v1247_v14 = vld [vmem:[%s1321_s27 + $0x18] sm:$0xff]   ;;  %v1248_v16 = vld [vmem:[%s1321_s27 + $0x20] sm:$0xff]   ;;  %v1249_v18 = vld [vmem:[%s1321_s27 + $0x28] sm:$0xff]  }
  0x13   : > { %1171 = vmatpush3.bf16.msra.mxu0 %v1239_v3  ;;  %1223 = vmatpush3.bf16.msra.mxu1 %v1239_v3  ;;  %v1255_v15 = vld [vmem:[%s1321_s27 + $0x58] sm:$0xff]   ;;  %v1256_v17 = vld [vmem:[%s1321_s27 + $0x60] sm:$0xff]   ;;  %v1257_v19 = vld [vmem:[%s1321_s27 + $0x68] sm:$0xff]  }
  0x14   : > { %1172 = vmatprep.subr.bf16.mxu0 %v1240_v5  ;;  %1216 = vmatprep.subr.bf16.mxu1 %v1240_v5  ;;  %v1250_v20 = vld [vmem:[%s1321_s27 + $0x30] sm:$0xff]   ;;  %v1251_v22 = vld [vmem:[%s1321_s27 + $0x38] sm:$0xff]  }
  0x15   : > { %v1258_v21 = vld [vmem:[%s1321_s27 + $0x70] sm:$0xff]   ;;  %v1259_v23 = vld [vmem:[%s1321_s27 + $0x78] sm:$0xff]  }
  0x17   : > { %1173 = vmatpush3.bf16.msra.mxu0 %v1240_v5  ;;  %1224 = vmatpush3.bf16.msra.mxu1 %v1240_v5 }
  0x18   : > { %1174 = vmatprep.subr.bf16.mxu0 %v1241_v6  ;;  %1217 = vmatprep.subr.bf16.mxu1 %v1241_v6 }
  0x1b   : > { %1175 = vmatpush3.bf16.msra.mxu0 %v1241_v6  ;;  %1225 = vmatpush3.bf16.msra.mxu1 %v1241_v6 }
  0x1c   : > { %1176 = vmatprep.subr.bf16.mxu0 %v1242_v8  ;;  %1218 = vmatprep.subr.bf16.mxu1 %v1242_v8 }
  0x1f   : > { %1177 = vmatpush3.bf16.msra.mxu0 %v1242_v8  ;;  %1226 = vmatpush3.bf16.msra.mxu1 %v1242_v8 }
  0x20   : > { %1178 = vmatprep.subr.bf16.mxu0 %v1243_v9  ;;  %1219 = vmatprep.subr.bf16.mxu1 %v1243_v9 }
  0x23   : > { %1179 = vmatpush3.bf16.msra.mxu0 %v1243_v9  ;;  %1227 = vmatpush3.bf16.msra.mxu1 %v1243_v9 }
  0x26   : > { %1181 = vmatmul.mubr.bf16.vlgmr.msra.gmra.mrb[0].mxu0 %v1245_v10  ;;  %1197 = vmatmul.mubr.bf16.vlgmr.msra.gmra.mrb[0].mxu1 %v1253_v11 }
  0x27   : > { %1184 = vmatprep.mubr.bf16.mxu0 %v1246_v12  ;;  %1200 = vmatprep.mubr.bf16.mxu1 %v1254_v13 }
  0x2e   : > { %1185 = vmatmul.mubr.bf16.gmra.mrb[4].mxu0 %v1247_v14  ;;  %1201 = vmatmul.mubr.bf16.gmra.mrb[4].mxu1 %v1255_v15 }
  0x2f   : > { %1188 = vmatprep.mubr.bf16.mxu0 %v1248_v16  ;;  %1204 = vmatprep.mubr.bf16.mxu1 %v1256_v17 }
  0x36   : > { %1189 = vmatmul.mubr.bf16.gmra.mrb[8].mxu0 %v1249_v18  ;;  %1205 = vmatmul.mubr.bf16.gmra.mrb[8].mxu1 %v1257_v19 }
  0x37   : > { %1192 = vmatprep.mubr.bf16.mxu0 %v1250_v20  ;;  %1208 = vmatprep.mubr.bf16.mxu1 %v1258_v21 }
  0x3e   : > { %1193 = vmatmul.mubr.bf16.gmra.mrb[12].mxu0 %v1251_v22  ;;  %1209 = vmatmul.mubr.bf16.gmra.mrb[12].mxu1 %v1259_v23 }
  0xf9   : > { %v1182_v24 = vpop.f32.mrb[0].mxu0  ;;  %v1354_v25 = vpop.f32.mrb[0].mxu1 }
  0xfa   : > { %v445_v26 = vpop.f32.mrb[1].mxu0  ;;  %v1356_v27 = vpop.f32.mrb[1].mxu1  ;;  %v772_v39 = vmul.f32 %v1182_v24, %v1182_v24 }
  0xfb   : > { %v1183_v28 = vpop.f32.mrb[2].mxu0  ;;  %v1365_v29 = vpop.f32.mrb[2].mxu1  ;;  %v770_v30 = vmul.f32 %v445_v26, %v445_v26 }
  0xfc   : > { %v1053_v31 = vpack.c.bf16 %v1183_v28, %v1182_v24  ;;  %v448_v32 = vpop.f32.mrb[3].mxu0  ;;  %v1093_v33 = vpack.c.bf16 %v1365_v29, %v1354_v25  ;;  %v1369_v34 = vpop.f32.mrb[3].mxu1  ;;  %v773_v42 = vmul.f32 %v1183_v28, %v1183_v28 }
  0xfd   : > { %v1048_v35 = vpack.c.bf16 %v448_v32, %v445_v26  ;;  %v732_v36 = vadd.f32 %v448_v32, %v445_v26  ;;  %v771_v37 = vmul.f32 %v448_v32, %v448_v32  ;;  %v1088_v38 = vpack.c.bf16 %v1369_v34, %v1356_v27 }
  0xfe   : > { %1125 = vst [vmem:[%s1363_s14 + $0x8] sm:$0xff] %v1053_v31   ;;  %1133 = vst [vmem:[%s1363_s14 + $0x48] sm:$0xff] %v1093_v33  }
  0xff   : > { %1049 = vst [vmem:[%s1363_s14] sm:$0xff] %v1048_v35   ;;  %v733_v40 = vadd.f32 %v1182_v24, %v732_v36  ;;  %v802_v41 = vadd.f32 %v771_v37, %v770_v30  ;;  %1132 = vst [vmem:[%s1363_s14 + $0x40] sm:$0xff] %v1088_v38  }
 0x101   : > { %v803_v43 = vadd.f32 %v802_v41, %v772_v39  ;;  %v1186_v44 = vpop.f32.mrb[4].mxu0  ;;  %v734_v45 = vadd.f32 %v1183_v28, %v733_v40  ;;  %v1377_v46 = vpop.f32.mrb[4].mxu1 }
 0x102   : > { %v461_v47 = vpop.f32.mrb[5].mxu0  ;;  %v1379_v48 = vpop.f32.mrb[5].mxu1  ;;  %v776_v63 = vmul.f32 %v1186_v44, %v1186_v44 }
 0x103   : > { %v735_v49 = vadd.f32 %v734_v45, %v461_v47  ;;  %v774_v50 = vmul.f32 %v461_v47, %v461_v47  ;;  %v804_v51 = vadd.f32 %v803_v43, %v773_v42  ;;  %v1187_v52 = vpop.f32.mrb[6].mxu0  ;;  %v1381_v53 = vpop.f32.mrb[6].mxu1 }
 0x104   : > { %v1063_v54 = vpack.c.bf16 %v1187_v52, %v1186_v44  ;;  %v464_v55 = vpop.f32.mrb[7].mxu0  ;;  %v1103_v56 = vpack.c.bf16 %v1381_v53, %v1377_v46  ;;  %v1385_v57 = vpop.f32.mrb[7].mxu1  ;;  %v777_v2 = vmul.f32 %v1187_v52, %v1187_v52 }
 0x105   : > { %v805_v58 = vadd.f32 %v804_v51, %v774_v50  ;;  %v1058_v59 = vpack.c.bf16 %v464_v55, %v461_v47  ;;  %v736_v60 = vadd.f32 %v735_v49, %v464_v55  ;;  %v775_v61 = vmul.f32 %v464_v55, %v464_v55 }
 0x106   : > { %1127 = vst [vmem:[%s1363_s14 + $0x18] sm:$0xff] %v1063_v54   ;;  %1135 = vst [vmem:[%s1363_s14 + $0x58] sm:$0xff] %v1103_v56   ;;  %v1098_v62 = vpack.c.bf16 %v1385_v57, %v1379_v48 }
 0x107   : > { %1126 = vst [vmem:[%s1363_s14 + $0x10] sm:$0xff] %v1058_v59   ;;  %v737_v0 = vadd.f32 %v1186_v44, %v736_v60  ;;  %v806_v1 = vadd.f32 %v805_v58, %v775_v61  ;;  %v786_v61 = vmul.f32 %v1356_v27, %v1356_v27 }
 0x108   : > { %1134 = vst [vmem:[%s1363_s14 + $0x50] sm:$0xff] %v1098_v62  }
 0x109   : > { %v807_v3 = vadd.f32 %v806_v1, %v776_v63  ;;  %v1190_v4 = vpop.f32.mrb[8].mxu0  ;;  %v738_v5 = vadd.f32 %v1187_v52, %v737_v0  ;;  %v1393_v6 = vpop.f32.mrb[8].mxu1 }
 0x10a   : > { %v477_v7 = vpop.f32.mrb[9].mxu0  ;;  %v1395_v8 = vpop.f32.mrb[9].mxu1  ;;  %v780_v23 = vmul.f32 %v1190_v4, %v1190_v4 }
 0x10b   : > { %v739_v9 = vadd.f32 %v738_v5, %v477_v7  ;;  %v778_v10 = vmul.f32 %v477_v7, %v477_v7  ;;  %v808_v11 = vadd.f32 %v807_v3, %v777_v2  ;;  %v1191_v12 = vpop.f32.mrb[10].mxu0  ;;  %v1397_v13 = vpop.f32.mrb[10].mxu1  ;;  %v787_v2 = vmul.f32 %v1369_v34, %v1369_v34 }
 0x10c   : > { %v1073_v14 = vpack.c.bf16 %v1191_v12, %v1190_v4  ;;  %v480_v15 = vpop.f32.mrb[11].mxu0  ;;  %v1113_v16 = vpack.c.bf16 %v1397_v13, %v1393_v6  ;;  %v1401_v17 = vpop.f32.mrb[11].mxu1  ;;  %v781_v28 = vmul.f32 %v1191_v12, %v1191_v12  ;;  %v788_v3 = vmul.f32 %v1354_v25, %v1354_v25 }
 0x10d   : > { %v809_v18 = vadd.f32 %v808_v11, %v778_v10  ;;  %v1068_v19 = vpack.c.bf16 %v480_v15, %v477_v7  ;;  %v740_v20 = vadd.f32 %v739_v9, %v480_v15  ;;  %v779_v21 = vmul.f32 %v480_v15, %v480_v15 }
 0x10e   : > { %1129 = vst [vmem:[%s1363_s14 + $0x28] sm:$0xff] %v1073_v14   ;;  %1137 = vst [vmem:[%s1363_s14 + $0x68] sm:$0xff] %v1113_v16   ;;  %v1108_v22 = vpack.c.bf16 %v1401_v17, %v1395_v8  ;;  %v789_v7 = vmul.f32 %v1365_v29, %v1365_v29  ;;  %v791_v15 = vmul.f32 %v1385_v57, %v1385_v57 }
 0x10f   : > { %1128 = vst [vmem:[%s1363_s14 + $0x20] sm:$0xff] %v1068_v19   ;;  %v741_v24 = vadd.f32 %v1190_v4, %v740_v20  ;;  %v810_v26 = vadd.f32 %v809_v18, %v779_v21 }
 0x110   : > { %1136 = vst [vmem:[%s1363_s14 + $0x60] sm:$0xff] %v1108_v22  }
 0x111   : > { %v811_v30 = vadd.f32 %v810_v26, %v780_v23  ;;  %v1194_v31 = vpop.f32.mrb[12].mxu0  ;;  %v742_v32 = vadd.f32 %v1191_v12, %v741_v24  ;;  %v1409_v33 = vpop.f32.mrb[12].mxu1  ;;  %v795_v24 = vmul.f32 %v1401_v17, %v1401_v17 }
 0x112   : > { %v493_v35 = vpop.f32.mrb[13].mxu0  ;;  %v557_v36 = vpop.f32.mrb[13].mxu1  ;;  %v784_v54 = vmul.f32 %v1194_v31, %v1194_v31 }
 0x113   : > { %v743_v37 = vadd.f32 %v742_v32, %v493_v35  ;;  %v782_v38 = vmul.f32 %v493_v35, %v493_v35  ;;  %v812_v39 = vadd.f32 %v811_v30, %v781_v28  ;;  %v1195_v40 = vpop.f32.mrb[14].mxu0  ;;  %v1411_v41 = vpop.f32.mrb[14].mxu1 }
 0x114   : > { %v1083_v42 = vpack.c.bf16 %v1195_v40, %v1194_v31  ;;  %v496_v43 = vpop.f32.mrb[15].mxu0  ;;  %v1123_v44 = vpack.c.bf16 %v1411_v41, %v1409_v33  ;;  %v560_v45 = vpop.f32.mrb[15].mxu1  ;;  %v785_v58 = vmul.f32 %v1195_v40, %v1195_v40 }
 0x115   : > { %v813_v47 = vadd.f32 %v812_v39, %v782_v38  ;;  %v1078_v49 = vpack.c.bf16 %v496_v43, %v493_v35  ;;  %v744_v50 = vadd.f32 %v743_v37, %v496_v43  ;;  %v783_v51 = vmul.f32 %v496_v43, %v496_v43 }
 0x116   : > { %1131 = vst [vmem:[%s1363_s14 + $0x38] sm:$0xff] %v1083_v42   ;;  %1139 = vst [vmem:[%s1363_s14 + $0x78] sm:$0xff] %v1123_v44   ;;  %v1118_v52 = vpack.c.bf16 %v560_v45, %v557_v36  ;;  %v800_v39 = vmul.f32 %v1409_v33, %v1409_v33  ;;  %v801_v42 = vmul.f32 %v1411_v41, %v1411_v41 }
 0x117   : > { %1130 = vst [vmem:[%s1363_s14 + $0x30] sm:$0xff] %v1078_v49   ;;  %v745_v55 = vadd.f32 %v1194_v31, %v744_v50  ;;  %v814_v56 = vadd.f32 %v813_v47, %v783_v51  ;;  %v798_v31 = vmul.f32 %v557_v36, %v557_v36 }
 0x118   : > { %1138 = vst [vmem:[%s1363_s14 + $0x70] sm:$0xff] %v1118_v52  }
 0x119   : > { %v815_v59 = vadd.f32 %v814_v56, %v784_v54  ;;  %v746_v60 = vadd.f32 %v1195_v40, %v745_v55 }
 0x11b   : > { %v747_v62 = vadd.f32 %v746_v60, %v1356_v27  ;;  %v816_v63 = vadd.f32 %v815_v59, %v785_v58  ;;  %v790_v27 = vmul.f32 %v1379_v48, %v1379_v48 }
 0x11d   : > { %v817_v0 = vadd.f32 %v816_v63, %v786_v61  ;;  %v748_v1 = vadd.f32 %v747_v62, %v1369_v34 }
 0x11f   : > { %v749_v4 = vadd.f32 %v1354_v25, %v748_v1  ;;  %v818_v5 = vadd.f32 %v817_v0, %v787_v2  ;;  %v792_v25 = vmul.f32 %v1377_v46, %v1377_v46 }
 0x121   : > { %v819_v9 = vadd.f32 %v818_v5, %v788_v3  ;;  %v750_v10 = vadd.f32 %v1365_v29, %v749_v4  ;;  %v793_v29 = vmul.f32 %v1381_v53, %v1381_v53 }
 0x123   : > { %v751_v11 = vadd.f32 %v750_v10, %v1379_v48  ;;  %v820_v12 = vadd.f32 %v819_v9, %v789_v7  ;;  %v794_v48 = vmul.f32 %v1395_v8, %v1395_v8 }
 0x125   : > { %v821_v14 = vadd.f32 %v820_v12, %v790_v27  ;;  %v752_v34 = vadd.f32 %v751_v11, %v1385_v57 }
 0x127   : > { %v753_v16 = vadd.f32 %v1377_v46, %v752_v34  ;;  %v822_v18 = vadd.f32 %v821_v14, %v791_v15  ;;  %v796_v46 = vmul.f32 %v1393_v6, %v1393_v6 }
 0x129   : > { %v823_v19 = vadd.f32 %v822_v18, %v792_v25  ;;  %v754_v20 = vadd.f32 %v1381_v53, %v753_v16  ;;  %v797_v53 = vmul.f32 %v1397_v13, %v1397_v13 }
 0x12b   : > { %v755_v21 = vadd.f32 %v754_v20, %v1395_v8  ;;  %v824_v22 = vadd.f32 %v823_v19, %v793_v29 }
 0x12d   : > { %v825_v23 = vadd.f32 %v824_v22, %v794_v48  ;;  %v756_v57 = vadd.f32 %v755_v21, %v1401_v17  ;;  %v799_v17 = vmul.f32 %v560_v45, %v560_v45 }
 0x12f   : > { %v757_v26 = vadd.f32 %v1393_v6, %v756_v57  ;;  %v826_v28 = vadd.f32 %v825_v23, %v795_v24 }
 0x131   : > { %v827_v30 = vadd.f32 %v826_v28, %v796_v46  ;;  %v758_v8 = vadd.f32 %v1397_v13, %v757_v26 }
 0x133   : > { %v759_v32 = vadd.f32 %v758_v8, %v557_v36  ;;  %v828_v35 = vadd.f32 %v827_v30, %v797_v53 }
 0x135   : > { %v829_v37 = vadd.f32 %v828_v35, %v798_v31  ;;  %v760_v38 = vadd.f32 %v759_v32, %v560_v45 }
 0x137   : > { %v761_v6 = vadd.f32 %v1409_v33, %v760_v38  ;;  %v830_v40 = vadd.f32 %v829_v37, %v799_v17 }
 0x139   : > { %v762_v43 = vadd.f32 %v1411_v41, %v761_v6  ;;  %v831_v44 = vadd.f32 %v830_v40, %v800_v39 }
 0x13b   : > { %v763_v13 = vrot.slane %v762_v43, 4  ;;  %v832_v47 = vadd.f32 %v831_v44, %v801_v42 }
 0x13d   : > { %v764_v36 = vadd.f32 %v763_v13, %v762_v43  ;;  %v833_v49 = vrot.slane %v832_v47, 4 }
 0x13f   : > { %v765_v50 = vrot.slane %v764_v36, 2  ;;  %v834_v51 = vadd.f32 %v833_v49, %v832_v47 }
 0x141   : > { %v766_v45 = vadd.f32 %v765_v50, %v764_v36  ;;  %v835_v52 = vrot.slane %v834_v51, 2 }
 0x143   : > { %v767_v54 = vrot.slane %v766_v45, 1  ;;  %v836_v55 = vadd.f32 %v835_v52, %v834_v51 }
 0x145   : > { %v768_v33 = vadd.f32 %v767_v54, %v766_v45  ;;  %v837_v56 = vrot.slane %v836_v55, 1 }
 0x147   : > { %769 = vst [vmem:[%s214_s19] sm:$0x1] %v768_v33  ;;  %v838_v41 = vadd.f32 %v837_v56, %v836_v55 }
 0x149   : > { %839 = vst [vmem:[%s217_s22] sm:$0x1] %v838_v41 }
 0x14a PF: > { %s15_s15 = sadd.s32 1, %s1266_s15  }
 0x14b   : > { %p12_p5 = scmp.ge.s32.totalorder %s15_s15, 4  }
 0x14d   :  { %14 = sbr.rel (!%p12_p5) target bundleno = 1 (0x1), region = 82 }

// kernel: bottleneck_pallas.6
= control target key start
LH: loop header
LB: loop body
LE: loop exit
PB: predicated region body
PF: predicated region fallthrough
CT: control target
= control target key end

     0   :  { %s1468_s21 = smov 0   ;;  %s1739_s0 = inlined_call_operand.vmem [shape: bf16[512,128], index: 0, kind: input, shape index: {}]   ;;  %s1740_s1 = inlined_call_operand.vmem [shape: f32[1,128], index: 1, kind: input, shape index: {}]   ;;  %s1741_s2 = inlined_call_operand.vmem [shape: f32[1,128], index: 2, kind: input, shape index: {}]   ;;  %s1742_s3 = inlined_call_operand.vmem [shape: bf16[128,128], index: 3, kind: input, shape index: {}]   ;;  %s1743_s4 = inlined_call_operand.vmem [shape: bf16[512,128], index: 4, kind: output, shape index: {0}]   ;;  %s1744_s5 = inlined_call_operand.vmem [shape: f32[2,1,128], index: 5, kind: output, shape index: {1}]   ;;  %s1745_s6 = inlined_call_operand.vmem [shape: f32[2,1,128], index: 6, kind: output, shape index: {2}]  }
   0x1 LB: > { %s1474_s22 = sadd.s32 4294967295, %s1431_s21   ;;  %p1066_p0 = scmp.ge.s32.totalorder %s1431_s21, 1  ;;  %s1431_s21 = sphi %s1468_s21, %s17_s21  }
   0x2   : > { %p218_p1 = scmp.lt.s32.totalorder %s1431_s21, 3 }
   0x4   : > { %p219_p2 = pnand %p1066_p0, %p218_p1 }
   0x5   : > { %v1417_v0 = vld [vmem:[%s1742_s3] sm:$0xff] (!%p219_p2)   ;;  %s1067_s25 = sshll.u32 (!%p219_p2), %s1474_s22, 5  ;;  %v1418_v1 = vld [vmem:[%s1742_s3 + $0x8] sm:$0xff] (!%p219_p2)   ;;  %v1419_v2 = vld [vmem:[%s1742_s3 + $0x10] sm:$0xff] (!%p219_p2)   ;;  %p266_p4 = scmp.lt.s32.totalorder (!%p219_p2), %s1474_s22, 1 }
   0x6   : > { %222 = sbr.rel (%p219_p2) target bundleno = 330 (0x14a), region = 36  ;;  %p255_p3 = scmp.lt.s32.totalorder (!%p219_p2), %s1067_s25, 63  ;;  %1345 = vmatprep.subr.bf16.mxu0 (!%p219_p2), %v1417_v0  ;;  %1393 = vmatprep.subr.bf16.mxu1 (!%p219_p2), %v1417_v0  ;;  %v1420_v3 = vld [vmem:[%s1742_s3 + $0x18] sm:$0xff] (!%p219_p2)   ;;  %v1505_v5 = vld [vmem:[%s1740_s1] ss:$0 sm:$0xff] (!%p219_p2)  ;;  %v1422_v34 = vld [vmem:[%s1742_s3 + $0x28] sm:$0xff] (!%p219_p2)  }
   0x7   : > { %1346 = vmatpush3.bf16.msra.mxu0 (!%p219_p2), %v1417_v0  ;;  %1401 = vmatpush3.bf16.msra.mxu1 (!%p219_p2), %v1417_v0  ;;  %v1513_v11 = vld [vmem:[%s1741_s2] ss:$0 sm:$0xff] (!%p219_p2)  ;;  %v1423_v49 = vld [vmem:[%s1742_s3 + $0x30] sm:$0xff] (!%p219_p2)   ;;  %v1424_v63 = vld [vmem:[%s1742_s3 + $0x38] sm:$0xff] (!%p219_p2)  }
   0x8   : > { %1347 = vmatprep.subr.bf16.mxu0 (!%p219_p2), %v1418_v1  ;;  %1394 = vmatprep.subr.bf16.mxu1 (!%p219_p2), %v1418_v1  ;;  %v1421_v20 = vld [vmem:[%s1742_s3 + $0x20] sm:$0xff] (!%p219_p2)  }
   0xb   : > { %1348 = vmatpush3.bf16.msra.mxu0 (!%p219_p2), %v1418_v1  ;;  %1402 = vmatpush3.bf16.msra.mxu1 (!%p219_p2), %v1418_v1 }
   0xc   : > { %1349 = vmatprep.subr.bf16.mxu0 (!%p219_p2), %v1419_v2  ;;  %1395 = vmatprep.subr.bf16.mxu1 (!%p219_p2), %v1419_v2 }
   0xd   : > { %s1747_s25 = smov (!%p255_p3, %s1067_s25), 63  ;;  %s1749_s22 = smov (!%p266_p4, %s1474_s22), 1 }
   0xe   : > { %s1068_s30 = sshll.u32 %s1747_s25, 2  ;;  %s268_s7 = scalar_lea.vmem %s1744_s5, %s1749_s22 }
   0xf   : > { %s1496_s9 = scalar_lea.vmem %s1739_s0, %s1068_s30  ;;  %1350 = vmatpush3.bf16.msra.mxu0 %v1419_v2  ;;  %1403 = vmatpush3.bf16.msra.mxu1 %v1419_v2  ;;  %s1638_s29 = scalar_lea.vmem %s1743_s4, %s1068_s30 }
  0x10   : > { %v1148_v4 = vld [vmem:[%s1496_s9] sm:$0xff]   ;;  %v1291_v8 = vld [vmem:[%s1496_s9 + $0x8] sm:$0xff]   ;;  %v1292_v9 = vld [vmem:[%s1496_s9 + $0x10] sm:$0xff]   ;;  %1351 = vmatprep.subr.bf16.mxu0 %v1420_v3  ;;  %1396 = vmatprep.subr.bf16.mxu1 %v1420_v3  ;;  %s271_s10 = scalar_lea.vmem %s1745_s6, %s1749_s22 }
  0x11   : > { %v1149_v6 = vunpack.c.l.bf16 %v1148_v4  ;;  %v1150_v7 = vunpack.c.h.bf16 %v1148_v4  ;;  %v1293_v10 = vld [vmem:[%s1496_s9 + $0x18] sm:$0xff]   ;;  %v1153_v12 = vunpack.c.l.bf16 %v1291_v8  ;;  %v1154_v13 = vunpack.c.h.bf16 %v1291_v8  ;;  %v1294_v29 = vld [vmem:[%s1496_s9 + $0x20] sm:$0xff]   ;;  %v1295_v33 = vld [vmem:[%s1496_s9 + $0x28] sm:$0xff]  }
  0x12   : > { %v1157_v14 = vunpack.c.l.bf16 %v1292_v9  ;;  %v1158_v15 = vunpack.c.h.bf16 %v1292_v9  ;;  %v1161_v18 = vunpack.c.l.bf16 %v1293_v10  ;;  %v1162_v19 = vunpack.c.h.bf16 %v1293_v10  ;;  %v1296_v42 = vld [vmem:[%s1496_s9 + $0x30] sm:$0xff]   ;;  %v1542_v48 = vld [vmem:[%s1496_s9 + $0x38] sm:$0xff]   ;;  %v1298_v60 = vld [vmem:[%s1496_s9 + $0x40] sm:$0xff]  }
  0x13   : > { %v344_v16 = vmul.f32 %v1149_v6, %v1505_v5  ;;  %v345_v17 = vmul.f32 %v1150_v7, %v1505_v5  ;;  %v346_v21 = vmul.f32 %v1153_v12, %v1505_v5  ;;  %v347_v22 = vmul.f32 %v1154_v13, %v1505_v5  ;;  %1352 = vmatpush3.bf16.msra.mxu0 %v1420_v3  ;;  %v1300_v9 = vld [vmem:[%s1496_s9 + $0x50] sm:$0xff]  }
  0x14   : > { %v348_v23 = vmul.f32 %v1157_v14, %v1505_v5  ;;  %v349_v24 = vmul.f32 %v1158_v15, %v1505_v5  ;;  %v350_v27 = vmul.f32 %v1161_v18, %v1505_v5  ;;  %v351_v28 = vmul.f32 %v1162_v19, %v1505_v5  ;;  %1404 = vmatpush3.bf16.msra.mxu1 %v1420_v3  ;;  %v1299_v3 = vld [vmem:[%s1496_s9 + $0x48] sm:$0xff]   ;;  %v1301_v19 = vld [vmem:[%s1496_s9 + $0x58] sm:$0xff]  }
  0x15   : > { %v383_v25 = vadd.f32 %v1513_v11, %v344_v16  ;;  %v384_v26 = vadd.f32 %v1513_v11, %v345_v17  ;;  %v385_v32 = vadd.f32 %v1513_v11, %v346_v21  ;;  %1353 = vmatprep.subr.bf16.mxu0 %v1421_v20  ;;  %v386_v35 = vadd.f32 %v1513_v11, %v347_v22 }
  0x16   : > { %v387_v36 = vadd.f32 %v1513_v11, %v348_v23  ;;  %v388_v37 = vadd.f32 %v1513_v11, %v349_v24  ;;  %1397 = vmatprep.subr.bf16.mxu1 %v1421_v20  ;;  %v389_v39 = vadd.f32 %v1513_v11, %v350_v27  ;;  %v390_v40 = vadd.f32 %v1513_v11, %v351_v28 }
  0x17   : > { %v415_v30 = vmax.f32 %v383_v25, 0.0  ;;  %v416_v31 = vmax.f32 %v384_v26, 0.0  ;;  %v1165_v41 = vunpack.c.l.bf16 %v1294_v29  ;;  %v1166_v43 = vunpack.c.h.bf16 %v1294_v29  ;;  %1354 = vmatpush3.bf16.msra.mxu0 %v1421_v20 }
  0x18   : > { %v1169_v44 = vunpack.c.l.bf16 %v1295_v33  ;;  %v417_v45 = vmax.f32 %v385_v32, 0.0  ;;  %v1170_v47 = vunpack.c.h.bf16 %v1295_v33  ;;  %1355 = vmatprep.subr.bf16.mxu0 %v1422_v34  ;;  %v418_v50 = vmax.f32 %v386_v35, 0.0  ;;  %1405 = vmatpush3.bf16.msra.mxu1 %v1421_v20  ;;  %v1302_v32 = vld [vmem:[%s1496_s9 + $0x60] sm:$0xff]  }
  0x19   : > { %v447_v38 = vpack.c.bf16 %v416_v31, %v415_v30  ;;  %v352_v46 = vmul.f32 %v1165_v41, %v1505_v5  ;;  %v419_v51 = vmax.f32 %v387_v36, 0.0  ;;  %v420_v52 = vmax.f32 %v388_v37, 0.0  ;;  %1398 = vmatprep.subr.bf16.mxu1 %v1422_v34 }
  0x1a   : > { %v1173_v53 = vunpack.c.l.bf16 %v1296_v42  ;;  %v421_v54 = vmax.f32 %v389_v39, 0.0  ;;  %v422_v55 = vmax.f32 %v390_v40, 0.0  ;;  %v353_v56 = vmul.f32 %v1166_v43, %v1505_v5 }
  0x1b   : > { %1361 = vmatprep.mubr.bf16.mxu0 %v447_v38  ;;  %v354_v57 = vmul.f32 %v1169_v44, %v1505_v5  ;;  %v1174_v58 = vunpack.c.h.bf16 %v1296_v42  ;;  %v1177_v59 = vunpack.c.l.bf16 %v1542_v48  ;;  %1356 = vmatpush3.bf16.msra.mxu0 %v1422_v34  ;;  %v1552_v61 = vadd.f32 %v1513_v11, %v352_v46 }
  0x1c   : > { %v355_v62 = vmul.f32 %v1170_v47, %v1505_v5  ;;  %1357 = vmatprep.subr.bf16.mxu0 %v1423_v49  ;;  %v448_v0 = vpack.c.bf16 %v418_v50, %v417_v45  ;;  %v449_v1 = vpack.c.bf16 %v420_v52, %v419_v51  ;;  %1406 = vmatpush3.bf16.msra.mxu1 %v1422_v34  ;;  %v1178_v7 = vunpack.c.h.bf16 %v1542_v48  ;;  %v1303_v45 = vld [vmem:[%s1496_s9 + $0x68] sm:$0xff]  }
  0x1d   : > { %v356_v2 = vmul.f32 %v1173_v53, %v1505_v5  ;;  %v1560_v4 = vpack.c.bf16 %v422_v55, %v421_v54  ;;  %v1563_v6 = vadd.f32 %v1513_v11, %v353_v56  ;;  %1399 = vmatprep.subr.bf16.mxu1 %v1423_v49  ;;  %v1181_v8 = vunpack.c.l.bf16 %v1298_v60  ;;  %v1304_v55 = vld [vmem:[%s1496_s9 + $0x70] sm:$0xff]  }
  0x1e   : > { %v1568_v10 = vadd.f32 %v1513_v11, %v354_v57  ;;  %v1571_v12 = vmul.f32 %v1174_v58, %v1505_v5  ;;  %v1574_v13 = vmul.f32 %v1177_v59, %v1505_v5  ;;  %v1182_v14 = vunpack.c.h.bf16 %v1298_v60 }
  0x1f   : > { %1358 = vmatpush3.bf16.msra.mxu0 %v1423_v49  ;;  %v423_v15 = vmax.f32 %v1552_v61, 0.0  ;;  %v1578_v16 = vadd.f32 %v1513_v11, %v355_v62  ;;  %v360_v17 = vmul.f32 %v1181_v8, %v1505_v5  ;;  %v1185_v18 = vunpack.c.l.bf16 %v1299_v3 }
  0x20   : > { %1359 = vmatprep.subr.bf16.mxu0 %v1424_v63  ;;  %1407 = vmatpush3.bf16.msra.mxu1 %v1423_v49  ;;  %v1583_v20 = vadd.f32 %v1513_v11, %v356_v2  ;;  %v361_v21 = vmul.f32 %v1182_v14, %v1505_v5  ;;  %v1186_v22 = vunpack.c.h.bf16 %v1299_v3  ;;  %v1189_v23 = vunpack.c.l.bf16 %v1300_v9 }
  0x21   : > { %v424_v24 = vmax.f32 %v1563_v6, 0.0  ;;  %1400 = vmatprep.subr.bf16.mxu1 %v1424_v63  ;;  %v399_v25 = vadd.f32 %v1513_v11, %v360_v17  ;;  %v362_v26 = vmul.f32 %v1185_v18, %v1505_v5  ;;  %v1190_v27 = vunpack.c.h.bf16 %v1300_v9  ;;  %v1305_v17 = vld [vmem:[%s1496_s9 + $0x78] sm:$0xff]  }
  0x22   : > { %v400_v28 = vadd.f32 %v1513_v11, %v361_v21  ;;  %v363_v29 = vmul.f32 %v1186_v22, %v1505_v5  ;;  %v364_v30 = vmul.f32 %v1189_v23, %v1505_v5  ;;  %v1193_v31 = vunpack.c.l.bf16 %v1301_v19 }
  0x23   : > { %1360 = vmatpush3.bf16.msra.mxu0 %v1424_v63  ;;  %v431_v33 = vmax.f32 %v399_v25, 0.0  ;;  %v401_v34 = vadd.f32 %v1513_v11, %v362_v26  ;;  %v365_v35 = vmul.f32 %v1190_v27, %v1505_v5  ;;  %v1194_v36 = vunpack.c.h.bf16 %v1301_v19 }
  0x24   : > { %1408 = vmatpush3.bf16.msra.mxu1 %v1424_v63  ;;  %v432_v37 = vmax.f32 %v400_v28, 0.0  ;;  %v402_v38 = vadd.f32 %v1513_v11, %v363_v29  ;;  %v403_v39 = vadd.f32 %v1513_v11, %v364_v30  ;;  %v366_v40 = vmul.f32 %v1193_v31, %v1505_v5 }
  0x25   : > { %v433_v41 = vmax.f32 %v401_v34, 0.0  ;;  %v404_v42 = vadd.f32 %v1513_v11, %v365_v35  ;;  %v367_v43 = vmul.f32 %v1194_v36, %v1505_v5  ;;  %v1197_v44 = vunpack.c.l.bf16 %v1302_v32 }
  0x26   : > { %1362 = vmatmul.mubr.bf16.vlgmr.msra.gmra.mrb[0].mxu0 %v448_v0  ;;  %v455_v46 = vpack.c.bf16 %v432_v37, %v431_v33  ;;  %v434_v47 = vmax.f32 %v402_v38, 0.0  ;;  %v435_v49 = vmax.f32 %v403_v39, 0.0  ;;  %v405_v50 = vadd.f32 %v1513_v11, %v366_v40 }
  0x27   : > { %1365 = vmatprep.mubr.bf16.mxu0 %v449_v1  ;;  %v436_v51 = vmax.f32 %v404_v42, 0.0  ;;  %v406_v52 = vadd.f32 %v1513_v11, %v367_v43  ;;  %v1198_v53 = vunpack.c.h.bf16 %v1302_v32  ;;  %v368_v54 = vmul.f32 %v1197_v44, %v1505_v5 }
  0x28   : > { %1377 = vmatprep.mubr.bf16.mxu1 %v455_v46  ;;  %v456_v56 = vpack.c.bf16 %v434_v47, %v433_v41  ;;  %v437_v57 = vmax.f32 %v405_v50, 0.0  ;;  %v1201_v58 = vunpack.c.l.bf16 %v1303_v45  ;;  %v1202_v59 = vunpack.c.h.bf16 %v1303_v45 }
  0x29   : > { %v457_v60 = vpack.c.bf16 %v436_v51, %v435_v49  ;;  %v438_v61 = vmax.f32 %v406_v52, 0.0  ;;  %v369_v62 = vmul.f32 %v1198_v53, %v1505_v5  ;;  %v407_v63 = vadd.f32 %v1513_v11, %v368_v54 }
  0x2a   : > { %1378 = vmatmul.mubr.bf16.vlgmr.msra.gmra.mrb[0].mxu1 %v456_v56  ;;  %v370_v0 = vmul.f32 %v1201_v58, %v1505_v5  ;;  %v371_v1 = vmul.f32 %v1202_v59, %v1505_v5  ;;  %v1205_v2 = vunpack.c.l.bf16 %v1304_v55  ;;  %v1206_v3 = vunpack.c.h.bf16 %v1304_v55 }
  0x2b   : > { %v451_v6 = vpack.c.bf16 %v424_v24, %v423_v15  ;;  %v396_v8 = vadd.f32 %v1513_v11, %v1571_v12  ;;  %1381 = vmatprep.mubr.bf16.mxu1 %v457_v60  ;;  %v408_v9 = vadd.f32 %v1513_v11, %v369_v62  ;;  %v439_v14 = vmax.f32 %v407_v63, 0.0 }
  0x2c   : > { %v425_v18 = vmax.f32 %v1568_v10, 0.0  ;;  %v359_v19 = vmul.f32 %v1178_v7, %v1505_v5  ;;  %v372_v21 = vmul.f32 %v1205_v2, %v1505_v5  ;;  %v373_v22 = vmul.f32 %v1206_v3, %v1505_v5 }
  0x2d   : > { %v426_v15 = vmax.f32 %v1578_v16, 0.0  ;;  %v427_v23 = vmax.f32 %v1583_v20, 0.0  ;;  %v458_v12 = vpack.c.bf16 %v438_v61, %v437_v57  ;;  %v440_v24 = vmax.f32 %v408_v9, 0.0 }
  0x2e   : > { %1366 = vmatmul.mubr.bf16.gmra.mrb[4].mxu0 %v1560_v4  ;;  %v409_v25 = vadd.f32 %v1513_v11, %v370_v0  ;;  %v410_v10 = vadd.f32 %v1513_v11, %v371_v1  ;;  %v1209_v26 = vunpack.c.l.bf16 %v1305_v17  ;;  %v1210_v27 = vunpack.c.h.bf16 %v1305_v17 }
  0x2f   : > { %1369 = vmatprep.mubr.bf16.mxu0 %v451_v6  ;;  %v428_v48 = vmax.f32 %v396_v8, 0.0  ;;  %v459_v7 = vpack.c.bf16 %v440_v24, %v439_v14  ;;  %v411_v28 = vadd.f32 %v1513_v11, %v372_v21  ;;  %v412_v29 = vadd.f32 %v1513_v11, %v373_v22 }
  0x30   : > { %v452_v16 = vpack.c.bf16 %v426_v15, %v425_v18  ;;  %v397_v20 = vadd.f32 %v1513_v11, %v1574_v13  ;;  %v398_v30 = vadd.f32 %v1513_v11, %v359_v19  ;;  %v441_v4 = vmax.f32 %v409_v25, 0.0 }
  0x31   : > { %v442_v31 = vmax.f32 %v410_v10, 0.0  ;;  %v374_v32 = vmul.f32 %v1209_v26, %v1505_v5  ;;  %v375_v33 = vmul.f32 %v1210_v27, %v1505_v5  ;;  %v453_v34 = vpack.c.bf16 %v428_v48, %v427_v23 }
  0x32   : > { %1382 = vmatmul.mubr.bf16.gmra.mrb[4].mxu1 %v458_v12  ;;  %v443_v35 = vmax.f32 %v411_v28, 0.0  ;;  %v444_v36 = vmax.f32 %v412_v29, 0.0  ;;  %v429_v37 = vmax.f32 %v397_v20, 0.0  ;;  %v430_v38 = vmax.f32 %v398_v30, 0.0 }
  0x33   : > { %1385 = vmatprep.mubr.bf16.mxu1 %v459_v7  ;;  %v460_v39 = vpack.c.bf16 %v442_v31, %v441_v4  ;;  %v413_v13 = vadd.f32 %v1513_v11, %v374_v32  ;;  %v414_v40 = vadd.f32 %v1513_v11, %v375_v33 }
  0x34   : > { %v461_v41 = vpack.c.bf16 %v444_v36, %v443_v35  ;;  %v454_v42 = vpack.c.bf16 %v430_v38, %v429_v37 }
  0x35   : > { %v445_v43 = vmax.f32 %v413_v13, 0.0  ;;  %v446_v44 = vmax.f32 %v414_v40, 0.0 }
  0x36   : > { %1370 = vmatmul.mubr.bf16.gmra.mrb[8].mxu0 %v452_v16 }
  0x37   : > { %1373 = vmatprep.mubr.bf16.mxu0 %v453_v34  ;;  %v462_v5 = vpack.c.bf16 %v446_v44, %v445_v43 }
  0x3a   : > { %1386 = vmatmul.mubr.bf16.gmra.mrb[8].mxu1 %v460_v39 }
  0x3b   : > { %1389 = vmatprep.mubr.bf16.mxu1 %v461_v41 }
  0x3e   : > { %1374 = vmatmul.mubr.bf16.gmra.mrb[12].mxu0 %v454_v42 }
  0x42   : > { %1390 = vmatmul.mubr.bf16.gmra.mrb[12].mxu1 %v462_v5 }
  0xf9   : > { %v1363_v45 = vpop.f32.mrb[0].mxu0 }
  0xfa   : > { %v561_v46 = vpop.f32.mrb[1].mxu0  ;;  %v888_v56 = vmul.f32 %v1363_v45, %v1363_v45 }
  0xfb   : > { %v1364_v11 = vpop.f32.mrb[2].mxu0  ;;  %v886_v50 = vmul.f32 %v561_v46, %v561_v46 }
  0xfc   : > { %v1219_v47 = vpack.c.bf16 %v1364_v11, %v1363_v45  ;;  %v564_v49 = vpop.f32.mrb[3].mxu0  ;;  %v889_v62 = vmul.f32 %v1364_v11, %v1364_v11 }
  0xfd   : > { %v1214_v51 = vpack.c.bf16 %v564_v49, %v561_v46  ;;  %v848_v52 = vadd.f32 %v564_v49, %v561_v46  ;;  %v887_v53 = vmul.f32 %v564_v49, %v564_v49  ;;  %v1640_v54 = vpop.f32.mrb[0].mxu1 }
  0xfe   : > { %1306 = vst [vmem:[%s1638_s29 + $0x8] sm:$0xff] %v1219_v47   ;;  %v1643_v55 = vpop.f32.mrb[1].mxu1 }
  0xff   : > { %1215 = vst [vmem:[%s1638_s29] sm:$0xff] %v1214_v51   ;;  %v849_v57 = vadd.f32 %v1363_v45, %v848_v52  ;;  %v918_v58 = vadd.f32 %v887_v53, %v886_v50  ;;  %v1646_v59 = vpop.f32.mrb[2].mxu1 }
 0x100   : > { %v1259_v60 = vpack.c.bf16 %v1646_v59, %v1640_v54  ;;  %v1650_v61 = vpop.f32.mrb[3].mxu1 }
 0x101   : > { %v919_v63 = vadd.f32 %v918_v58, %v888_v56  ;;  %v1367_v0 = vpop.f32.mrb[4].mxu0  ;;  %v850_v1 = vadd.f32 %v1364_v11, %v849_v57  ;;  %v1254_v2 = vpack.c.bf16 %v1650_v61, %v1643_v55 }
 0x102   : > { %v577_v3 = vpop.f32.mrb[5].mxu0  ;;  %1314 = vst [vmem:[%s1638_s29 + $0x48] sm:$0xff] %v1259_v60   ;;  %v892_v24 = vmul.f32 %v1367_v0, %v1367_v0 }
 0x103   : > { %v851_v6 = vadd.f32 %v850_v1, %v577_v3  ;;  %v890_v8 = vmul.f32 %v577_v3, %v577_v3  ;;  %v920_v9 = vadd.f32 %v919_v63, %v889_v62  ;;  %v1368_v14 = vpop.f32.mrb[6].mxu0  ;;  %1313 = vst [vmem:[%s1638_s29 + $0x40] sm:$0xff] %v1254_v2  }
 0x104   : > { %v1229_v17 = vpack.c.bf16 %v1368_v14, %v1367_v0  ;;  %v580_v18 = vpop.f32.mrb[7].mxu0  ;;  %v893_v7 = vmul.f32 %v1368_v14, %v1368_v14 }
 0x105   : > { %v921_v19 = vadd.f32 %v920_v9, %v890_v8  ;;  %v1224_v21 = vpack.c.bf16 %v580_v18, %v577_v3  ;;  %v852_v22 = vadd.f32 %v851_v6, %v580_v18  ;;  %v891_v15 = vmul.f32 %v580_v18, %v580_v18  ;;  %v1656_v23 = vpop.f32.mrb[4].mxu1 }
 0x106   : > { %1308 = vst [vmem:[%s1638_s29 + $0x18] sm:$0xff] %v1229_v17   ;;  %v1659_v12 = vpop.f32.mrb[5].mxu1  ;;  %v902_v17 = vmul.f32 %v1643_v55, %v1643_v55 }
 0x107   : > { %1307 = vst [vmem:[%s1638_s29 + $0x10] sm:$0xff] %v1224_v21   ;;  %v853_v25 = vadd.f32 %v1367_v0, %v852_v22  ;;  %v922_v10 = vadd.f32 %v921_v19, %v891_v15  ;;  %v1662_v26 = vpop.f32.mrb[6].mxu1 }
 0x108   : > { %v1269_v27 = vpack.c.bf16 %v1662_v26, %v1656_v23  ;;  %v1666_v48 = vpop.f32.mrb[7].mxu1 }
 0x109   : > { %v923_v28 = vadd.f32 %v922_v10, %v892_v24  ;;  %v1371_v29 = vpop.f32.mrb[8].mxu0  ;;  %v854_v16 = vadd.f32 %v1368_v14, %v853_v25  ;;  %v1264_v20 = vpack.c.bf16 %v1666_v48, %v1659_v12 }
 0x10a   : > { %v593_v30 = vpop.f32.mrb[9].mxu0  ;;  %1316 = vst [vmem:[%s1638_s29 + $0x58] sm:$0xff] %v1269_v27   ;;  %v896_v41 = vmul.f32 %v1371_v29, %v1371_v29 }
 0x10b   : > { %v855_v4 = vadd.f32 %v854_v16, %v593_v30  ;;  %v894_v31 = vmul.f32 %v593_v30, %v593_v30  ;;  %v924_v32 = vadd.f32 %v923_v28, %v893_v7  ;;  %v1372_v33 = vpop.f32.mrb[10].mxu0  ;;  %1315 = vst [vmem:[%s1638_s29 + $0x50] sm:$0xff] %v1264_v20   ;;  %v903_v28 = vmul.f32 %v1650_v61, %v1650_v61 }
 0x10c   : > { %v1239_v34 = vpack.c.bf16 %v1372_v33, %v1371_v29  ;;  %v596_v35 = vpop.f32.mrb[11].mxu0  ;;  %v897_v46 = vmul.f32 %v1372_v33, %v1372_v33 }
 0x10d   : > { %v925_v36 = vadd.f32 %v924_v32, %v894_v31  ;;  %v1234_v37 = vpack.c.bf16 %v596_v35, %v593_v30  ;;  %v856_v38 = vadd.f32 %v855_v4, %v596_v35  ;;  %v895_v39 = vmul.f32 %v596_v35, %v596_v35  ;;  %v1672_v13 = vpop.f32.mrb[8].mxu1 }
 0x10e   : > { %1310 = vst [vmem:[%s1638_s29 + $0x28] sm:$0xff] %v1239_v34   ;;  %v1675_v40 = vpop.f32.mrb[9].mxu1  ;;  %v905_v30 = vmul.f32 %v1646_v59, %v1646_v59  ;;  %v906_v31 = vmul.f32 %v1659_v12, %v1659_v12  ;;  %v907_v35 = vmul.f32 %v1666_v48, %v1666_v48 }
 0x10f   : > { %1309 = vst [vmem:[%s1638_s29 + $0x20] sm:$0xff] %v1234_v37   ;;  %v857_v42 = vadd.f32 %v1371_v29, %v856_v38  ;;  %v926_v43 = vadd.f32 %v925_v36, %v895_v39  ;;  %v1678_v44 = vpop.f32.mrb[10].mxu1  ;;  %v904_v29 = vmul.f32 %v1640_v54, %v1640_v54 }
 0x110   : > { %v1279_v5 = vpack.c.bf16 %v1678_v44, %v1672_v13  ;;  %v1682_v45 = vpop.f32.mrb[11].mxu1 }
 0x111   : > { %v927_v11 = vadd.f32 %v926_v43, %v896_v41  ;;  %v1375_v47 = vpop.f32.mrb[12].mxu0  ;;  %v858_v49 = vadd.f32 %v1372_v33, %v857_v42  ;;  %v1274_v50 = vpack.c.bf16 %v1682_v45, %v1675_v40 }
 0x112   : > { %v609_v51 = vpop.f32.mrb[13].mxu0  ;;  %1318 = vst [vmem:[%s1638_s29 + $0x68] sm:$0xff] %v1279_v5   ;;  %v900_v6 = vmul.f32 %v1375_v47, %v1375_v47  ;;  %v911_v5 = vmul.f32 %v1682_v45, %v1682_v45 }
 0x113   : > { %v859_v52 = vadd.f32 %v858_v49, %v609_v51  ;;  %v898_v53 = vmul.f32 %v609_v51, %v609_v51  ;;  %v928_v56 = vadd.f32 %v927_v11, %v897_v46  ;;  %v1376_v57 = vpop.f32.mrb[14].mxu0  ;;  %1317 = vst [vmem:[%s1638_s29 + $0x60] sm:$0xff] %v1274_v50  }
 0x114   : > { %v1249_v58 = vpack.c.bf16 %v1376_v57, %v1375_v47  ;;  %v612_v60 = vpop.f32.mrb[15].mxu0  ;;  %v901_v21 = vmul.f32 %v1376_v57, %v1376_v57 }
 0x115   : > { %v929_v62 = vadd.f32 %v928_v56, %v898_v53  ;;  %v1244_v63 = vpack.c.bf16 %v612_v60, %v609_v51  ;;  %v860_v0 = vadd.f32 %v859_v52, %v612_v60  ;;  %v899_v1 = vmul.f32 %v612_v60, %v612_v60  ;;  %v1391_v2 = vpop.f32.mrb[12].mxu1 }
 0x116   : > { %1312 = vst [vmem:[%s1638_s29 + $0x38] sm:$0xff] %v1249_v58   ;;  %v673_v3 = vpop.f32.mrb[13].mxu1  ;;  %v916_v56 = vmul.f32 %v1391_v2, %v1391_v2 }
 0x117   : > { %1311 = vst [vmem:[%s1638_s29 + $0x30] sm:$0xff] %v1244_v63   ;;  %v861_v8 = vadd.f32 %v1375_v47, %v860_v0  ;;  %v930_v9 = vadd.f32 %v929_v62, %v899_v1  ;;  %v1392_v14 = vpop.f32.mrb[14].mxu1  ;;  %v914_v49 = vmul.f32 %v673_v3, %v673_v3 }
 0x118   : > { %v1289_v18 = vpack.c.bf16 %v1392_v14, %v1391_v2  ;;  %v676_v19 = vpop.f32.mrb[15].mxu1  ;;  %v917_v60 = vmul.f32 %v1392_v14, %v1392_v14 }
 0x119   : > { %v931_v22 = vadd.f32 %v930_v9, %v900_v6  ;;  %v862_v15 = vadd.f32 %v1376_v57, %v861_v8  ;;  %v1284_v24 = vpack.c.bf16 %v676_v19, %v673_v3 }
 0x11a   : > { %1320 = vst [vmem:[%s1638_s29 + $0x78] sm:$0xff] %v1289_v18  }
 0x11b   : > { %v863_v25 = vadd.f32 %v862_v15, %v1643_v55  ;;  %v932_v10 = vadd.f32 %v931_v22, %v901_v21  ;;  %1319 = vst [vmem:[%s1638_s29 + $0x70] sm:$0xff] %v1284_v24  }
 0x11d   : > { %v933_v27 = vadd.f32 %v932_v10, %v902_v17  ;;  %v864_v7 = vadd.f32 %v863_v25, %v1650_v61 }
 0x11f   : > { %v865_v16 = vadd.f32 %v1640_v54, %v864_v7  ;;  %v934_v20 = vadd.f32 %v933_v27, %v903_v28  ;;  %v908_v54 = vmul.f32 %v1656_v23, %v1656_v23 }
 0x121   : > { %v935_v4 = vadd.f32 %v934_v20, %v904_v29  ;;  %v866_v55 = vadd.f32 %v1646_v59, %v865_v16  ;;  %v909_v59 = vmul.f32 %v1662_v26, %v1662_v26 }
 0x123   : > { %v867_v32 = vadd.f32 %v866_v55, %v1659_v12  ;;  %v936_v33 = vadd.f32 %v935_v4, %v905_v30  ;;  %v910_v12 = vmul.f32 %v1675_v40, %v1675_v40 }
 0x125   : > { %v937_v34 = vadd.f32 %v936_v33, %v906_v31  ;;  %v868_v61 = vadd.f32 %v867_v32, %v1666_v48 }
 0x127   : > { %v869_v36 = vadd.f32 %v1656_v23, %v868_v61  ;;  %v938_v37 = vadd.f32 %v937_v34, %v907_v35  ;;  %v912_v23 = vmul.f32 %v1672_v13, %v1672_v13 }
 0x129   : > { %v939_v38 = vadd.f32 %v938_v37, %v908_v54  ;;  %v870_v39 = vadd.f32 %v1662_v26, %v869_v36  ;;  %v913_v26 = vmul.f32 %v1678_v44, %v1678_v44 }
 0x12b   : > { %v871_v41 = vadd.f32 %v870_v39, %v1675_v40  ;;  %v940_v42 = vadd.f32 %v939_v38, %v909_v59 }
 0x12d   : > { %v941_v43 = vadd.f32 %v940_v42, %v910_v12  ;;  %v872_v48 = vadd.f32 %v871_v41, %v1682_v45  ;;  %v915_v45 = vmul.f32 %v676_v19, %v676_v19 }
 0x12f   : > { %v873_v46 = vadd.f32 %v1672_v13, %v872_v48  ;;  %v942_v11 = vadd.f32 %v941_v43, %v911_v5 }
 0x131   : > { %v943_v47 = vadd.f32 %v942_v11, %v912_v23  ;;  %v874_v40 = vadd.f32 %v1678_v44, %v873_v46 }
 0x133   : > { %v875_v50 = vadd.f32 %v874_v40, %v673_v3  ;;  %v944_v51 = vadd.f32 %v943_v47, %v913_v26 }
 0x135   : > { %v945_v52 = vadd.f32 %v944_v51, %v914_v49  ;;  %v876_v53 = vadd.f32 %v875_v50, %v676_v19 }
 0x137   : > { %v877_v57 = vadd.f32 %v1391_v2, %v876_v53  ;;  %v946_v58 = vadd.f32 %v945_v52, %v915_v45 }
 0x139   : > { %v878_v13 = vadd.f32 %v1392_v14, %v877_v57  ;;  %v947_v62 = vadd.f32 %v946_v58, %v916_v56 }
 0x13b   : > { %v879_v63 = vrot.slane %v878_v13, 4  ;;  %v948_v0 = vadd.f32 %v947_v62, %v917_v60 }
 0x13d   : > { %v880_v1 = vadd.f32 %v879_v63, %v878_v13  ;;  %v949_v6 = vrot.slane %v948_v0, 4 }
 0x13f   : > { %v881_v8 = vrot.slane %v880_v1, 2  ;;  %v950_v44 = vadd.f32 %v949_v6, %v948_v0 }
 0x141   : > { %v882_v3 = vadd.f32 %v881_v8, %v880_v1  ;;  %v951_v9 = vrot.slane %v950_v44, 2 }
 0x143   : > { %v883_v17 = vrot.slane %v882_v3, 1  ;;  %v952_v18 = vadd.f32 %v951_v9, %v950_v44 }
 0x145   : > { %v884_v2 = vadd.f32 %v883_v17, %v882_v3  ;;  %v953_v19 = vrot.slane %v952_v18, 1 }
 0x147   : > { %885 = vst [vmem:[%s268_s7] sm:$0x1] %v884_v2  ;;  %v954_v14 = vadd.f32 %v953_v19, %v952_v18 }
 0x149   : > { %955 = vst [vmem:[%s271_s10] sm:$0x1] %v954_v14 }
 0x14a PF: > { %s17_s21 = sadd.s32 1, %s1431_s21  }
 0x14b   : > { %p14_p5 = scmp.ge.s32.totalorder %s17_s21, 4  }
 0x14d   :  { %16 = sbr.rel (!%p14_p5) target bundleno = 1 (0x1), region = 90 }

// kernel: bottleneck_pallas.7
= control target key start
LH: loop header
LB: loop body
LE: loop exit
PB: predicated region body
PF: predicated region fallthrough
CT: control target
= control target key end

     0   :  { %s696_s15 = smov 0   ;;  %s884_s0 = inlined_call_operand.vmem [shape: bf16[512,128], index: 0, kind: input, shape index: {}]   ;;  %s885_s1 = inlined_call_operand.vmem [shape: f32[1,128], index: 1, kind: input, shape index: {}]   ;;  %s886_s2 = inlined_call_operand.vmem [shape: f32[1,128], index: 2, kind: input, shape index: {}]   ;;  %s887_s3 = inlined_call_operand.vmem [shape: f32[512,128], index: 3, kind: input, shape index: {}]   ;;  %s888_s4 = inlined_call_operand.vmem [shape: f32[512,128], index: 4, kind: output, shape index: {}]  }
   0x1 LB: > { %s561_s16 = sadd.s32 4294967295, %s669_s15   ;;  %p565_p0 = scmp.ge.s32.totalorder %s669_s15, 1  ;;  %s669_s15 = sphi %s696_s15, %s14_s15  }
   0x2   : > { %p174_p1 = scmp.lt.s32.totalorder %s669_s15, 3 }
   0x4   : > { %p175_p2 = pnand %p565_p0, %p174_p1 }
   0x5   : > { %s566_s17 = sshll.u32 (!%p175_p2), %s561_s16, 5  ;;  %v717_v1 = vld [vmem:[%s885_s1] ss:$0 sm:$0xff] (!%p175_p2) }
   0x6   : > { %178 = sbr.rel (%p175_p2) target bundleno = 60 (0x3c), region = 36  ;;  %p206_p3 = scmp.lt.s32.totalorder (!%p175_p2), %s566_s17, 63  ;;  %v730_v5 = vld [vmem:[%s886_s2] ss:$0 sm:$0xff] (!%p175_p2) }
   0xd   : > { %s890_s17 = smov (!%p206_p3, %s566_s17), 63 }
   0xe   : > { %s567_s18 = sshll.u32 %s890_s17, 2  ;;  %s569_s19 = sshll.u32 %s890_s17, 3 }
   0xf   : > { %s711_s22 = scalar_lea.vmem %s884_s0, %s567_s18  ;;  %s724_s27 = scalar_lea.vmem %s887_s3, %s569_s19 }
  0x10   : > { %v577_v0 = vld [vmem:[%s711_s22] sm:$0xff]   ;;  %v640_v4 = vld [vmem:[%s711_s22 + $0x8] sm:$0xff]   ;;  %v641_v8 = vld [vmem:[%s711_s22 + $0x10] sm:$0xff]   ;;  %s761_s6 = scalar_lea.vmem %s888_s4, %s569_s19 }
  0x11   : > { %v578_v2 = vunpack.c.l.bf16 %v577_v0  ;;  %v579_v3 = vunpack.c.h.bf16 %v577_v0  ;;  %v582_v6 = vunpack.c.l.bf16 %v640_v4  ;;  %v583_v7 = vunpack.c.h.bf16 %v640_v4  ;;  %v642_v13 = vld [vmem:[%s711_s22 + $0x18] sm:$0xff]   ;;  %v365_v14 = vld [vmem:[%s724_s27] sm:$0xff]  ;;  %v366_v15 = vld [vmem:[%s724_s27 + $0x8] sm:$0xff] }
  0x12   : > { %v586_v11 = vunpack.c.l.bf16 %v641_v8  ;;  %v587_v12 = vunpack.c.h.bf16 %v641_v8  ;;  %v590_v18 = vunpack.c.l.bf16 %v642_v13  ;;  %v591_v19 = vunpack.c.h.bf16 %v642_v13  ;;  %v367_v22 = vld [vmem:[%s724_s27 + $0x10] sm:$0xff]  ;;  %v368_v23 = vld [vmem:[%s724_s27 + $0x18] sm:$0xff]  ;;  %v369_v28 = vld [vmem:[%s724_s27 + $0x20] sm:$0xff] }
  0x13   : > { %v294_v9 = vmul.f32 %v578_v2, %v717_v1  ;;  %v295_v10 = vmul.f32 %v579_v3, %v717_v1  ;;  %v296_v16 = vmul.f32 %v582_v6, %v717_v1  ;;  %v297_v17 = vmul.f32 %v583_v7, %v717_v1  ;;  %v370_v29 = vld [vmem:[%s724_s27 + $0x28] sm:$0xff]  ;;  %v371_v36 = vld [vmem:[%s724_s27 + $0x30] sm:$0xff]  ;;  %v372_v37 = vld [vmem:[%s724_s27 + $0x38] sm:$0xff] }
  0x14   : > { %v298_v24 = vmul.f32 %v586_v11, %v717_v1  ;;  %v299_v25 = vmul.f32 %v587_v12, %v717_v1  ;;  %v300_v30 = vmul.f32 %v590_v18, %v717_v1  ;;  %v301_v31 = vmul.f32 %v591_v19, %v717_v1  ;;  %v643_v42 = vld [vmem:[%s711_s22 + $0x20] sm:$0xff]   ;;  %v644_v47 = vld [vmem:[%s711_s22 + $0x28] sm:$0xff]   ;;  %v645_v52 = vld [vmem:[%s711_s22 + $0x30] sm:$0xff]  }
  0x15   : > { %v333_v20 = vadd.f32 %v730_v5, %v294_v9  ;;  %v334_v21 = vadd.f32 %v730_v5, %v295_v10  ;;  %v335_v26 = vadd.f32 %v730_v5, %v296_v16  ;;  %v336_v27 = vadd.f32 %v730_v5, %v297_v17  ;;  %v646_v57 = vld [vmem:[%s711_s22 + $0x38] sm:$0xff]   ;;  %v373_v3 = vld [vmem:[%s724_s27 + $0x40] sm:$0xff]  ;;  %v374_v4 = vld [vmem:[%s724_s27 + $0x48] sm:$0xff] }
  0x16   : > { %v337_v34 = vadd.f32 %v730_v5, %v298_v24  ;;  %v338_v35 = vadd.f32 %v730_v5, %v299_v25  ;;  %v339_v40 = vadd.f32 %v730_v5, %v300_v30  ;;  %v340_v41 = vadd.f32 %v730_v5, %v301_v31  ;;  %v375_v12 = vld [vmem:[%s724_s27 + $0x50] sm:$0xff]  ;;  %v376_v13 = vld [vmem:[%s724_s27 + $0x58] sm:$0xff]  ;;  %v377_v18 = vld [vmem:[%s724_s27 + $0x60] sm:$0xff] }
  0x17   : > { %v397_v32 = vadd.f32 %v365_v14, %v333_v20  ;;  %v398_v33 = vadd.f32 %v366_v15, %v334_v21  ;;  %v399_v38 = vadd.f32 %v367_v22, %v335_v26  ;;  %v400_v39 = vadd.f32 %v368_v23, %v336_v27  ;;  %v378_v19 = vld [vmem:[%s724_s27 + $0x68] sm:$0xff]  ;;  %v379_v26 = vld [vmem:[%s724_s27 + $0x70] sm:$0xff]  ;;  %v380_v27 = vld [vmem:[%s724_s27 + $0x78] sm:$0xff] }
  0x18   : > { %v401_v45 = vadd.f32 %v369_v28, %v337_v34  ;;  %v402_v46 = vadd.f32 %v370_v29, %v338_v35  ;;  %v403_v50 = vadd.f32 %v371_v36, %v339_v40  ;;  %v404_v51 = vadd.f32 %v372_v37, %v340_v41  ;;  %v648_v37 = vld [vmem:[%s711_s22 + $0x48] sm:$0xff]  }
  0x19   : > { %v429_v43 = vmax.f32 %v397_v32, 0.0  ;;  %v430_v44 = vmax.f32 %v398_v33, 0.0  ;;  %v431_v48 = vmax.f32 %v399_v38, 0.0  ;;  %v432_v49 = vmax.f32 %v400_v39, 0.0  ;;  %v647_v32 = vld [vmem:[%s711_s22 + $0x40] sm:$0xff]  }
  0x1a   : > { %v433_v53 = vmax.f32 %v401_v45, 0.0  ;;  %v434_v54 = vmax.f32 %v402_v46, 0.0  ;;  %v594_v55 = vunpack.c.l.bf16 %v643_v42  ;;  %v595_v56 = vunpack.c.h.bf16 %v643_v42  ;;  %v649_v42 = vld [vmem:[%s711_s22 + $0x50] sm:$0xff]  }
  0x1b   : > { %461 = vst [vmem:[%s761_s6] sm:$0xff] %v429_v43  ;;  %462 = vst [vmem:[%s761_s6 + $0x8] sm:$0xff] %v430_v44  ;;  %v435_v58 = vmax.f32 %v403_v50, 0.0  ;;  %v436_v59 = vmax.f32 %v404_v51, 0.0  ;;  %v598_v60 = vunpack.c.l.bf16 %v644_v47  ;;  %v599_v61 = vunpack.c.h.bf16 %v644_v47  ;;  %v650_v47 = vld [vmem:[%s711_s22 + $0x58] sm:$0xff]  }
  0x1c   : > { %463 = vst [vmem:[%s761_s6 + $0x10] sm:$0xff] %v431_v48  ;;  %464 = vst [vmem:[%s761_s6 + $0x18] sm:$0xff] %v432_v49  ;;  %v302_v62 = vmul.f32 %v594_v55, %v717_v1  ;;  %v303_v63 = vmul.f32 %v595_v56, %v717_v1  ;;  %v602_v0 = vunpack.c.l.bf16 %v645_v52  ;;  %v603_v2 = vunpack.c.h.bf16 %v645_v52  ;;  %v381_v56 = vld [vmem:[%s724_s27 + $0x80] sm:$0xff] }
  0x1d   : > { %465 = vst [vmem:[%s761_s6 + $0x20] sm:$0xff] %v433_v53  ;;  %466 = vst [vmem:[%s761_s6 + $0x28] sm:$0xff] %v434_v54  ;;  %v304_v6 = vmul.f32 %v598_v60, %v717_v1  ;;  %v305_v7 = vmul.f32 %v599_v61, %v717_v1  ;;  %v606_v8 = vunpack.c.l.bf16 %v646_v57  ;;  %v607_v9 = vunpack.c.h.bf16 %v646_v57  ;;  %v382_v57 = vld [vmem:[%s724_s27 + $0x88] sm:$0xff] }
  0x1e   : > { %467 = vst [vmem:[%s761_s6 + $0x30] sm:$0xff] %v435_v58  ;;  %468 = vst [vmem:[%s761_s6 + $0x38] sm:$0xff] %v436_v59  ;;  %v341_v10 = vadd.f32 %v730_v5, %v302_v62  ;;  %v342_v11 = vadd.f32 %v730_v5, %v303_v63  ;;  %v306_v14 = vmul.f32 %v602_v0, %v717_v1  ;;  %v610_v45 = vunpack.c.l.bf16 %v647_v32  ;;  %v383_v0 = vld [vmem:[%s724_s27 + $0x90] sm:$0xff] }
  0x1f   : > { %v307_v15 = vmul.f32 %v603_v2, %v717_v1  ;;  %v343_v16 = vadd.f32 %v730_v5, %v304_v6  ;;  %v344_v17 = vadd.f32 %v730_v5, %v305_v7  ;;  %v308_v20 = vmul.f32 %v606_v8, %v717_v1  ;;  %v384_v2 = vld [vmem:[%s724_s27 + $0x98] sm:$0xff]  ;;  %v385_v8 = vld [vmem:[%s724_s27 + $0xa0] sm:$0xff] }
  0x20   : > { %v309_v21 = vmul.f32 %v607_v9, %v717_v1  ;;  %v405_v22 = vadd.f32 %v373_v3, %v341_v10  ;;  %v406_v23 = vadd.f32 %v374_v4, %v342_v11  ;;  %v345_v24 = vadd.f32 %v730_v5, %v306_v14  ;;  %v386_v9 = vld [vmem:[%s724_s27 + $0xa8] sm:$0xff] }
  0x21   : > { %v346_v25 = vadd.f32 %v730_v5, %v307_v15  ;;  %v407_v28 = vadd.f32 %v375_v12, %v343_v16  ;;  %v408_v29 = vadd.f32 %v376_v13, %v344_v17  ;;  %v347_v30 = vadd.f32 %v730_v5, %v308_v20  ;;  %v387_v16 = vld [vmem:[%s724_s27 + $0xb0] sm:$0xff]  ;;  %v388_v17 = vld [vmem:[%s724_s27 + $0xb8] sm:$0xff] }
  0x22   : > { %v348_v31 = vadd.f32 %v730_v5, %v309_v21  ;;  %v437_v33 = vmax.f32 %v405_v22, 0.0  ;;  %v438_v34 = vmax.f32 %v406_v23, 0.0  ;;  %v409_v35 = vadd.f32 %v377_v18, %v345_v24  ;;  %v651_v22 = vld [vmem:[%s711_s22 + $0x60] sm:$0xff]  }
  0x23   : > { %v410_v36 = vadd.f32 %v378_v19, %v346_v25  ;;  %v439_v38 = vmax.f32 %v407_v28, 0.0  ;;  %v440_v39 = vmax.f32 %v408_v29, 0.0  ;;  %v411_v40 = vadd.f32 %v379_v26, %v347_v30 }
  0x24   : > { %v412_v41 = vadd.f32 %v380_v27, %v348_v31  ;;  %469 = vst [vmem:[%s761_s6 + $0x40] sm:$0xff] %v437_v33  ;;  %470 = vst [vmem:[%s761_s6 + $0x48] sm:$0xff] %v438_v34  ;;  %v441_v43 = vmax.f32 %v409_v35, 0.0  ;;  %v611_v46 = vunpack.c.h.bf16 %v647_v32  ;;  %v614_v50 = vunpack.c.l.bf16 %v648_v37  ;;  %v652_v27 = vld [vmem:[%s711_s22 + $0x68] sm:$0xff]   ;;  %v653_v32 = vld [vmem:[%s711_s22 + $0x70] sm:$0xff]  }
  0x25   : > { %v442_v44 = vmax.f32 %v410_v36, 0.0  ;;  %471 = vst [vmem:[%s761_s6 + $0x50] sm:$0xff] %v439_v38  ;;  %472 = vst [vmem:[%s761_s6 + $0x58] sm:$0xff] %v440_v39  ;;  %v443_v48 = vmax.f32 %v411_v40, 0.0  ;;  %v615_v51 = vunpack.c.h.bf16 %v648_v37  ;;  %v310_v52 = vmul.f32 %v610_v45, %v717_v1  ;;  %v654_v37 = vld [vmem:[%s711_s22 + $0x78] sm:$0xff]  }
  0x26   : > { %v444_v49 = vmax.f32 %v412_v41, 0.0  ;;  %473 = vst [vmem:[%s761_s6 + $0x60] sm:$0xff] %v441_v43  ;;  %v311_v53 = vmul.f32 %v611_v46, %v717_v1  ;;  %v618_v54 = vunpack.c.l.bf16 %v649_v42  ;;  %v619_v55 = vunpack.c.h.bf16 %v649_v42  ;;  %v389_v46 = vld [vmem:[%s724_s27 + $0xc0] sm:$0xff] }
  0x27   : > { %474 = vst [vmem:[%s761_s6 + $0x68] sm:$0xff] %v442_v44  ;;  %475 = vst [vmem:[%s761_s6 + $0x70] sm:$0xff] %v443_v48  ;;  %v312_v58 = vmul.f32 %v614_v50, %v717_v1  ;;  %v313_v59 = vmul.f32 %v615_v51, %v717_v1  ;;  %v622_v60 = vunpack.c.l.bf16 %v650_v47  ;;  %v623_v61 = vunpack.c.h.bf16 %v650_v47  ;;  %v390_v47 = vld [vmem:[%s724_s27 + $0xc8] sm:$0xff] }
  0x28   : > { %476 = vst [vmem:[%s761_s6 + $0x78] sm:$0xff] %v444_v49  ;;  %v349_v62 = vadd.f32 %v730_v5, %v310_v52  ;;  %v350_v63 = vadd.f32 %v730_v5, %v311_v53  ;;  %v314_v3 = vmul.f32 %v618_v54, %v717_v1  ;;  %v315_v4 = vmul.f32 %v619_v55, %v717_v1  ;;  %v391_v54 = vld [vmem:[%s724_s27 + $0xd0] sm:$0xff]  ;;  %v392_v55 = vld [vmem:[%s724_s27 + $0xd8] sm:$0xff] }
  0x29   : > { %v351_v6 = vadd.f32 %v730_v5, %v312_v58  ;;  %v352_v7 = vadd.f32 %v730_v5, %v313_v59  ;;  %v316_v10 = vmul.f32 %v622_v60, %v717_v1  ;;  %v317_v11 = vmul.f32 %v623_v61, %v717_v1  ;;  %v393_v60 = vld [vmem:[%s724_s27 + $0xe0] sm:$0xff]  ;;  %v394_v61 = vld [vmem:[%s724_s27 + $0xe8] sm:$0xff] }
  0x2a   : > { %v413_v12 = vadd.f32 %v381_v56, %v349_v62  ;;  %v414_v13 = vadd.f32 %v382_v57, %v350_v63  ;;  %v353_v14 = vadd.f32 %v730_v5, %v314_v3  ;;  %v354_v15 = vadd.f32 %v730_v5, %v315_v4 }
  0x2b   : > { %v415_v18 = vadd.f32 %v383_v0, %v351_v6  ;;  %v416_v19 = vadd.f32 %v384_v2, %v352_v7  ;;  %v355_v20 = vadd.f32 %v730_v5, %v316_v10  ;;  %v356_v21 = vadd.f32 %v730_v5, %v317_v11  ;;  %v395_v6 = vld [vmem:[%s724_s27 + $0xf0] sm:$0xff]  ;;  %v396_v7 = vld [vmem:[%s724_s27 + $0xf8] sm:$0xff] }
  0x2c   : > { %v445_v23 = vmax.f32 %v413_v12, 0.0  ;;  %v446_v24 = vmax.f32 %v414_v13, 0.0  ;;  %v417_v25 = vadd.f32 %v385_v8, %v353_v14  ;;  %v418_v26 = vadd.f32 %v386_v9, %v354_v15 }
  0x2d   : > { %v447_v28 = vmax.f32 %v415_v18, 0.0  ;;  %v448_v29 = vmax.f32 %v416_v19, 0.0  ;;  %v419_v30 = vadd.f32 %v387_v16, %v355_v20  ;;  %v420_v31 = vadd.f32 %v388_v17, %v356_v21 }
  0x2e   : > { %477 = vst [vmem:[%s761_s6 + $0x80] sm:$0xff] %v445_v23  ;;  %478 = vst [vmem:[%s761_s6 + $0x88] sm:$0xff] %v446_v24  ;;  %v449_v33 = vmax.f32 %v417_v25, 0.0  ;;  %v450_v34 = vmax.f32 %v418_v26, 0.0  ;;  %v626_v35 = vunpack.c.l.bf16 %v651_v22  ;;  %v627_v36 = vunpack.c.h.bf16 %v651_v22 }
  0x2f   : > { %479 = vst [vmem:[%s761_s6 + $0x90] sm:$0xff] %v447_v28  ;;  %480 = vst [vmem:[%s761_s6 + $0x98] sm:$0xff] %v448_v29  ;;  %v451_v38 = vmax.f32 %v419_v30, 0.0  ;;  %v452_v39 = vmax.f32 %v420_v31, 0.0  ;;  %v630_v40 = vunpack.c.l.bf16 %v652_v27  ;;  %v631_v41 = vunpack.c.h.bf16 %v652_v27 }
  0x30   : > { %481 = vst [vmem:[%s761_s6 + $0xa0] sm:$0xff] %v449_v33  ;;  %482 = vst [vmem:[%s761_s6 + $0xa8] sm:$0xff] %v450_v34  ;;  %v318_v42 = vmul.f32 %v626_v35, %v717_v1  ;;  %v319_v43 = vmul.f32 %v627_v36, %v717_v1  ;;  %v634_v44 = vunpack.c.l.bf16 %v653_v32  ;;  %v635_v45 = vunpack.c.h.bf16 %v653_v32 }
  0x31   : > { %483 = vst [vmem:[%s761_s6 + $0xb0] sm:$0xff] %v451_v38  ;;  %484 = vst [vmem:[%s761_s6 + $0xb8] sm:$0xff] %v452_v39  ;;  %v320_v48 = vmul.f32 %v630_v40, %v717_v1  ;;  %v321_v49 = vmul.f32 %v631_v41, %v717_v1  ;;  %v638_v50 = vunpack.c.l.bf16 %v654_v37  ;;  %v639_v51 = vunpack.c.h.bf16 %v654_v37 }
  0x32   : > { %v357_v52 = vadd.f32 %v730_v5, %v318_v42  ;;  %v358_v53 = vadd.f32 %v730_v5, %v319_v43  ;;  %v322_v56 = vmul.f32 %v634_v44, %v717_v1  ;;  %v323_v57 = vmul.f32 %v635_v45, %v717_v1 }
  0x33   : > { %v359_v58 = vadd.f32 %v730_v5, %v320_v48  ;;  %v360_v59 = vadd.f32 %v730_v5, %v321_v49  ;;  %v324_v62 = vmul.f32 %v638_v50, %v717_v1  ;;  %v325_v63 = vmul.f32 %v639_v51, %v717_v1 }
  0x34   : > { %v421_v0 = vadd.f32 %v389_v46, %v357_v52  ;;  %v422_v2 = vadd.f32 %v390_v47, %v358_v53  ;;  %v361_v3 = vadd.f32 %v730_v5, %v322_v56  ;;  %v362_v4 = vadd.f32 %v730_v5, %v323_v57 }
  0x35   : > { %v423_v8 = vadd.f32 %v391_v54, %v359_v58  ;;  %v424_v9 = vadd.f32 %v392_v55, %v360_v59  ;;  %v363_v10 = vadd.f32 %v730_v5, %v324_v62  ;;  %v364_v11 = vadd.f32 %v730_v5, %v325_v63 }
  0x36   : > { %v453_v12 = vmax.f32 %v421_v0, 0.0  ;;  %v454_v1 = vmax.f32 %v422_v2, 0.0  ;;  %v425_v13 = vadd.f32 %v393_v60, %v361_v3  ;;  %v426_v14 = vadd.f32 %v394_v61, %v362_v4 }
  0x37   : > { %v455_v15 = vmax.f32 %v423_v8, 0.0  ;;  %v456_v16 = vmax.f32 %v424_v9, 0.0  ;;  %v427_v17 = vadd.f32 %v395_v6, %v363_v10  ;;  %v428_v18 = vadd.f32 %v396_v7, %v364_v11 }
  0x38   : > { %485 = vst [vmem:[%s761_s6 + $0xc0] sm:$0xff] %v453_v12  ;;  %486 = vst [vmem:[%s761_s6 + $0xc8] sm:$0xff] %v454_v1  ;;  %v457_v19 = vmax.f32 %v425_v13, 0.0  ;;  %v458_v20 = vmax.f32 %v426_v14, 0.0 }
  0x39   : > { %487 = vst [vmem:[%s761_s6 + $0xd0] sm:$0xff] %v455_v15  ;;  %488 = vst [vmem:[%s761_s6 + $0xd8] sm:$0xff] %v456_v16  ;;  %v459_v21 = vmax.f32 %v427_v17, 0.0  ;;  %v460_v5 = vmax.f32 %v428_v18, 0.0 }
  0x3a   : > { %489 = vst [vmem:[%s761_s6 + $0xe0] sm:$0xff] %v457_v19  ;;  %490 = vst [vmem:[%s761_s6 + $0xe8] sm:$0xff] %v458_v20 }
  0x3b   : > { %491 = vst [vmem:[%s761_s6 + $0xf0] sm:$0xff] %v459_v21  ;;  %492 = vst [vmem:[%s761_s6 + $0xf8] sm:$0xff] %v460_v5 }
  0x3c PF: > { %s14_s15 = sadd.s32 1, %s669_s15  }
  0x3d   : > { %p11_p4 = scmp.ge.s32.totalorder %s14_s15, 4  }
  0x3f   :  { %13 = sbr.rel (!%p11_p4) target bundleno = 1 (0x1), region = 69 }

// kernel: bottleneck_pallas.5
= control target key start
LH: loop header
LB: loop body
LE: loop exit
PB: predicated region body
PF: predicated region fallthrough
CT: control target
= control target key end

     0   :  { %s7924_s21 = smov 0   ;;  %s9765_s0 = inlined_call_operand.vmem [shape: bf16[2,16,16,128], index: 0, kind: input, shape index: {}]   ;;  %s9766_s1 = inlined_call_operand.vmem [shape: f32[1,128], index: 1, kind: input, shape index: {}]   ;;  %s9767_s2 = inlined_call_operand.vmem [shape: f32[1,128], index: 2, kind: input, shape index: {}]   ;;  %s9768_s3 = inlined_call_operand.vmem [shape: bf16[3,3,128,128], index: 3, kind: input, shape index: {}]   ;;  %s9769_s4 = inlined_call_operand.vmem [shape: bf16[512,128], index: 4, kind: output, shape index: {0}]   ;;  %s9770_s5 = inlined_call_operand.vmem [shape: f32[2,1,128], index: 5, kind: output, shape index: {1}]   ;;  %s9771_s6 = inlined_call_operand.vmem [shape: f32[2,1,128], index: 6, kind: output, shape index: {2}]  }
   0x1 LB: > { %s7930_s22 = sadd.s32 4294967295, %s7886_s21   ;;  %p6064_p0 = scmp.ge.s32.totalorder %s7886_s21, 1  ;;  %s7886_s21 = sphi %s7924_s21, %s17_s21  }
   0x2   : > { %p217_p1 = scmp.lt.s32.totalorder %s7886_s21, 3 }
   0x4   : > { %p218_p2 = pnand %p6064_p0, %p217_p1 }
   0x6   : > { %221 = sbr.rel (%p218_p2) target bundleno = 692 (0x2b4), region = 36 }
   0xd   : > { %v7683_v0 = vld [vmem:[%s9768_s3 + $0x40] sm:$0xff]   ;;  %v7888_v2 = vmov 0   ;;  %v7685_v5 = vld [vmem:[%s9768_s3 + $0x48] sm:$0xff]   ;;  %v7687_v7 = vld [vmem:[%s9768_s3 + $0x50] sm:$0xff]   ;;  %p253_p3 = scmp.lt.s32.totalorder %s7930_s22, 1  ;;  %vm605_vm3 = vcmask 1040384  }
   0xe   : > { %v7684_v1 = vld [vmem:[%s9768_s3 + $0x100] sm:$0xff]   ;;  %v6071_v3 = vcombine.low %v7888_v2, %v7888_v2  ;;  %v6072_v4 = vcombine.high %v7888_v2, %v7888_v2  ;;  %6970 = vmatprep.subr.bf16.mxu1 %v7683_v0  ;;  %v7686_v6 = vld [vmem:[%s9768_s3 + $0x108] sm:$0xff]   ;;  %v7688_v8 = vld [vmem:[%s9768_s3 + $0x110] sm:$0xff]   ;;  %vm941_vm0 = vsmask.f32 3328  ;;  %vm1971_vm6 = vcmask 1042432  }
   0xf   : > { %7162 = vmatprep.subr.bf16.mxu0 %v7684_v1  ;;  %6971 = vmatpush3.bf16.msra.mxu1 %v7683_v0  ;;  %v7689_v9 = vld [vmem:[%s9768_s3 + $0x58] sm:$0xff]   ;;  %s7957_s13 = scalar_select %p253_p3, %s7930_s22, 1  ;;  %v7691_v11 = vld [vmem:[%s9768_s3 + $0x60] sm:$0xff]   ;;  %v7693_v13 = vld [vmem:[%s9768_s3 + $0x68] sm:$0xff]   ;;  %vm942_vm1 = vsmask.f32 7440 }
  0x10   : > { %823 = vst [vmem:[#allocation2] sm:$0xf] %v6071_v3  ;;  %824 = vst [vmem:[#allocation2 + $0x4] sm:$0xf] %v6072_v4  ;;  %7163 = vmatpush3.bf16.msra.mxu0 %v7684_v1  ;;  %6972 = vmatprep.subr.bf16.mxu1 %v7685_v5  ;;  %v7690_v10 = vld [vmem:[%s9768_s3 + $0x118] sm:$0xff]   ;;  %v7692_v12 = vld [vmem:[%s9768_s3 + $0x120] sm:$0xff]  }
  0x11   : > { %825 = vst [vmem:[#allocation2 + $0x8] sm:$0x1] %v6071_v3  ;;  %874 = vst [vmem:[#allocation2 + $0xcc] sm:$0xf] %v6071_v3  ;;  %7164 = vmatprep.subr.bf16.mxu0 %v7686_v6  ;;  %s6547_s18 = sshll.u32 %s7957_s13, 7  ;;  %v7694_v17 = vld [vmem:[%s9768_s3 + $0x128] sm:$0xff]   ;;  %s269_s23 = scalar_lea.vmem %s9771_s6, %s7957_s13 }
  0x12   : > { %875 = vst [vmem:[#allocation2 + $0xd0] sm:$0xf] %v6072_v4  ;;  %876 = vst [vmem:[#allocation2 + $0xd4] sm:$0x1] %v6071_v3  ;;  %s7975_s27 = scalar_lea.vmem %s9765_s0, %s6547_s18  ;;  %v7984_v28 = vld [vmem:[%s9766_s1] ss:$0 sm:$0xff]  ;;  %s266_s18 = scalar_lea.vmem %s9770_s5, %s7957_s13 }
  0x13   : > { %6973 = vmatpush3.bf16.msra.mxu1 %v7685_v5  ;;  %v6581_v23 = vld [vmem:[%s7975_s27] sm:$0xff]   ;;  %v7695_v29 = vld [vmem:[%s9768_s3 + $0x70] sm:$0xff]   ;;  %vm7999_vm2 = vmor %vm941_vm0, %vm942_vm1  ;;  %vm606_vm4 = vsmask.f32 256  ;;  %vm1972_vm7 = vcmask 1046532   ;;  %s6067_s12 = sshll.u32 %s7930_s22, 5 }
  0x14   : > { %7165 = vmatpush3.bf16.msra.mxu0 %v7686_v6  ;;  %6974 = vmatprep.subr.bf16.mxu1 %v7687_v7  ;;  %v6582_v26 = vunpack.c.l.bf16 %v6581_v23  ;;  %v6583_v27 = vunpack.c.h.bf16 %v6581_v23  ;;  %v7696_v30 = vld [vmem:[%s9768_s3 + $0x130] sm:$0xff]   ;;  %v7995_v33 = vld [vmem:[%s9767_s2] ss:$0 sm:$0xff]  ;;  %v6724_v40 = vld [vmem:[%s7975_s27 + $0x8] sm:$0xff]   ;;  %p259_p4 = scmp.lt.s32.totalorder %s6067_s12, 63 }
  0x15   : > { %7166 = vmatprep.subr.bf16.mxu0 %v7688_v8  ;;  %v7697_v41 = vld [vmem:[%s9768_s3 + $0x78] sm:$0xff]   ;;  %v6586_v45 = vunpack.c.l.bf16 %v6724_v40  ;;  %v6587_v47 = vunpack.c.h.bf16 %v6724_v40  ;;  %v6725_v48 = vld [vmem:[%s7975_s27 + $0x10] sm:$0xff]   ;;  %v8025_v61 = vld [vmem:[%s9768_s3] sm:$0xff]  }
  0x16   : > { %v342_v36 = vmul.f32 %v6582_v26, %v7984_v28  ;;  %v343_v37 = vmul.f32 %v6583_v27, %v7984_v28  ;;  %v7698_v49 = vld [vmem:[%s9768_s3 + $0x138] sm:$0xff]   ;;  %v6590_v56 = vunpack.c.l.bf16 %v6725_v48  ;;  %v6591_v57 = vunpack.c.h.bf16 %v6725_v48  ;;  %v6727_v4 = vld [vmem:[%s7975_s27 + $0x20] sm:$0xff]   ;;  %vm8044_vm5 = vmand %vm605_vm3, %vm606_vm4  ;;  %s9894_s12 = smov (!%p259_p4, %s6067_s12), 63 }
  0x17   : > { %6975 = vmatpush3.bf16.msra.mxu1 %v7687_v7  ;;  %v877_v14 = vld [vmem:[#allocation2] sm:$0xf]  ;;  %v878_v15 = vld [vmem:[#allocation2 + $0x4] sm:$0xf]  ;;  %v344_v53 = vmul.f32 %v6586_v45, %v7984_v28  ;;  %v345_v55 = vmul.f32 %v6587_v47, %v7984_v28  ;;  %v6726_v58 = vld [vmem:[%s7975_s27 + $0x18] sm:$0xff]   ;;  %s6068_s14 = sshll.u32 %s9894_s12, 2 }
  0x18   : > { %7167 = vmatpush3.bf16.msra.mxu0 %v7688_v8  ;;  %6976 = vmatprep.subr.bf16.mxu1 %v7689_v9  ;;  %v925_v16 = vld [vmem:[#allocation2 + $0x8] sm:$0x1]  ;;  %v945_v18 = vshrl.u32 %v877_v14, 16  ;;  %v948_v19 = vshll.u32 %v877_v14, 16  ;;  %v954_v20 = vshll.u32 %v878_v15, 16  ;;  %v958_v21 = vshrl.u32 %v878_v15, 16  ;;  %vm8281_vm8 = vmor %vm1971_vm6, %vm1972_vm7  ;;  %s9731_s15 = scalar_lea.vmem %s9769_s4, %s6068_s14 }
  0x19   : > { %7168 = vmatprep.subr.bf16.mxu0 %v7690_v10  ;;  %v964_v22 = vshll.u32 %v925_v16, 16  ;;  %v381_v43 = vadd.f32 %v7995_v33, %v342_v36  ;;  %v382_v44 = vadd.f32 %v7995_v33, %v343_v37  ;;  %v383_v62 = vadd.f32 %v7995_v33, %v344_v53  ;;  %v8035_v7 = vld [vmem:[%s9768_s3 + $0x140] sm:$0xff]  }
  0x1a   : > { %v947_v24 = vrot.slane %v945_v18, 4  ;;  %v950_v25 = vrot.slane %v948_v19, 5  ;;  %v956_v31 = vrot.slane %v954_v20, 5  ;;  %v960_v32 = vrot.slane %v958_v21, 4  ;;  %v7733_v18 = vld [vmem:[%s9768_s3 + $0x98] sm:$0xff]  }
  0x1b   : > { %6977 = vmatpush3.bf16.msra.mxu1 %v7689_v9  ;;  %v966_v39 = vrot.slane %v964_v22, 5  ;;  %v413_v51 = vmax.f32 %v381_v43, 0.0  ;;  %v414_v52 = vmax.f32 %v382_v44, 0.0  ;;  %v6594_v63 = vunpack.c.l.bf16 %v6726_v58 }
  0x1c   : > { %7169 = vmatpush3.bf16.msra.mxu0 %v7690_v10  ;;  %6978 = vmatprep.subr.bf16.mxu1 %v7691_v11  ;;  %v951_v35 = vor.u32 %v950_v25, %v947_v24  ;;  %v961_v38 = vor.u32 %v960_v32, %v956_v31  ;;  %v384_v0 = vadd.f32 %v7995_v33, %v345_v55  ;;  %v6595_v3 = vunpack.c.h.bf16 %v6726_v58  ;;  %v6728_v32 = vld [vmem:[%s7975_s27 + $0x28] sm:$0xff]  }
  0x1d   : > { %7170 = vmatprep.subr.bf16.mxu0 %v7692_v12  ;;  %v445_v60 = vpack.c.bf16 %v414_v52, %v413_v51  ;;  %v346_v1 = vmul.f32 %v6590_v56, %v7984_v28  ;;  %v347_v2 = vmul.f32 %v6591_v57, %v7984_v28  ;;  %v415_v8 = vmax.f32 %v383_v62, 0.0 }
  0x1e   : > { %v952_v42 = vrot.slane %v951_v35, 4  ;;  %v962_v46 = vrot.slane %v961_v38, 4  ;;  %v348_v9 = vmul.f32 %v6594_v63, %v7984_v28  ;;  %v416_v10 = vmax.f32 %v384_v0, 0.0 }
  0x1f   : > { %6979 = vmatpush3.bf16.msra.mxu1 %v7691_v11  ;;  %v462_v5 = vshrl.u32 %v445_v60, 16  ;;  %v465_v6 = vshll.u32 %v445_v60, 16  ;;  %v385_v11 = vadd.f32 %v7995_v33, %v346_v1  ;;  %v6598_v16 = vunpack.c.l.bf16 %v6727_v4 }
  0x20   : > { %7171 = vmatpush3.bf16.msra.mxu0 %v7692_v12  ;;  %6980 = vmatprep.subr.bf16.mxu1 %v7693_v13  ;;  %v957_v50 = vsel %vm7999_vm2, %v952_v42, %v956_v31  ;;  %v967_v54 = vsel %vm7999_vm2, %v962_v46, %v966_v39  ;;  %v386_v12 = vadd.f32 %v7995_v33, %v347_v2  ;;  %v6603_v58 = vunpack.c.h.bf16 %v6728_v32 }
  0x21   : > { %7172 = vmatprep.subr.bf16.mxu0 %v7694_v17  ;;  %v6137_v59 = vcombine.low %v957_v50, %v967_v54  ;;  %v464_v14 = vrot.slane %v462_v5, 7  ;;  %v387_v15 = vadd.f32 %v7995_v33, %v348_v9  ;;  %v446_v19 = vpack.c.bf16 %v416_v10, %v415_v8 }
  0x22   : > { %v417_v20 = vmax.f32 %v385_v11, 0.0  ;;  %v418_v21 = vmax.f32 %v386_v12, 0.0  ;;  %v350_v26 = vmul.f32 %v6598_v16, %v7984_v28  ;;  %v6602_v50 = vunpack.c.l.bf16 %v6728_v32 }
  0x23   : > { %6981 = vmatpush3.bf16.msra.mxu1 %v7693_v13  ;;  %6986 = vmatprep.mubr.bf16.mxu1 %v6137_v59  ;;  %v349_v13 = vmul.f32 %v6595_v3, %v7984_v28  ;;  %v467_v23 = vor.u32 %v465_v6, %v464_v14  ;;  %v624_v24 = vsel %vm8044_vm5, %v464_v14, 0  ;;  %v419_v25 = vmax.f32 %v387_v15, 0.0  ;;  %v8071_v3 = vld [vmem:[%s7975_s27 + $0x30] sm:$0xff]  }
  0x24   : > { %7173 = vmatpush3.bf16.msra.mxu0 %v7694_v17  ;;  %6982 = vmatprep.subr.bf16.mxu1 %v7695_v29  ;;  %v6599_v17 = vunpack.c.h.bf16 %v6727_v4  ;;  %v6075_v27 = vcombine.low %v624_v24, %v624_v24  ;;  %v447_v31 = vpack.c.bf16 %v418_v21, %v417_v20  ;;  %v389_v38 = vadd.f32 %v7995_v33, %v350_v26 }
  0x25   : > { %7174 = vmatprep.subr.bf16.mxu0 %v7696_v30  ;;  %v388_v22 = vadd.f32 %v7995_v33, %v349_v13  ;;  %v608_v35 = vsel %vm8044_vm5, 0, %v467_v23  ;;  %v352_v1 = vmul.f32 %v6602_v50, %v7984_v28  ;;  %v353_v2 = vmul.f32 %v6603_v58, %v7984_v28 }
  0x26   : > { %v351_v37 = vmul.f32 %v6599_v17, %v7984_v28  ;;  %v6073_v39 = vcombine.low %v608_v35, %v608_v35  ;;  %v6074_v40 = vcombine.high %v608_v35, %v608_v35  ;;  %828 = vst [vmem:[#allocation2 + $0x14] sm:$0x1] %v6075_v27  ;;  %v476_v42 = vshrl.u32 %v447_v31, 16 }
  0x27   : > { %6983 = vmatpush3.bf16.msra.mxu1 %v7695_v29  ;;  %v469_v29 = vshrl.u32 %v446_v19, 16  ;;  %v420_v36 = vmax.f32 %v388_v22, 0.0  ;;  %v479_v43 = vshll.u32 %v447_v31, 16  ;;  %v421_v46 = vmax.f32 %v389_v38, 0.0 }
  0x28   : > { %7175 = vmatpush3.bf16.msra.mxu0 %v7696_v30  ;;  %6984 = vmatprep.subr.bf16.mxu1 %v7697_v41  ;;  %v472_v30 = vshll.u32 %v446_v19, 16  ;;  %v390_v45 = vadd.f32 %v7995_v33, %v351_v37  ;;  %826 = vst [vmem:[#allocation2 + $0xc] sm:$0xf] %v6073_v39  ;;  %827 = vst [vmem:[#allocation2 + $0x10] sm:$0xf] %v6074_v40  ;;  %v8084_v20 = vadd.f32 %v7995_v33, %v352_v1 }
  0x29   : > { %7176 = vmatprep.subr.bf16.mxu0 %v7698_v49  ;;  %v448_v44 = vpack.c.bf16 %v420_v36, %v419_v25  ;;  %v8087_v21 = vadd.f32 %v7995_v33, %v353_v2  ;;  %v6606_v22 = vunpack.c.l.bf16 %v8071_v3 }
  0x2a   : > { %v422_v54 = vmax.f32 %v390_v45, 0.0 }
  0x2b   : > { %6985 = vmatpush3.bf16.msra.mxu1 %v7697_v41  ;;  %v471_v41 = vrot.slane %v469_v29, 7  ;;  %v483_v52 = vshrl.u32 %v448_v44, 16  ;;  %v486_v53 = vshll.u32 %v448_v44, 16 }
  0x2c   : > { %7177 = vmatpush3.bf16.msra.mxu0 %v7698_v49  ;;  %7018 = vmatprep.subr.bf16.mxu1 %v8025_v61  ;;  %v478_v49 = vrot.slane %v476_v42, 7  ;;  %v8077_v10 = vpack.c.bf16 %v422_v54, %v421_v46 }
  0x2d   : > { %7210 = vmatprep.subr.bf16.mxu0 %v8035_v7  ;;  %v474_v47 = vor.u32 %v472_v30, %v471_v41  ;;  %v625_v48 = vsel %vm8044_vm5, %v471_v41, 0  ;;  %v485_v63 = vrot.slane %v483_v52, 7  ;;  %v926_v4 = vld [vmem:[#allocation2 + $0x14] sm:$0x1] }
  0x2e   : > { %v6078_v51 = vcombine.low %v625_v48, %v625_v48  ;;  %v481_v56 = vor.u32 %v479_v43, %v478_v49  ;;  %v626_v57 = vsel %vm8044_vm5, %v478_v49, 0  ;;  %v8073_v5 = vld [vmem:[#allocation2 + $0x14] sm:$0x1]  ;;  %v988_v11 = vshll.u32 %v926_v4, 16 }
  0x2f   : > { %v609_v55 = vsel %vm8044_vm5, 0, %v474_v47  ;;  %v6081_v62 = vcombine.low %v626_v57, %v626_v57  ;;  %v627_v9 = vsel %vm8044_vm5, %v485_v63, 0  ;;  %v2863_v12 = vshll.u32 %v8073_v5, 16  ;;  %v879_v15 = vld [vmem:[#allocation2 + $0xc] sm:$0xf] }
  0x30   : > { %v6076_v59 = vcombine.low %v609_v55, %v609_v55  ;;  %v6077_v60 = vcombine.high %v609_v55, %v609_v55  ;;  %831 = vst [vmem:[#allocation2 + $0x20] sm:$0x1] %v6078_v51  ;;  %v610_v0 = vsel %vm8044_vm5, 0, %v481_v56  ;;  %v3618_v13 = vrot.slane %v8073_v5, 5  ;;  %v880_v16 = vld [vmem:[#allocation2 + $0x10] sm:$0xf] }
  0x31   : > { %v6079_v6 = vcombine.low %v610_v0, %v610_v0  ;;  %v6080_v8 = vcombine.high %v610_v0, %v610_v0  ;;  %834 = vst [vmem:[#allocation2 + $0x2c] sm:$0x1] %v6081_v62  ;;  %v8081_v14 = vor.u32 %v486_v53, %v485_v63  ;;  %v2795_v17 = vld [vmem:[#allocation2 + $0xc] sm:$0xf]  ;;  %v6084_v19 = vcombine.low %v627_v9, %v627_v9  ;;  %v8090_v27 = vld [vmem:[#allocation2 + $0x10] sm:$0xf] }
  0x32   : > { %829 = vst [vmem:[#allocation2 + $0x18] sm:$0xf] %v6076_v59  ;;  %830 = vst [vmem:[#allocation2 + $0x1c] sm:$0xf] %v6077_v60  ;;  %v969_v23 = vshrl.u32 %v879_v15, 16  ;;  %v972_v24 = vshll.u32 %v879_v15, 16 }
  0x33   : > { %832 = vst [vmem:[#allocation2 + $0x24] sm:$0xf] %v6079_v6  ;;  %833 = vst [vmem:[#allocation2 + $0x28] sm:$0xf] %v6080_v8  ;;  %v978_v25 = vshll.u32 %v880_v16, 16  ;;  %v982_v26 = vshrl.u32 %v880_v16, 16 }
  0x34   : > { %v990_v29 = vrot.slane %v988_v11, 5  ;;  %v2844_v30 = vshrl.u32 %v2795_v17, 16  ;;  %v2847_v31 = vshll.u32 %v2795_v17, 16  ;;  %v2853_v32 = vshll.u32 %v8090_v27, 16  ;;  %837 = vst [vmem:[#allocation2 + $0x38] sm:$0x1] %v6084_v19 }
  0x35   : > { %v971_v35 = vrot.slane %v969_v23, 4  ;;  %v974_v36 = vrot.slane %v972_v24, 5  ;;  %v980_v37 = vrot.slane %v978_v25, 5  ;;  %v984_v38 = vrot.slane %v982_v26, 4  ;;  %v7702_v15 = vld [vmem:[%s9768_s3 + $0x8] sm:$0xff]  }
  0x36   : > { %v2846_v40 = vrot.slane %v2844_v30, 4  ;;  %v2849_v41 = vrot.slane %v2847_v31, 5  ;;  %v2855_v42 = vrot.slane %v2853_v32, 5  ;;  %v2857_v43 = vshrl.u32 %v8090_v27, 16 }
  0x37   : > { %v8093_v39 = vld [vmem:[#allocation2 + $0x20] sm:$0x1]  ;;  %v975_v44 = vor.u32 %v974_v36, %v971_v35  ;;  %v985_v45 = vor.u32 %v984_v38, %v980_v37  ;;  %v2865_v46 = vrot.slane %v2863_v12, 5 }
  0x38   : > { %v2887_v49 = vshll.u32 %v8093_v39, 16  ;;  %v2850_v50 = vor.u32 %v2849_v41, %v2846_v40  ;;  %v2859_v51 = vrot.slane %v2857_v43, 4  ;;  %v3625_v23 = vrot.slane %v8093_v39, 5  ;;  %v927_v24 = vld [vmem:[#allocation2 + $0x20] sm:$0x1] }
  0x39   : > { %v2798_v47 = vld [vmem:[#allocation2 + $0x18] sm:$0xf]  ;;  %v8096_v48 = vld [vmem:[#allocation2 + $0x1c] sm:$0xf]  ;;  %v976_v54 = vrot.slane %v975_v44, 4  ;;  %v986_v55 = vrot.slane %v985_v45, 4 }
  0x3a   : > { %v2868_v52 = vshrl.u32 %v2798_v47, 16  ;;  %v2871_v53 = vshll.u32 %v2798_v47, 16  ;;  %v2877_v56 = vshll.u32 %v8096_v48, 16  ;;  %v2881_v57 = vshrl.u32 %v8096_v48, 16  ;;  %v881_v4 = vld [vmem:[#allocation2 + $0x18] sm:$0xf] }
  0x3b   : > { %v2851_v58 = vrot.slane %v2850_v50, 4  ;;  %v2860_v59 = vor.u32 %v2859_v51, %v2855_v42  ;;  %v981_v63 = vsel %vm7999_vm2, %v976_v54, %v980_v37  ;;  %v991_v0 = vsel %vm7999_vm2, %v986_v55, %v990_v29  ;;  %v882_v12 = vld [vmem:[#allocation2 + $0x1c] sm:$0xf]  ;;  %v883_v31 = vld [vmem:[#allocation2 + $0x24] sm:$0xf]  ;;  %v7705_v45 = vld [vmem:[%s9768_s3 + $0x10] sm:$0xff]  }
  0x3c   : > { %v2870_v60 = vrot.slane %v2868_v52, 4  ;;  %v2873_v62 = vrot.slane %v2871_v53, 5  ;;  %v2879_v1 = vrot.slane %v2877_v56, 5  ;;  %v2883_v2 = vrot.slane %v2881_v57, 4  ;;  %v884_v38 = vld [vmem:[#allocation2 + $0x28] sm:$0xf] }
  0x3d   : > { %v6138_v6 = vcombine.low %v981_v63, %v991_v0  ;;  %v2856_v8 = vsel %vm7999_vm2, %v2851_v58, %v2855_v42  ;;  %v2861_v9 = vrot.slane %v2860_v59, 4  ;;  %v2889_v17 = vrot.slane %v2887_v49, 5  ;;  %v928_v44 = vld [vmem:[#allocation2 + $0x2c] sm:$0x1]  ;;  %v2801_v51 = vld [vmem:[#allocation2 + $0x24] sm:$0xf] }
  0x3e   : > { %v2874_v11 = vor.u32 %v2873_v62, %v2870_v60  ;;  %v2884_v16 = vor.u32 %v2883_v2, %v2879_v1  ;;  %v3622_v19 = vrot.slane %v8096_v48, 5  ;;  %v993_v29 = vshrl.u32 %v881_v4, 16  ;;  %v2802_v56 = vld [vmem:[#allocation2 + $0x28] sm:$0xf]  ;;  %v2803_v62 = vld [vmem:[#allocation2 + $0x2c] sm:$0x1] }
  0x3f   : > { %6987 = vmatmul.mubr.bf16.vlgmr.msra.gmra.mrb[0].mxu1 %v6138_v6  ;;  %v2866_v25 = vsel %vm7999_vm2, %v2861_v9, %v2865_v46  ;;  %v996_v30 = vshll.u32 %v881_v4, 16  ;;  %v1002_v37 = vshll.u32 %v882_v12, 16  ;;  %v1006_v43 = vshrl.u32 %v882_v12, 16  ;;  %v7701_v46 = vld [vmem:[%s9768_s3 + $0x148] sm:$0xff]   ;;  %v7703_v4 = vld [vmem:[%s9768_s3 + $0x150] sm:$0xff]   ;;  %v7708_v6 = vld [vmem:[%s9768_s3 + $0x18] sm:$0xff]  }
  0x40   : > { %v2875_v26 = vrot.slane %v2874_v11, 4  ;;  %v6297_v32 = vcombine.low %v2856_v8, %v2866_v25  ;;  %7019 = vmatpush3.bf16.msra.mxu1 %v8025_v61  ;;  %v2885_v35 = vrot.slane %v2884_v16, 4  ;;  %v8117_v36 = vrot.slane %v3622_v19, 4 }
  0x41   : > { %v995_v41 = vrot.slane %v993_v29, 4  ;;  %v998_v42 = vrot.slane %v996_v30, 5  ;;  %7020 = vmatprep.subr.bf16.mxu1 %v7702_v15  ;;  %v1004_v47 = vrot.slane %v1002_v37, 5  ;;  %v1012_v49 = vshll.u32 %v927_v24, 16 }
  0x42   : > { %v2880_v40 = vsel %vm7999_vm2, %v2875_v26, %v2879_v1  ;;  %7178 = vmatprep.mubr.bf16.mxu0 %v6297_v32  ;;  %v2890_v61 = vsel %vm7999_vm2, %v2885_v35, %v2889_v17  ;;  %v1017_v50 = vshrl.u32 %v883_v31, 16  ;;  %v1008_v54 = vrot.slane %v1006_v43, 4 }
  0x43   : > { %v6298_v52 = vcombine.low %v2880_v40, %v2890_v61  ;;  %v999_v53 = vor.u32 %v998_v42, %v995_v41  ;;  %v1020_v55 = vshll.u32 %v883_v31, 16  ;;  %v1014_v57 = vrot.slane %v1012_v49, 5  ;;  %v2806_v31 = vld [vmem:[#allocation2 + $0x38] sm:$0x1]  ;;  %v7711_v40 = vld [vmem:[%s9768_s3 + $0x20] sm:$0xff]  }
  0x44   : > { %v1019_v58 = vrot.slane %v1017_v50, 4  ;;  %v1026_v59 = vshll.u32 %v884_v38, 16  ;;  %v1030_v60 = vshrl.u32 %v884_v38, 16  ;;  %7021 = vmatpush3.bf16.msra.mxu1 %v7702_v15  ;;  %v1009_v0 = vor.u32 %v1008_v54, %v1004_v47  ;;  %v7704_v38 = vld [vmem:[%s9768_s3 + $0x158] sm:$0xff]  }
  0x45   : > { %7179 = vmatmul.mubr.bf16.vlgmr.msra.gmra.mrb[0].mxu0 %v6298_v52  ;;  %v1000_v63 = vrot.slane %v999_v53, 4  ;;  %v1022_v1 = vrot.slane %v1020_v55, 5  ;;  %v1036_v2 = vshll.u32 %v928_v44, 16  ;;  %7022 = vmatprep.subr.bf16.mxu1 %v7705_v45  ;;  %v2892_v11 = vshrl.u32 %v2801_v51, 16  ;;  %v7713_v55 = vld [vmem:[%s9768_s3 + $0x28] sm:$0xff]  }
  0x46   : > { %7211 = vmatpush3.bf16.msra.mxu0 %v8035_v7  ;;  %v1028_v8 = vrot.slane %v1026_v59, 5  ;;  %v1032_v9 = vrot.slane %v1030_v60, 4  ;;  %v2895_v12 = vshll.u32 %v2801_v51, 16  ;;  %v1010_v16 = vrot.slane %v1009_v0, 4  ;;  %v6730_v51 = vld [vmem:[%s7975_s27 + $0x38] sm:$0xff]  }
  0x47   : > { %7212 = vmatprep.subr.bf16.mxu0 %v7701_v46  ;;  %v1005_v15 = vsel %vm7999_vm2, %v1000_v63, %v1004_v47  ;;  %v1023_v17 = vor.u32 %v1022_v1, %v1019_v58  ;;  %v1038_v24 = vrot.slane %v1036_v2, 5  ;;  %v2894_v26 = vrot.slane %v2892_v11, 4  ;;  %v8166_v1 = vld [vmem:[%s7975_s27 + $0x40] sm:$0xff]  }
  0x48   : > { %v1033_v25 = vor.u32 %v1032_v9, %v1028_v8  ;;  %v2897_v29 = vrot.slane %v2895_v12, 5  ;;  %v2901_v30 = vshll.u32 %v2802_v56, 16  ;;  %7023 = vmatpush3.bf16.msra.mxu1 %v7705_v45  ;;  %v1015_v7 = vsel %vm7999_vm2, %v1010_v16, %v1014_v57  ;;  %v929_v45 = vld [vmem:[#allocation2 + $0x38] sm:$0x1] }
  0x49   : > { %v1024_v32 = vrot.slane %v1023_v17, 4  ;;  %v2905_v35 = vshrl.u32 %v2802_v56, 16  ;;  %v2911_v37 = vshll.u32 %v2803_v62, 16  ;;  %7024 = vmatprep.subr.bf16.mxu1 %v7708_v6  ;;  %v6139_v41 = vcombine.low %v1005_v15, %v1015_v7 }
  0x4a   : > { %7213 = vmatpush3.bf16.msra.mxu0 %v7701_v46  ;;  %v1034_v42 = vrot.slane %v1033_v25, 4  ;;  %v2898_v43 = vor.u32 %v2897_v29, %v2894_v26  ;;  %v2903_v44 = vrot.slane %v2901_v30, 5  ;;  %v611_v50 = vsel %vm8044_vm5, 0, %v8081_v14  ;;  %v7706_v14 = vld [vmem:[%s9768_s3 + $0x160] sm:$0xff]  }
  0x4b   : > { %v1029_v61 = vsel %vm7999_vm2, %v1024_v32, %v1028_v8  ;;  %v2907_v47 = vrot.slane %v2905_v35, 4  ;;  %v2913_v49 = vrot.slane %v2911_v37, 5  ;;  %7214 = vmatprep.subr.bf16.mxu0 %v7703_v4  ;;  %6990 = vmatprep.mubr.bf16.mxu1 %v6139_v41  ;;  %v6082_v53 = vcombine.low %v611_v50, %v611_v50 }
  0x4c   : > { %v1039_v46 = vsel %vm7999_vm2, %v1034_v42, %v1038_v24  ;;  %v2899_v52 = vrot.slane %v2898_v43, 4  ;;  %v6083_v54 = vcombine.high %v611_v50, %v611_v50  ;;  %7025 = vmatpush3.bf16.msra.mxu1 %v7708_v6  ;;  %v2935_v58 = vshll.u32 %v2806_v31, 16 }
  0x4d   : > { %v6140_v56 = vcombine.low %v1029_v61, %v1039_v46  ;;  %v2908_v57 = vor.u32 %v2907_v47, %v2903_v44  ;;  %v1060_v59 = vshll.u32 %v929_v45, 16  ;;  %7026 = vmatprep.subr.bf16.mxu1 %v7711_v40  ;;  %835 = vst [vmem:[#allocation2 + $0x30] sm:$0xf] %v6082_v53  ;;  %v490_v62 = vshrl.u32 %v8077_v10, 16 }
  0x4e   : > { %v2904_v60 = vsel %vm7999_vm2, %v2899_v52, %v2903_v44  ;;  %836 = vst [vmem:[#allocation2 + $0x34] sm:$0xf] %v6083_v54  ;;  %7215 = vmatpush3.bf16.msra.mxu0 %v7703_v4  ;;  %v493_v63 = vshll.u32 %v8077_v10, 16  ;;  %v423_v0 = vmax.f32 %v8084_v20, 0.0  ;;  %v8168_v6 = vrot.slane %v2935_v58, 5  ;;  %v7715_v20 = vld [vmem:[%s9768_s3 + $0x30] sm:$0xff]  }
  0x4f   : > { %6991 = vmatmul.mubr.bf16.gmra.mrb[4].mxu1 %v6140_v56  ;;  %v2909_v2 = vrot.slane %v2908_v57, 4  ;;  %7216 = vmatprep.subr.bf16.mxu0 %v7704_v38  ;;  %v8170_v8 = vrot.slane %v1060_v59, 5  ;;  %v424_v9 = vmax.f32 %v8087_v21, 0.0  ;;  %v492_v11 = vrot.slane %v490_v62, 7  ;;  %v7709_v56 = vld [vmem:[%s9768_s3 + $0x170] sm:$0xff]  }
  0x50   : > { %v6607_v4 = vunpack.c.h.bf16 %v8071_v3  ;;  %v354_v10 = vmul.f32 %v6606_v22, %v7984_v28  ;;  %v6610_v12 = vunpack.c.l.bf16 %v6730_v51  ;;  %7027 = vmatpush3.bf16.msra.mxu1 %v7711_v40  ;;  %v6611_v17 = vunpack.c.h.bf16 %v6730_v51  ;;  %v7707_v22 = vld [vmem:[%s9768_s3 + $0x168] sm:$0xff]  }
  0x51   : > { %v2914_v15 = vsel %vm7999_vm2, %v2909_v2, %v2913_v49  ;;  %v8182_v16 = vpack.c.bf16 %v424_v9, %v423_v0  ;;  %v6614_v21 = vunpack.c.l.bf16 %v8166_v1  ;;  %7028 = vmatprep.subr.bf16.mxu1 %v7713_v55  ;;  %v495_v25 = vor.u32 %v493_v63, %v492_v11 }
  0x52   : > { %v6299_v24 = vcombine.low %v2904_v60, %v2914_v15  ;;  %7217 = vmatpush3.bf16.msra.mxu0 %v7704_v38  ;;  %v628_v3 = vsel %vm8044_vm5, %v492_v11, 0  ;;  %v355_v26 = vmul.f32 %v6607_v4, %v7984_v28  ;;  %v8194_v7 = vadd.f32 %v7995_v33, %v354_v10 }
  0x53   : > { %v6087_v29 = vcombine.low %v628_v3, %v628_v3  ;;  %7218 = vmatprep.subr.bf16.mxu0 %v7706_v14  ;;  %v497_v30 = vshrl.u32 %v8182_v16, 16  ;;  %v500_v31 = vshll.u32 %v8182_v16, 16  ;;  %v612_v32 = vsel %vm8044_vm5, 0, %v495_v25 }
  0x54   : > { %7182 = vmatprep.mubr.bf16.mxu0 %v6299_v24  ;;  %v8199_v35 = vadd.f32 %v7995_v33, %v355_v26  ;;  %v356_v37 = vmul.f32 %v6610_v12, %v7984_v28  ;;  %v357_v38 = vmul.f32 %v6611_v17, %v7984_v28  ;;  %7029 = vmatpush3.bf16.msra.mxu1 %v7713_v55  ;;  %v2804_v40 = vld [vmem:[#allocation2 + $0x30] sm:$0xf]  ;;  %v6615_v45 = vunpack.c.h.bf16 %v8166_v1 }
  0x55   : > { %v8203_v41 = vld [vmem:[#allocation2 + $0x34] sm:$0xf]  ;;  %v885_v42 = vld [vmem:[#allocation2 + $0x30] sm:$0xf]  ;;  %v6085_v43 = vcombine.low %v612_v32, %v612_v32  ;;  %v6086_v44 = vcombine.high %v612_v32, %v612_v32  ;;  %840 = vst [vmem:[#allocation2 + $0x44] sm:$0x1] %v6087_v29  ;;  %v8207_v61 = vmul.f32 %v6614_v21, %v7984_v28  ;;  %7030 = vmatprep.subr.bf16.mxu1 %v7715_v20 }
  0x56   : > { %v2916_v47 = vshrl.u32 %v2804_v40, 16  ;;  %v2919_v49 = vshll.u32 %v2804_v40, 16  ;;  %v2925_v50 = vshll.u32 %v8203_v41, 16  ;;  %v2929_v51 = vshrl.u32 %v8203_v41, 16  ;;  %v886_v46 = vld [vmem:[#allocation2 + $0x34] sm:$0xf]  ;;  %7219 = vmatpush3.bf16.msra.mxu0 %v7706_v14 }
  0x57   : > { %v1041_v52 = vshrl.u32 %v885_v42, 16  ;;  %v1044_v53 = vshll.u32 %v885_v42, 16  ;;  %v1050_v54 = vshll.u32 %v886_v46, 16  ;;  %v1054_v55 = vshrl.u32 %v886_v46, 16  ;;  %838 = vst [vmem:[#allocation2 + $0x3c] sm:$0xf] %v6085_v43  ;;  %7220 = vmatprep.subr.bf16.mxu0 %v7707_v22 }
  0x58   : > { %839 = vst [vmem:[#allocation2 + $0x40] sm:$0xf] %v6086_v44  ;;  %v2918_v57 = vrot.slane %v2916_v47, 4  ;;  %v2921_v58 = vrot.slane %v2919_v49, 5  ;;  %v2927_v59 = vrot.slane %v2925_v50, 5  ;;  %v2931_v60 = vrot.slane %v2929_v51, 4  ;;  %7031 = vmatpush3.bf16.msra.mxu1 %v7715_v20 }
  0x59   : > { %v1043_v62 = vrot.slane %v1041_v52, 4  ;;  %v1046_v63 = vrot.slane %v1044_v53, 5  ;;  %v1052_v0 = vrot.slane %v1050_v54, 5  ;;  %v1056_v14 = vrot.slane %v1054_v55, 4  ;;  %v7710_v20 = vld [vmem:[%s9768_s3 + $0x178] sm:$0xff]  }
  0x5a   : > { %v2922_v1 = vor.u32 %v2921_v58, %v2918_v57  ;;  %v2932_v2 = vor.u32 %v2931_v60, %v2927_v59  ;;  %v499_v9 = vrot.slane %v497_v30, 7  ;;  %7221 = vmatpush3.bf16.msra.mxu0 %v7707_v22  ;;  %v425_v11 = vmax.f32 %v8194_v7, 0.0 }
  0x5b   : > { %v1047_v4 = vor.u32 %v1046_v63, %v1043_v62  ;;  %v1057_v10 = vor.u32 %v1056_v14, %v1052_v0  ;;  %v426_v12 = vmax.f32 %v8199_v35, 0.0  ;;  %7222 = vmatprep.subr.bf16.mxu0 %v7709_v56  ;;  %v8217_v15 = vadd.f32 %v7995_v33, %v356_v37 }
  0x5c   : > { %v2923_v16 = vrot.slane %v2922_v1, 4  ;;  %v2933_v17 = vrot.slane %v2932_v2, 4  ;;  %v930_v21 = vld [vmem:[#allocation2 + $0x44] sm:$0x1]  ;;  %v502_v25 = vor.u32 %v500_v31, %v499_v9  ;;  %v8225_v3 = vadd.f32 %v7995_v33, %v357_v38 }
  0x5d   : > { %v8222_v24 = vld [vmem:[#allocation2 + $0x44] sm:$0x1]  ;;  %v1048_v22 = vrot.slane %v1047_v4, 4  ;;  %v1058_v26 = vrot.slane %v1057_v10, 4  ;;  %v1084_v29 = vshll.u32 %v930_v21, 16  ;;  %v8233_v42 = vpack.c.bf16 %v426_v12, %v425_v11  ;;  %v7717_v12 = vld [vmem:[%s9768_s3 + $0x38] sm:$0xff]  }
  0x5e   : > { %v2959_v30 = vshll.u32 %v8222_v24, 16  ;;  %v2928_v7 = vsel %vm7999_vm2, %v2923_v16, %v2927_v59  ;;  %v2938_v32 = vsel %vm7999_vm2, %v2933_v17, %v8168_v6  ;;  %v887_v35 = vld [vmem:[#allocation2 + $0x3c] sm:$0xf]  ;;  %7223 = vmatpush3.bf16.msra.mxu0 %v7709_v56  ;;  %v8236_v33 = vmul.f32 %v6615_v45, %v7984_v28  ;;  %v8248_v6 = vld [vmem:[%s9768_s3 + $0x180] sm:$0xff]   ;;  %v3549_v10 = vld [vmem:[#allocation2 + $0xc] sm:$0xe]  ;;  %7032 = vmatprep.subr.bf16.mxu1 %v7717_v12 }
  0x5f   : > { %v888_v37 = vld [vmem:[#allocation2 + $0x40] sm:$0xf]  ;;  %v2807_v40 = vld [vmem:[#allocation2 + $0x3c] sm:$0xf]  ;;  %v6300_v31 = vcombine.low %v2928_v7, %v2938_v32  ;;  %v1053_v38 = vsel %vm7999_vm2, %v1048_v22, %v1052_v0  ;;  %v1063_v43 = vsel %vm7999_vm2, %v1058_v26, %v8170_v8  ;;  %v1065_v44 = vshrl.u32 %v887_v35, 16  ;;  %7224 = vmatprep.subr.bf16.mxu0 %v7710_v20  ;;  %7033 = vmatpush3.bf16.msra.mxu1 %v7717_v12 }
  0x60   : > { %v8243_v47 = vld [vmem:[#allocation2 + $0x40] sm:$0xf]  ;;  %v6141_v28 = vcombine.low %v1053_v38, %v1063_v43  ;;  %v1068_v45 = vshll.u32 %v887_v35, 16  ;;  %v1074_v49 = vshll.u32 %v888_v37, 16  ;;  %v1078_v50 = vshrl.u32 %v888_v37, 16 }
  0x61   : > { %7183 = vmatmul.mubr.bf16.gmra.mrb[4].mxu0 %v6300_v31  ;;  %v1067_v51 = vrot.slane %v1065_v44, 4  ;;  %v1086_v46 = vrot.slane %v1084_v29, 5  ;;  %v2940_v52 = vshrl.u32 %v2807_v40, 16  ;;  %v2943_v8 = vshll.u32 %v2807_v40, 16  ;;  %v8273_v38 = vld [vmem:[%s9767_s2] ss:$0 sm:$0xff] }
  0x62   : > { %6994 = vmatprep.mubr.bf16.mxu1 %v6141_v28  ;;  %v1070_v53 = vrot.slane %v1068_v45, 5  ;;  %v1076_v54 = vrot.slane %v1074_v49, 5  ;;  %v1080_v55 = vrot.slane %v1078_v50, 4  ;;  %v2949_v56 = vshll.u32 %v8243_v47, 16  ;;  %7225 = vmatpush3.bf16.msra.mxu0 %v7710_v20 }
  0x63   : > { %v2942_v57 = vrot.slane %v2940_v52, 4  ;;  %v2945_v58 = vrot.slane %v2943_v8, 5  ;;  %v2953_v59 = vshrl.u32 %v8243_v47, 16  ;;  %v2961_v60 = vrot.slane %v2959_v30, 5  ;;  %7258 = vmatprep.subr.bf16.mxu0 %v8248_v6 }
  0x64   : > { %v1071_v62 = vor.u32 %v1070_v53, %v1067_v51  ;;  %v1081_v63 = vor.u32 %v1080_v55, %v1076_v54  ;;  %v2951_v0 = vrot.slane %v2949_v56, 5  ;;  %v613_v14 = vsel %vm8044_vm5, 0, %v502_v25  ;;  %v7721_v55 = vld [vmem:[%s9768_s3 + $0x80] sm:$0xff]  }
  0x65   : > { %v2946_v1 = vor.u32 %v2945_v58, %v2942_v57  ;;  %v2955_v2 = vrot.slane %v2953_v59, 4  ;;  %v629_v11 = vsel %vm8044_vm5, %v499_v9, 0  ;;  %v6088_v4 = vcombine.low %v613_v14, %v613_v14  ;;  %7066 = vmatprep.subr.bf16.mxu1 %v7721_v55 }
  0x66   : > { %v1072_v20 = vrot.slane %v1071_v62, 4  ;;  %v1082_v16 = vrot.slane %v1081_v63, 4  ;;  %v6089_v17 = vcombine.high %v613_v14, %v613_v14  ;;  %v6090_v21 = vcombine.low %v629_v11, %v629_v11 }
  0x67   : > { %v2947_v22 = vrot.slane %v2946_v1, 4  ;;  %v2956_v26 = vor.u32 %v2955_v2, %v2951_v0  ;;  %841 = vst [vmem:[#allocation2 + $0x48] sm:$0xf] %v6088_v4  ;;  %v504_v25 = vshrl.u32 %v8233_v42, 16  ;;  %v507_v29 = vshll.u32 %v8233_v42, 16 }
  0x68   : > { %v1077_v9 = vsel %vm7999_vm2, %v1072_v20, %v1076_v54  ;;  %v1087_v30 = vsel %vm7999_vm2, %v1082_v16, %v1086_v46  ;;  %842 = vst [vmem:[#allocation2 + $0x4c] sm:$0xf] %v6089_v17  ;;  %843 = vst [vmem:[#allocation2 + $0x50] sm:$0x1] %v6090_v21  ;;  %v427_v7 = vmax.f32 %v8217_v15, 0.0  ;;  %v428_v32 = vmax.f32 %v8225_v3, 0.0 }
  0x69   : > { %v6142_v35 = vcombine.low %v1077_v9, %v1087_v30  ;;  %v2952_v37 = vsel %vm7999_vm2, %v2947_v22, %v2951_v0  ;;  %v2957_v40 = vrot.slane %v2956_v26, 4  ;;  %v506_v42 = vrot.slane %v504_v25, 7 }
  0x6a   : > { %v452_v31 = vpack.c.bf16 %v428_v32, %v427_v7  ;;  %v397_v43 = vadd.f32 %v8273_v38, %v8207_v61  ;;  %v398_v15 = vadd.f32 %v8273_v38, %v8236_v33  ;;  %v6321_v44 = vrot.slane %v3549_v10, 9 }
  0x6b   : > { %6995 = vmatmul.mubr.bf16.gmra.mrb[8].mxu1 %v6142_v35  ;;  %v2962_v28 = vsel %vm7999_vm2, %v2957_v40, %v2961_v60  ;;  %v509_v45 = vor.u32 %v507_v29, %v506_v42  ;;  %v630_v49 = vsel %vm8044_vm5, %v506_v42, 0  ;;  %v3615_v61 = vrot.slane %v8090_v27, 5 }
  0x6c   : > { %v6301_v50 = vcombine.low %v2952_v37, %v2962_v28  ;;  %v6093_v51 = vcombine.low %v630_v49, %v630_v49  ;;  %v511_v33 = vshrl.u32 %v452_v31, 16  ;;  %v514_v46 = vshll.u32 %v452_v31, 16 }
  0x6d   : > { %v614_v52 = vsel %vm8044_vm5, 0, %v509_v45  ;;  %v429_v8 = vmax.f32 %v397_v43, 0.0  ;;  %v430_v53 = vmax.f32 %v398_v15, 0.0  ;;  %v8294_v54 = vsel %vm8281_vm8, %v6321_v44, %v3615_v61 }
  0x6e   : > { %7186 = vmatprep.mubr.bf16.mxu0 %v6301_v50  ;;  %v2810_v56 = vld [vmem:[#allocation2 + $0x48] sm:$0xf]  ;;  %v6091_v57 = vcombine.low %v614_v52, %v614_v52  ;;  %v6092_v58 = vcombine.high %v614_v52, %v614_v52  ;;  %846 = vst [vmem:[#allocation2 + $0x5c] sm:$0x1] %v6093_v51  ;;  %v513_v59 = vrot.slane %v511_v33, 7  ;;  %v8299_v60 = vrot.slane %v3615_v61, 4 }
  0x6f   : > { %v889_v27 = vld [vmem:[#allocation2 + $0x48] sm:$0xf]  ;;  %v8301_v62 = vld [vmem:[#allocation2 + $0x4c] sm:$0xf]  ;;  %v8303_v63 = vld [vmem:[#allocation2 + $0x50] sm:$0x1]  ;;  %v8305_v1 = vpack.c.bf16 %v430_v53, %v429_v8  ;;  %v8312_v2 = vsel %vm8281_vm8, %v8117_v36, %v3625_v23 }
  0x70   : > { %v2964_v0 = vshrl.u32 %v2810_v56, 16  ;;  %v2967_v14 = vshll.u32 %v2810_v56, 16  ;;  %v2973_v11 = vshll.u32 %v8301_v62, 16  ;;  %v2977_v4 = vshrl.u32 %v8301_v62, 16  ;;  %v890_v12 = vld [vmem:[#allocation2 + $0x4c] sm:$0xf] }
  0x71   : > { %v2983_v10 = vshll.u32 %v8303_v63, 16  ;;  %v1089_v20 = vshrl.u32 %v889_v27, 16  ;;  %844 = vst [vmem:[#allocation2 + $0x54] sm:$0xf] %v6091_v57  ;;  %845 = vst [vmem:[#allocation2 + $0x58] sm:$0xf] %v6092_v58  ;;  %v516_v37 = vor.u32 %v514_v46, %v513_v59 }
  0x72   : > { %v2966_v16 = vrot.slane %v2964_v0, 4  ;;  %v2969_v17 = vrot.slane %v2967_v14, 5  ;;  %v931_v21 = vld [vmem:[#allocation2 + $0x50] sm:$0x1]  ;;  %v1092_v39 = vshll.u32 %v889_v27, 16  ;;  %v1098_v22 = vshll.u32 %v890_v12, 16 }
  0x73   : > { %v2975_v26 = vrot.slane %v2973_v11, 5  ;;  %v2979_v25 = vrot.slane %v2977_v4, 4  ;;  %v2985_v23 = vrot.slane %v2983_v10, 5  ;;  %v1091_v36 = vrot.slane %v1089_v20, 4 }
  0x74   : > { %v2970_v29 = vor.u32 %v2969_v17, %v2966_v16  ;;  %v1094_v9 = vrot.slane %v1092_v39, 5  ;;  %v1100_v30 = vrot.slane %v1098_v22, 5  ;;  %v1102_v7 = vshrl.u32 %v890_v12, 16 }
  0x75   : > { %v2980_v32 = vor.u32 %v2979_v25, %v2975_v26  ;;  %v1108_v35 = vshll.u32 %v931_v21, 16  ;;  %v631_v40 = vsel %vm8044_vm5, %v513_v59, 0  ;;  %v932_v15 = vld [vmem:[#allocation2 + $0x5c] sm:$0x1]  ;;  %v615_v53 = vsel %vm8044_vm5, 0, %v516_v37 }
  0x76   : > { %v2971_v42 = vrot.slane %v2970_v29, 4  ;;  %v1095_v31 = vor.u32 %v1094_v9, %v1091_v36  ;;  %v1104_v43 = vrot.slane %v1102_v7, 4  ;;  %v8319_v44 = vld [vmem:[#allocation2 + $0x5c] sm:$0x1]  ;;  %v6096_v28 = vcombine.low %v631_v40, %v631_v40 }
  0x77   : > { %v2981_v45 = vrot.slane %v2980_v32, 4  ;;  %v1110_v49 = vrot.slane %v1108_v35, 5  ;;  %v1132_v61 = vshll.u32 %v932_v15, 16  ;;  %v3007_v50 = vshll.u32 %v8319_v44, 16 }
  0x78   : > { %v2976_v51 = vsel %vm7999_vm2, %v2971_v42, %v2975_v26  ;;  %v1096_v33 = vrot.slane %v1095_v31, 4  ;;  %v1105_v46 = vor.u32 %v1104_v43, %v1100_v30  ;;  %v891_v52 = vld [vmem:[#allocation2 + $0x54] sm:$0xf]  ;;  %v892_v8 = vld [vmem:[#allocation2 + $0x58] sm:$0xf]  ;;  %v6094_v40 = vcombine.low %v615_v53, %v615_v53  ;;  %v6732_v43 = vld [vmem:[%s7975_s27 + $0x48] sm:$0xff]  }
  0x79   : > { %849 = vst [vmem:[#allocation2 + $0x68] sm:$0x1] %v6096_v28  ;;  %v2986_v55 = vsel %vm7999_vm2, %v2981_v45, %v2985_v23  ;;  %v1113_v56 = vshrl.u32 %v891_v52, 16  ;;  %v1116_v27 = vshll.u32 %v891_v52, 16  ;;  %v1122_v57 = vshll.u32 %v892_v8, 16 }
  0x7a   : > { %v2813_v58 = vld [vmem:[#allocation2 + $0x54] sm:$0xf]  ;;  %v6302_v59 = vcombine.low %v2976_v51, %v2986_v55  ;;  %v1101_v0 = vsel %vm7999_vm2, %v1096_v33, %v1100_v30  ;;  %v1106_v14 = vrot.slane %v1105_v46, 4  ;;  %v1126_v11 = vshrl.u32 %v892_v8, 16  ;;  %v8330_v4 = vld [vmem:[#allocation2 + $0x58] sm:$0xf] }
  0x7b   : > { %v1115_v10 = vrot.slane %v1113_v56, 4  ;;  %v1118_v12 = vrot.slane %v1116_v27, 5  ;;  %v1124_v20 = vrot.slane %v1122_v57, 5  ;;  %v1134_v16 = vrot.slane %v1132_v61, 5  ;;  %v3550_v31 = vld [vmem:[#allocation2 + $0x18] sm:$0xe] }
  0x7c   : > { %7187 = vmatmul.mubr.bf16.gmra.mrb[8].mxu0 %v6302_v59  ;;  %v1111_v17 = vsel %vm7999_vm2, %v1106_v14, %v1110_v49  ;;  %v1128_v21 = vrot.slane %v1126_v11, 4  ;;  %v2988_v39 = vshrl.u32 %v2813_v58, 16  ;;  %v2991_v22 = vshll.u32 %v2813_v58, 16  ;;  %847 = vst [vmem:[#allocation2 + $0x60] sm:$0xf] %v6094_v40 }
  0x7d   : > { %v6143_v26 = vcombine.low %v1101_v0, %v1111_v17  ;;  %v1119_v25 = vor.u32 %v1118_v12, %v1115_v10  ;;  %v2997_v23 = vshll.u32 %v8330_v4, 16  ;;  %v3001_v36 = vshrl.u32 %v8330_v4, 16  ;;  %v6733_v10 = vld [vmem:[%s7975_s27 + $0x50] sm:$0xff]  }
  0x7e   : > { %v1129_v29 = vor.u32 %v1128_v21, %v1124_v20  ;;  %v2990_v9 = vrot.slane %v2988_v39, 4  ;;  %v2993_v30 = vrot.slane %v2991_v22, 5  ;;  %v3009_v7 = vrot.slane %v3007_v50, 5  ;;  %v8379_v22 = vld [vmem:[%s9766_s1] ss:$0 sm:$0xff] }
  0x7f   : > { %6998 = vmatprep.mubr.bf16.mxu1 %v6143_v26  ;;  %v1120_v32 = vrot.slane %v1119_v25, 4  ;;  %v2999_v35 = vrot.slane %v2997_v23, 5  ;;  %v3003_v37 = vrot.slane %v3001_v36, 4  ;;  %v6095_v45 = vcombine.high %v615_v53, %v615_v53 }
  0x80   : > { %v8336_v42 = vld [vmem:[#allocation2 + $0x68] sm:$0x1]  ;;  %v1130_v15 = vrot.slane %v1129_v29, 4  ;;  %v2994_v28 = vor.u32 %v2993_v30, %v2990_v9  ;;  %v518_v46 = vshrl.u32 %v8305_v1, 16  ;;  %v521_v53 = vshll.u32 %v8305_v1, 16 }
  0x81   : > { %v3031_v49 = vshll.u32 %v8336_v42, 16  ;;  %v933_v61 = vld [vmem:[#allocation2 + $0x68] sm:$0x1]  ;;  %v1125_v51 = vsel %vm7999_vm2, %v1120_v32, %v1124_v20  ;;  %v3004_v33 = vor.u32 %v3003_v37, %v2999_v35  ;;  %848 = vst [vmem:[#allocation2 + $0x64] sm:$0xf] %v6095_v45  ;;  %v8357_v0 = vsel %vm8281_vm8, %v8299_v60, %v3618_v13 }
  0x82   : > { %v1156_v50 = vshll.u32 %v933_v61, 16  ;;  %v1135_v52 = vsel %vm7999_vm2, %v1130_v15, %v1134_v16  ;;  %v2995_v8 = vrot.slane %v2994_v28, 4  ;;  %v520_v58 = vrot.slane %v518_v46, 7 }
  0x83   : > { %v8345_v55 = vrot.slane %v3031_v49, 5  ;;  %v6144_v56 = vcombine.low %v1125_v51, %v1135_v52  ;;  %v3005_v27 = vrot.slane %v3004_v33, 4  ;;  %v6322_v14 = vrot.slane %v3550_v31, 9  ;;  %v2816_v48 = vld [vmem:[#allocation2 + $0x60] sm:$0xf] }
  0x84   : > { %v8348_v57 = vrot.slane %v1156_v50, 5  ;;  %v3000_v59 = vsel %vm7999_vm2, %v2995_v8, %v2999_v35  ;;  %v6618_v11 = vunpack.c.l.bf16 %v6732_v43  ;;  %v523_v12 = vor.u32 %v521_v53, %v520_v58  ;;  %v893_v23 = vld [vmem:[#allocation2 + $0x60] sm:$0xf] }
  0x85   : > { %6999 = vmatmul.mubr.bf16.gmra.mrb[12].mxu1 %v6144_v56  ;;  %v3010_v1 = vsel %vm7999_vm2, %v3005_v27, %v3009_v7  ;;  %v632_v20 = vsel %vm8044_vm5, %v520_v58, 0  ;;  %v6353_v16 = vcombine.low %v8294_v54, %v8357_v0  ;;  %v8370_v13 = vsel %vm8281_vm8, %v6322_v14, %v3622_v19 }
  0x86   : > { %v6303_v5 = vcombine.low %v3000_v59, %v3010_v1  ;;  %v6099_v17 = vcombine.low %v632_v20, %v632_v20  ;;  %v6619_v60 = vunpack.c.h.bf16 %v6732_v43  ;;  %v616_v21 = vsel %vm8044_vm5, 0, %v523_v12 }
  0x87   : > { %v6354_v39 = vcombine.low %v8370_v13, %v8312_v2  ;;  %v360_v26 = vmul.f32 %v8379_v22, %v6618_v11  ;;  %v6622_v25 = vunpack.c.l.bf16 %v6733_v10  ;;  %v6097_v19 = vcombine.low %v616_v21, %v616_v21  ;;  %v7716_v2 = vld [vmem:[%s9768_s3 + $0x190] sm:$0xff]   ;;  %v8435_v13 = vld [vmem:[#allocation2 + $0x48] sm:$0xe] }
  0x88   : > { %7190 = vmatprep.mubr.bf16.mxu0 %v6303_v5  ;;  %v6098_v36 = vcombine.high %v616_v21, %v616_v21  ;;  %852 = vst [vmem:[#allocation2 + $0x74] sm:$0x1] %v6099_v17  ;;  %v361_v29 = vmul.f32 %v8379_v22, %v6619_v60  ;;  %v6623_v9 = vunpack.c.h.bf16 %v6733_v10  ;;  %v8383_v30 = vld [vmem:[#allocation2 + $0x64] sm:$0xf]  ;;  %v3012_v7 = vshrl.u32 %v2816_v48, 16 }
  0x89   : > { %v3015_v32 = vshll.u32 %v2816_v48, 16  ;;  %v894_v35 = vld [vmem:[#allocation2 + $0x64] sm:$0xf]  ;;  %v399_v37 = vadd.f32 %v8273_v38, %v360_v26  ;;  %v362_v40 = vmul.f32 %v8379_v22, %v6622_v25  ;;  %v3021_v31 = vshll.u32 %v8383_v30, 16  ;;  %850 = vst [vmem:[#allocation2 + $0x6c] sm:$0xf] %v6097_v19 }
  0x8a   : > { %v3025_v43 = vshrl.u32 %v8383_v30, 16  ;;  %v1137_v15 = vshrl.u32 %v893_v23, 16  ;;  %v1140_v28 = vshll.u32 %v893_v23, 16  ;;  %851 = vst [vmem:[#allocation2 + $0x70] sm:$0xf] %v6098_v36  ;;  %v3014_v45 = vrot.slane %v3012_v7, 4 }
  0x8b   : > { %v3017_v49 = vrot.slane %v3015_v32, 5  ;;  %v1146_v61 = vshll.u32 %v894_v35, 16  ;;  %v1150_v51 = vshrl.u32 %v894_v35, 16  ;;  %v3023_v33 = vrot.slane %v3021_v31, 5 }
  0x8c   : > { %v3027_v50 = vrot.slane %v3025_v43, 4  ;;  %v1139_v46 = vrot.slane %v1137_v15, 4  ;;  %v1142_v52 = vrot.slane %v1140_v28, 5  ;;  %v400_v27 = vadd.f32 %v8273_v38, %v361_v29 }
  0x8d   : > { %v3018_v8 = vor.u32 %v3017_v49, %v3014_v45  ;;  %v1148_v53 = vrot.slane %v1146_v61, 5  ;;  %v1152_v56 = vrot.slane %v1150_v51, 4  ;;  %v431_v14 = vmax.f32 %v399_v37, 0.0  ;;  %v3551_v37 = vld [vmem:[#allocation2 + $0x24] sm:$0xe] }
  0x8e   : > { %v3028_v58 = vor.u32 %v3027_v50, %v3023_v33  ;;  %v1143_v59 = vor.u32 %v1142_v52, %v1139_v46  ;;  %v363_v11 = vmul.f32 %v8379_v22, %v6623_v9  ;;  %v432_v20 = vmax.f32 %v400_v27, 0.0 }
  0x8f   : > { %v3019_v10 = vrot.slane %v3018_v8, 4  ;;  %v1153_v1 = vor.u32 %v1152_v56, %v1148_v53  ;;  %v934_v12 = vld [vmem:[#allocation2 + $0x74] sm:$0x1]  ;;  %v401_v5 = vadd.f32 %v8273_v38, %v362_v40  ;;  %v3552_v40 = vld [vmem:[#allocation2 + $0x30] sm:$0xe] }
  0x90   : > { %v3029_v17 = vrot.slane %v3028_v58, 4  ;;  %v1144_v60 = vrot.slane %v1143_v59, 4  ;;  %v1180_v21 = vshll.u32 %v934_v12, 16  ;;  %v402_v26 = vadd.f32 %v8273_v38, %v363_v11  ;;  %v895_v23 = vld [vmem:[#allocation2 + $0x6c] sm:$0xf] }
  0x91   : > { %v3024_v25 = vsel %vm7999_vm2, %v3019_v10, %v3023_v33  ;;  %v1154_v48 = vrot.slane %v1153_v1, 4  ;;  %v896_v19 = vld [vmem:[#allocation2 + $0x70] sm:$0xf]  ;;  %v454_v36 = vpack.c.bf16 %v432_v20, %v431_v14  ;;  %v433_v29 = vmax.f32 %v401_v5, 0.0  ;;  %v7806_v59 = vld [vmem:[#allocation2 + $0x2c] sm:$0x1] }
  0x92   : > { %v3034_v9 = vsel %vm7999_vm2, %v3029_v17, %v8345_v55  ;;  %v1149_v7 = vsel %vm7999_vm2, %v1144_v60, %v1148_v53  ;;  %v1161_v32 = vshrl.u32 %v895_v23, 16  ;;  %v1164_v35 = vshll.u32 %v895_v23, 16  ;;  %v7805_v53 = vld [vmem:[#allocation2 + $0x28] sm:$0xf]  ;;  %v6734_v5 = vld [vmem:[%s7975_s27 + $0x58] sm:$0xff]   ;;  %v6735_v60 = vld [vmem:[%s7975_s27 + $0x60] sm:$0xff]  }
  0x93   : > { %v6304_v31 = vcombine.low %v3024_v25, %v3034_v9  ;;  %v1159_v43 = vsel %vm7999_vm2, %v1154_v48, %v8348_v57  ;;  %v1170_v15 = vshll.u32 %v896_v19, 16  ;;  %v1174_v28 = vshrl.u32 %v896_v19, 16 }
  0x94   : > { %v6145_v45 = vcombine.low %v1149_v7, %v1159_v43  ;;  %v1163_v49 = vrot.slane %v1161_v32, 4  ;;  %v1166_v61 = vrot.slane %v1164_v35, 5  ;;  %v1182_v51 = vrot.slane %v1180_v21, 5 }
  0x95   : > { %7191 = vmatmul.mubr.bf16.gmra.mrb[12].mxu0 %v6304_v31  ;;  %v1172_v55 = vrot.slane %v1170_v15, 5  ;;  %v1176_v33 = vrot.slane %v1174_v28, 4  ;;  %v525_v50 = vshrl.u32 %v454_v36, 16  ;;  %v528_v46 = vshll.u32 %v454_v36, 16  ;;  %v7807_v31 = vld [vmem:[#allocation2 + $0x38] sm:$0x1] }
  0x96   : > { %7002 = vmatprep.mubr.bf16.mxu1 %v6145_v45  ;;  %v1167_v52 = vor.u32 %v1166_v61, %v1163_v49  ;;  %7226 = vmatprep.mubr.bf16.mxu0 %v6353_v16  ;;  %v434_v8 = vmax.f32 %v402_v26, 0.0  ;;  %v6323_v57 = vrot.slane %v3551_v37, 9  ;;  %v3629_v56 = vrot.slane %v7805_v53, 5  ;;  %v3553_v28 = vld [vmem:[#allocation2 + $0x3c] sm:$0xe] }
  0x97   : > { %v1177_v27 = vor.u32 %v1176_v33, %v1172_v55  ;;  %v527_v58 = vrot.slane %v525_v50, 7  ;;  %v3632_v14 = vrot.slane %v7806_v59, 5  ;;  %v6324_v11 = vrot.slane %v3552_v40, 9 }
  0x98   : > { %v1168_v10 = vrot.slane %v1167_v52, 4  ;;  %v455_v1 = vpack.c.bf16 %v434_v8, %v433_v29  ;;  %v3630_v12 = vsel %vm8281_vm8, %v6323_v57, %v3629_v56  ;;  %v3631_v20 = vrot.slane %v3629_v56, 4  ;;  %v8445_v57 = vld [vmem:[%s7975_s27 + $0x68] sm:$0xff]  }
  0x99   : > { %v1178_v17 = vrot.slane %v1177_v27, 4  ;;  %v530_v54 = vor.u32 %v528_v46, %v527_v58  ;;  %v633_v0 = vsel %vm8044_vm5, %v527_v58, 0  ;;  %v3636_v16 = vrot.slane %v8203_v41, 5  ;;  %v7714_v41 = vld [vmem:[%s9768_s3 + $0x188] sm:$0xff]  }
  0x9a   : > { %v1173_v21 = vsel %vm7999_vm2, %v1168_v10, %v1172_v55  ;;  %v6102_v26 = vcombine.low %v633_v0, %v633_v0  ;;  %v532_v25 = vshrl.u32 %v455_v1, 16  ;;  %v535_v48 = vshll.u32 %v455_v1, 16 }
  0x9b   : > { %v1183_v23 = vsel %vm7999_vm2, %v1178_v17, %v1182_v51  ;;  %v617_v19 = vsel %vm8044_vm5, 0, %v530_v54  ;;  %v3633_v36 = vsel %vm8281_vm8, %v3631_v20, %v3632_v14  ;;  %v3637_v29 = vsel %vm8281_vm8, %v6324_v11, %v3636_v16  ;;  %v7718_v54 = vld [vmem:[%s9768_s3 + $0x198] sm:$0xff]  }
  0x9c   : > { %v6146_v9 = vcombine.low %v1173_v21, %v1183_v23  ;;  %v6100_v7 = vcombine.low %v617_v19, %v617_v19  ;;  %v6101_v32 = vcombine.high %v617_v19, %v617_v19  ;;  %855 = vst [vmem:[#allocation2 + $0x80] sm:$0x1] %v6102_v26  ;;  %v534_v35 = vrot.slane %v532_v25, 7 }
  0x9d   : > { %7227 = vmatmul.mubr.bf16.vlgmr.msra.gmra.mrb[0].mxu0 %v6354_v39  ;;  %v6355_v37 = vcombine.low %v3630_v12, %v3633_v36  ;;  %v3638_v40 = vrot.slane %v3636_v16, 4  ;;  %v3639_v43 = vrot.slane %v7807_v31, 5  ;;  %v6626_v15 = vunpack.c.l.bf16 %v6734_v5 }
  0x9e   : > { %7003 = vmatmul.mubr.bf16.gmra.mrb[16].mxu1 %v6146_v9  ;;  %7259 = vmatpush3.bf16.msra.mxu0 %v8248_v6  ;;  %853 = vst [vmem:[#allocation2 + $0x78] sm:$0xf] %v6100_v7  ;;  %854 = vst [vmem:[#allocation2 + $0x7c] sm:$0xf] %v6101_v32  ;;  %v537_v45 = vor.u32 %v535_v48, %v534_v35  ;;  %v634_v49 = vsel %vm8044_vm5, %v534_v35, 0  ;;  %v6627_v61 = vunpack.c.h.bf16 %v6734_v5  ;;  %v6630_v51 = vunpack.c.l.bf16 %v6735_v60 }
  0x9f   : > { %v6105_v39 = vcombine.low %v634_v49, %v634_v49  ;;  %7230 = vmatprep.mubr.bf16.mxu0 %v6355_v37  ;;  %7260 = vmatprep.subr.bf16.mxu0 %v7714_v41  ;;  %v3640_v6 = vsel %vm8281_vm8, %v3638_v40, %v3639_v43  ;;  %v364_v55 = vmul.f32 %v8379_v22, %v6626_v15  ;;  %v6631_v33 = vunpack.c.h.bf16 %v6735_v60  ;;  %v7722_v37 = vld [vmem:[%s9768_s3 + $0x1a0] sm:$0xff]  }
  0xa0   : > { %v618_v50 = vsel %vm8044_vm5, 0, %v537_v45  ;;  %v6356_v46 = vcombine.low %v3637_v29, %v3640_v6  ;;  %v365_v52 = vmul.f32 %v8379_v22, %v6627_v61  ;;  %v366_v8 = vmul.f32 %v8379_v22, %v6630_v51 }
  0xa1   : > { %v6103_v53 = vcombine.low %v618_v50, %v618_v50  ;;  %v6104_v56 = vcombine.high %v618_v50, %v618_v50  ;;  %858 = vst [vmem:[#allocation2 + $0x8c] sm:$0x1] %v6105_v39  ;;  %v403_v27 = vadd.f32 %v8273_v38, %v364_v55  ;;  %v367_v58 = vmul.f32 %v8379_v22, %v6631_v33 }
  0xa2   : > { %7261 = vmatpush3.bf16.msra.mxu0 %v7714_v41  ;;  %v404_v59 = vadd.f32 %v8273_v38, %v365_v52  ;;  %v405_v14 = vadd.f32 %v8273_v38, %v366_v8  ;;  %v6325_v11 = vrot.slane %v3553_v28, 9  ;;  %v3643_v10 = vrot.slane %v8243_v47, 5 }
  0xa3   : > { %v935_v1 = vld [vmem:[#allocation2 + $0x80] sm:$0x1]  ;;  %856 = vst [vmem:[#allocation2 + $0x84] sm:$0xf] %v6103_v53  ;;  %857 = vst [vmem:[#allocation2 + $0x88] sm:$0xf] %v6104_v56  ;;  %v406_v20 = vadd.f32 %v8273_v38, %v367_v58  ;;  %7262 = vmatprep.subr.bf16.mxu0 %v7716_v2  ;;  %v6634_v48 = vunpack.c.l.bf16 %v8445_v57  ;;  %v6635_v23 = vunpack.c.h.bf16 %v8445_v57 }
  0xa4   : > { %v435_v12 = vmax.f32 %v403_v27, 0.0  ;;  %v3646_v5 = vrot.slane %v8222_v24, 5  ;;  %v6326_v17 = vrot.slane %v8435_v13, 9  ;;  %v1204_v0 = vshll.u32 %v935_v1, 16  ;;  %v7726_v56 = vld [vmem:[%s9768_s3 + $0x1a8] sm:$0xff]  }
  0xa5   : > { %v436_v16 = vmax.f32 %v404_v59, 0.0  ;;  %v437_v60 = vmax.f32 %v405_v14, 0.0  ;;  %v3644_v47 = vsel %vm8281_vm8, %v6325_v11, %v3643_v10  ;;  %v8460_v21 = vld [vmem:[#allocation2 + $0x78] sm:$0xf]  ;;  %v8462_v26 = vld [vmem:[#allocation2 + $0x7c] sm:$0xf]  ;;  %7231 = vmatmul.mubr.bf16.gmra.mrb[4].mxu0 %v6356_v46 }
  0xa6   : > { %v438_v25 = vmax.f32 %v406_v20, 0.0  ;;  %v3645_v24 = vrot.slane %v3643_v10, 4  ;;  %v1185_v19 = vshrl.u32 %v8460_v21, 16  ;;  %v1188_v36 = vshll.u32 %v8460_v21, 16  ;;  %7263 = vmatpush3.bf16.msra.mxu0 %v7716_v2 }
  0xa7   : > { %v1194_v41 = vshll.u32 %v8462_v26, 16  ;;  %v1198_v29 = vshrl.u32 %v8462_v26, 16  ;;  %v1206_v9 = vrot.slane %v1204_v0, 5  ;;  %v456_v7 = vpack.c.bf16 %v436_v16, %v435_v12  ;;  %7264 = vmatprep.subr.bf16.mxu0 %v7718_v54 }
  0xa8   : > { %v457_v32 = vpack.c.bf16 %v438_v25, %v437_v60  ;;  %v3647_v35 = vsel %vm8281_vm8, %v3645_v24, %v3646_v5  ;;  %v1187_v40 = vrot.slane %v1185_v19, 4  ;;  %v1190_v31 = vrot.slane %v1188_v36, 5  ;;  %v936_v28 = vld [vmem:[#allocation2 + $0x8c] sm:$0x1]  ;;  %v7730_v24 = vld [vmem:[%s9768_s3 + $0x1b0] sm:$0xff]  }
  0xa9   : > { %v1196_v43 = vrot.slane %v1194_v41, 5  ;;  %v1200_v15 = vrot.slane %v1198_v29, 4  ;;  %v1228_v45 = vshll.u32 %v936_v28, 16  ;;  %v539_v49 = vshrl.u32 %v456_v7, 16 }
  0xaa   : > { %v542_v61 = vshll.u32 %v456_v7, 16  ;;  %v546_v51 = vshrl.u32 %v457_v32, 16  ;;  %v1191_v2 = vor.u32 %v1190_v31, %v1187_v40  ;;  %v8475_v6 = vld [vmem:[#allocation2 + $0x84] sm:$0xf]  ;;  %v8477_v55 = vld [vmem:[#allocation2 + $0x88] sm:$0xf]  ;;  %v6357_v50 = vcombine.low %v3644_v47, %v3647_v35  ;;  %7265 = vmatpush3.bf16.msra.mxu0 %v7718_v54 }
  0xab   : > { %v1201_v39 = vor.u32 %v1200_v15, %v1196_v43  ;;  %v549_v33 = vshll.u32 %v457_v32, 16  ;;  %v1209_v46 = vshrl.u32 %v8475_v6, 16  ;;  %v1212_v52 = vshll.u32 %v8475_v6, 16  ;;  %7266 = vmatprep.subr.bf16.mxu0 %v7722_v37  ;;  %v6737_v15 = vld [vmem:[%s7975_s27 + $0x70] sm:$0xff]  }
  0xac   : > { %v1218_v8 = vshll.u32 %v8477_v55, 16  ;;  %v1222_v53 = vshrl.u32 %v8477_v55, 16  ;;  %v1192_v27 = vrot.slane %v1191_v2, 4  ;;  %v1230_v59 = vrot.slane %v1228_v45, 5  ;;  %7234 = vmatprep.mubr.bf16.mxu0 %v6357_v50 }
  0xad   : > { %v1202_v58 = vrot.slane %v1201_v39, 4  ;;  %v541_v14 = vrot.slane %v539_v49, 7  ;;  %v1211_v11 = vrot.slane %v1209_v46, 4  ;;  %v1214_v10 = vrot.slane %v1212_v52, 5  ;;  %v3556_v49 = vld [vmem:[#allocation2 + $0x60] sm:$0xe] }
  0xae   : > { %v1220_v1 = vrot.slane %v1218_v8, 5  ;;  %v1224_v12 = vrot.slane %v1222_v53, 4  ;;  %v1197_v20 = vsel %vm7999_vm2, %v1192_v27, %v1196_v43  ;;  %7267 = vmatpush3.bf16.msra.mxu0 %v7722_v37  ;;  %v548_v36 = vrot.slane %v546_v51, 7 }
  0xaf   : > { %v1207_v5 = vsel %vm7999_vm2, %v1202_v58, %v1206_v9  ;;  %v544_v54 = vor.u32 %v542_v61, %v541_v14  ;;  %v635_v0 = vsel %vm8044_vm5, %v541_v14, 0  ;;  %v1215_v60 = vor.u32 %v1214_v10, %v1211_v11  ;;  %7268 = vmatprep.subr.bf16.mxu0 %v7726_v56  ;;  %v8530_v58 = vld [vmem:[%s9768_s3 + $0x1c0] sm:$0xff]  }
  0xb0   : > { %v6147_v16 = vcombine.low %v1197_v20, %v1207_v5  ;;  %v1225_v47 = vor.u32 %v1224_v12, %v1220_v1  ;;  %v6108_v25 = vcombine.low %v635_v0, %v635_v0  ;;  %v3650_v41 = vrot.slane %v8301_v62, 5  ;;  %v3555_v62 = vld [vmem:[#allocation2 + $0x54] sm:$0xe] }
  0xb1   : > { %v619_v19 = vsel %vm8044_vm5, 0, %v544_v54  ;;  %v3653_v29 = vrot.slane %v8303_v63, 5  ;;  %v1216_v9 = vrot.slane %v1215_v60, 4  ;;  %v551_v37 = vor.u32 %v549_v33, %v548_v36  ;;  %v7734_v63 = vld [vmem:[%s9768_s3 + $0x1b8] sm:$0xff]  }
  0xb2   : > { %7006 = vmatprep.mubr.bf16.mxu1 %v6147_v16  ;;  %v1226_v7 = vrot.slane %v1225_v47, 4  ;;  %v6106_v32 = vcombine.low %v619_v19, %v619_v19  ;;  %v6107_v35 = vcombine.high %v619_v19, %v619_v19  ;;  %861 = vst [vmem:[#allocation2 + $0x98] sm:$0x1] %v6108_v25  ;;  %v636_v40 = vsel %vm8044_vm5, %v548_v36, 0  ;;  %7269 = vmatpush3.bf16.msra.mxu0 %v7726_v56 }
  0xb3   : > { %v3651_v31 = vsel %vm8281_vm8, %v6326_v17, %v3650_v41  ;;  %v3652_v43 = vrot.slane %v3650_v41, 4  ;;  %v1221_v28 = vsel %vm7999_vm2, %v1216_v9, %v1220_v1  ;;  %v6111_v13 = vcombine.low %v636_v40, %v636_v40  ;;  %7270 = vmatprep.subr.bf16.mxu0 %v7730_v24 }
  0xb4   : > { %v1231_v45 = vsel %vm7999_vm2, %v1226_v7, %v1230_v59  ;;  %859 = vst [vmem:[#allocation2 + $0x90] sm:$0xf] %v6106_v32  ;;  %860 = vst [vmem:[#allocation2 + $0x94] sm:$0xf] %v6107_v35  ;;  %v368_v17 = vmul.f32 %v8379_v22, %v6634_v48  ;;  %v620_v51 = vsel %vm8044_vm5, 0, %v551_v37  ;;  %v369_v39 = vmul.f32 %v8379_v22, %v6635_v23 }
  0xb5   : > { %v6148_v61 = vcombine.low %v1221_v28, %v1231_v45  ;;  %v3654_v2 = vsel %vm8281_vm8, %v3652_v43, %v3653_v29  ;;  %v6109_v33 = vcombine.low %v620_v51, %v620_v51  ;;  %v6110_v50 = vcombine.high %v620_v51, %v620_v51  ;;  %864 = vst [vmem:[#allocation2 + $0xa4] sm:$0x1] %v6111_v13 }
  0xb6   : > { %v6358_v46 = vcombine.low %v3651_v31, %v3654_v2  ;;  %v407_v52 = vadd.f32 %v8273_v38, %v368_v17  ;;  %v408_v48 = vadd.f32 %v8273_v38, %v369_v39  ;;  %v6638_v8 = vunpack.c.l.bf16 %v6737_v15  ;;  %7271 = vmatpush3.bf16.msra.mxu0 %v7730_v24 }
  0xb7   : > { %7007 = vmatmul.mubr.bf16.gmra.mrb[20].mxu1 %v6148_v61  ;;  %v6639_v53 = vunpack.c.h.bf16 %v6737_v15  ;;  %v6327_v56 = vrot.slane %v3555_v62, 9  ;;  %862 = vst [vmem:[#allocation2 + $0x9c] sm:$0xf] %v6109_v33  ;;  %863 = vst [vmem:[#allocation2 + $0xa0] sm:$0xf] %v6110_v50  ;;  %v3657_v57 = vrot.slane %v8330_v4, 5  ;;  %7272 = vmatprep.subr.bf16.mxu0 %v7734_v63 }
  0xb8   : > { %7235 = vmatmul.mubr.bf16.gmra.mrb[8].mxu0 %v6358_v46  ;;  %v439_v27 = vmax.f32 %v407_v52, 0.0  ;;  %v3660_v23 = vrot.slane %v8319_v44, 5  ;;  %v440_v14 = vmax.f32 %v408_v48, 0.0  ;;  %v370_v11 = vmul.f32 %v8379_v22, %v6638_v8 }
  0xb9   : > { %v937_v59 = vld [vmem:[#allocation2 + $0x98] sm:$0x1]  ;;  %v371_v10 = vmul.f32 %v8379_v22, %v6639_v53  ;;  %v6328_v1 = vrot.slane %v3556_v49, 9  ;;  %v8536_v20 = vsel %vm8281_vm8, %v6327_v56, %v3657_v57  ;;  %v3659_v4 = vrot.slane %v3657_v57, 4 }
  0xba   : > { %v1252_v12 = vshll.u32 %v937_v59, 16  ;;  %v3664_v44 = vrot.slane %v8383_v30, 5  ;;  %v458_v0 = vpack.c.bf16 %v440_v14, %v439_v27  ;;  %v8544_v16 = vadd.f32 %v8273_v38, %v370_v11  ;;  %7273 = vmatpush3.bf16.msra.mxu0 %v7734_v63  ;;  %v3557_v59 = vld [vmem:[#allocation2 + $0x6c] sm:$0xe] }
  0xbb   : > { %v8539_v5 = vld [vmem:[#allocation2 + $0x90] sm:$0xf]  ;;  %v8541_v54 = vld [vmem:[#allocation2 + $0x94] sm:$0xf]  ;;  %v8547_v60 = vadd.f32 %v8273_v38, %v371_v10  ;;  %v3667_v22 = vrot.slane %v8336_v42, 5  ;;  %7306 = vmatprep.subr.bf16.mxu0 %v8530_v58  ;;  %v3661_v15 = vsel %vm8281_vm8, %v3659_v4, %v3660_v23 }
  0xbc   : > { %v1233_v47 = vshrl.u32 %v8539_v5, 16  ;;  %v1236_v25 = vshll.u32 %v8539_v5, 16  ;;  %v1242_v30 = vshll.u32 %v8541_v54, 16  ;;  %v1246_v24 = vshrl.u32 %v8541_v54, 16  ;;  %v938_v36 = vld [vmem:[#allocation2 + $0xa4] sm:$0x1] }
  0xbd   : > { %v1254_v19 = vrot.slane %v1252_v12, 5  ;;  %v553_v41 = vshrl.u32 %v458_v0, 16  ;;  %v556_v29 = vshll.u32 %v458_v0, 16  ;;  %v441_v38 = vmax.f32 %v8544_v16, 0.0  ;;  %v2820_v23 = vld [vmem:[#allocation2 + $0x70] sm:$0xf] }
  0xbe   : > { %v1235_v9 = vrot.slane %v1233_v47, 4  ;;  %v1238_v7 = vrot.slane %v1236_v25, 5  ;;  %v1244_v32 = vrot.slane %v1242_v30, 5  ;;  %v1248_v35 = vrot.slane %v1246_v24, 4  ;;  %v8556_v37 = vld [vmem:[#allocation2 + $0x9c] sm:$0xf] }
  0xbf   : > { %v8558_v40 = vld [vmem:[#allocation2 + $0xa0] sm:$0xf]  ;;  %v1276_v31 = vshll.u32 %v938_v36, 16  ;;  %v555_v43 = vrot.slane %v553_v41, 7  ;;  %v3665_v62 = vsel %vm8281_vm8, %v6328_v1, %v3664_v44  ;;  %v1257_v45 = vshrl.u32 %v8556_v37, 16 }
  0xc0   : > { %v1239_v63 = vor.u32 %v1238_v7, %v1235_v9  ;;  %v1249_v28 = vor.u32 %v1248_v35, %v1244_v32  ;;  %v1260_v13 = vshll.u32 %v8556_v37, 16  ;;  %v1266_v17 = vshll.u32 %v8558_v40, 16  ;;  %v2821_v12 = vld [vmem:[#allocation2 + $0x74] sm:$0x1]  ;;  %v8588_v7 = vld [vmem:[#allocation2 + $0x80] sm:$0x1] }
  0xc1   : > { %v1270_v49 = vshrl.u32 %v8558_v40, 16  ;;  %v1278_v61 = vrot.slane %v1276_v31, 5  ;;  %v558_v51 = vor.u32 %v556_v29, %v555_v43  ;;  %v1259_v33 = vrot.slane %v1257_v45, 4  ;;  %v8590_v31 = vld [vmem:[#allocation2 + $0x7c] sm:$0xf] }
  0xc2   : > { %v1240_v2 = vrot.slane %v1239_v63, 4  ;;  %v1250_v39 = vrot.slane %v1249_v28, 4  ;;  %v1262_v50 = vrot.slane %v1260_v13, 5  ;;  %v1268_v46 = vrot.slane %v1266_v17, 5  ;;  %v3558_v42 = vld [vmem:[#allocation2 + $0x78] sm:$0xe] }
  0xc3   : > { %v1272_v52 = vrot.slane %v1270_v49, 4  ;;  %v621_v48 = vsel %vm8044_vm5, 0, %v558_v51  ;;  %v637_v8 = vsel %vm8044_vm5, %v555_v43, 0  ;;  %v442_v0 = vmax.f32 %v8547_v60, 0.0 }
  0xc4   : > { %v1245_v53 = vsel %vm7999_vm2, %v1240_v2, %v1244_v32  ;;  %v1255_v56 = vsel %vm7999_vm2, %v1250_v39, %v1254_v19  ;;  %v1263_v27 = vor.u32 %v1262_v50, %v1259_v33  ;;  %v6112_v57 = vcombine.low %v621_v48, %v621_v48 }
  0xc5   : > { %v6149_v14 = vcombine.low %v1245_v53, %v1255_v56  ;;  %v1273_v11 = vor.u32 %v1272_v52, %v1268_v46  ;;  %v6113_v10 = vcombine.high %v621_v48, %v621_v48  ;;  %v6114_v1 = vcombine.low %v637_v8, %v637_v8  ;;  %v2827_v52 = vld [vmem:[#allocation2 + $0x8c] sm:$0x1] }
  0xc6   : > { %v1264_v4 = vrot.slane %v1263_v27, 4  ;;  %865 = vst [vmem:[#allocation2 + $0xa8] sm:$0xf] %v6112_v57  ;;  %v6359_v16 = vcombine.low %v8536_v20, %v3661_v15  ;;  %v3666_v47 = vrot.slane %v3664_v44, 4  ;;  %v6329_v30 = vrot.slane %v3557_v59, 9 }
  0xc7   : > { %7010 = vmatprep.mubr.bf16.mxu1 %v6149_v14  ;;  %v1274_v25 = vrot.slane %v1273_v11, 4  ;;  %866 = vst [vmem:[#allocation2 + $0xac] sm:$0xf] %v6113_v10  ;;  %867 = vst [vmem:[#allocation2 + $0xb0] sm:$0x1] %v6114_v1  ;;  %v3671_v24 = vrot.slane %v2820_v23, 5  ;;  %v459_v36 = vpack.c.bf16 %v442_v0, %v441_v38 }
  0xc8   : > { %v1269_v19 = vsel %vm7999_vm2, %v1264_v4, %v1268_v46  ;;  %7238 = vmatprep.mubr.bf16.mxu0 %v6359_v16  ;;  %v3668_v41 = vsel %vm8281_vm8, %v3666_v47, %v3667_v22  ;;  %v3674_v60 = vrot.slane %v2821_v12, 5  ;;  %v6330_v63 = vrot.slane %v3558_v42, 9  ;;  %v2826_v46 = vld [vmem:[#allocation2 + $0x88] sm:$0xf]  ;;  %v3559_v27 = vld [vmem:[#allocation2 + $0x84] sm:$0xe] }
  0xc9   : > { %v1279_v20 = vsel %vm7999_vm2, %v1274_v25, %v1278_v61  ;;  %v6360_v44 = vcombine.low %v3665_v62, %v3668_v41  ;;  %v3672_v29 = vsel %vm8281_vm8, %v6329_v30, %v3671_v24  ;;  %v3673_v9 = vrot.slane %v3671_v24, 4  ;;  %v2829_v14 = vld [vmem:[#allocation2 + $0x94] sm:$0xf]  ;;  %v2830_v11 = vld [vmem:[#allocation2 + $0x98] sm:$0x1] }
  0xca   : > { %v6150_v32 = vcombine.low %v1269_v19, %v1279_v20  ;;  %v560_v35 = vshrl.u32 %v459_v36, 16  ;;  %v563_v38 = vshll.u32 %v459_v36, 16  ;;  %v3678_v28 = vrot.slane %v8590_v31, 5  ;;  %v3560_v30 = vld [vmem:[#allocation2 + $0x90] sm:$0xe] }
  0xcb   : > { %7239 = vmatmul.mubr.bf16.gmra.mrb[12].mxu0 %v6360_v44  ;;  %v3675_v22 = vsel %vm8281_vm8, %v3673_v9, %v3674_v60  ;;  %v3681_v45 = vrot.slane %v8588_v7, 5  ;;  %v6331_v47 = vrot.slane %v3559_v27, 9  ;;  %v3685_v25 = vrot.slane %v2826_v46, 5  ;;  %v2833_v41 = vld [vmem:[#allocation2 + $0xa4] sm:$0x1] }
  0xcc   : > { %7011 = vmatmul.mubr.bf16.gmra.mrb[24].mxu1 %v6150_v32  ;;  %v562_v43 = vrot.slane %v560_v35, 7  ;;  %v6361_v15 = vcombine.low %v3672_v29, %v3675_v22  ;;  %v3679_v12 = vsel %vm8281_vm8, %v6330_v63, %v3678_v28  ;;  %v3680_v4 = vrot.slane %v3678_v28, 4  ;;  %v2832_v9 = vld [vmem:[#allocation2 + $0xa0] sm:$0xf]  ;;  %v3561_v32 = vld [vmem:[#allocation2 + $0x9c] sm:$0xe] }
  0xcd   : > { %v8594_v62 = vld [vmem:[#allocation2 + $0xa8] sm:$0xf]  ;;  %v3688_v36 = vrot.slane %v2827_v52, 5  ;;  %v3686_v44 = vsel %vm8281_vm8, %v6331_v47, %v3685_v25  ;;  %v3687_v29 = vrot.slane %v3685_v25, 4  ;;  %v3692_v42 = vrot.slane %v2829_v14, 5 }
  0xce   : > { %v8598_v13 = vld [vmem:[#allocation2 + $0xac] sm:$0xf]  ;;  %v939_v17 = vld [vmem:[#allocation2 + $0xb0] sm:$0x1]  ;;  %v1281_v49 = vshrl.u32 %v8594_v62, 16  ;;  %v1284_v61 = vshll.u32 %v8594_v62, 16  ;;  %v565_v51 = vor.u32 %v563_v38, %v562_v43  ;;  %7242 = vmatprep.mubr.bf16.mxu0 %v6361_v15  ;;  %v3682_v19 = vsel %vm8281_vm8, %v3680_v4, %v3681_v45 }
  0xcf   : > { %v1290_v2 = vshll.u32 %v8598_v13, 16  ;;  %v1294_v39 = vshrl.u32 %v8598_v13, 16  ;;  %v1300_v33 = vshll.u32 %v939_v17, 16  ;;  %v638_v50 = vsel %vm8044_vm5, %v562_v43, 0  ;;  %v3562_v43 = vld [vmem:[#allocation2 + $0xa8] sm:$0xe] }
  0xd0   : > { %v1283_v48 = vrot.slane %v1281_v49, 4  ;;  %v1286_v8 = vrot.slane %v1284_v61, 5  ;;  %v622_v53 = vsel %vm8044_vm5, 0, %v565_v51  ;;  %v6117_v56 = vcombine.low %v638_v50, %v638_v50  ;;  %v2835_v28 = vld [vmem:[#allocation2 + $0xac] sm:$0xf] }
  0xd1   : > { %v1292_v57 = vrot.slane %v1290_v2, 5  ;;  %v1296_v23 = vrot.slane %v1294_v39, 4  ;;  %v6115_v59 = vcombine.low %v622_v53, %v622_v53  ;;  %v6116_v1 = vcombine.high %v622_v53, %v622_v53  ;;  %v2836_v45 = vld [vmem:[#allocation2 + $0xb0] sm:$0x1] }
  0xd2   : > { %v1287_v10 = vor.u32 %v1286_v8, %v1283_v48  ;;  %870 = vst [vmem:[#allocation2 + $0xbc] sm:$0x1] %v6117_v56  ;;  %v1302_v16 = vrot.slane %v1300_v33, 5  ;;  %v6362_v20 = vcombine.low %v3679_v12, %v3682_v19  ;;  %v6332_v38 = vrot.slane %v3560_v30, 9  ;;  %v6738_v30 = vld [vmem:[%s7975_s27 + $0x78] sm:$0xff]  }
  0xd3   : > { %v1297_v0 = vor.u32 %v1296_v23, %v1292_v57  ;;  %868 = vst [vmem:[#allocation2 + $0xb4] sm:$0xf] %v6115_v59  ;;  %869 = vst [vmem:[#allocation2 + $0xb8] sm:$0xf] %v6116_v1  ;;  %v3695_v22 = vrot.slane %v2830_v11, 5  ;;  %v3689_v63 = vsel %vm8281_vm8, %v3687_v29, %v3688_v36  ;;  %v3694_v51 = vrot.slane %v3692_v42, 4 }
  0xd4   : > { %v1288_v24 = vrot.slane %v1287_v10, 4  ;;  %7243 = vmatmul.mubr.bf16.gmra.mrb[16].mxu0 %v6362_v20  ;;  %v6363_v49 = vcombine.low %v3686_v44, %v3689_v63  ;;  %v3693_v61 = vsel %vm8281_vm8, %v6332_v38, %v3692_v42  ;;  %v6333_v39 = vrot.slane %v3561_v32, 9 }
  0xd5   : > { %v1298_v60 = vrot.slane %v1297_v0, 4  ;;  %v3699_v33 = vrot.slane %v2832_v9, 5  ;;  %v3702_v50 = vrot.slane %v2833_v41, 5  ;;  %v6334_v46 = vrot.slane %v3562_v43, 9 }
  0xd6   : > { %v1293_v35 = vsel %vm7999_vm2, %v1288_v24, %v1292_v57  ;;  %7246 = vmatprep.mubr.bf16.mxu0 %v6363_v49  ;;  %v3696_v8 = vsel %vm8281_vm8, %v3694_v51, %v3695_v22  ;;  %v3706_v53 = vrot.slane %v2835_v28, 5  ;;  %v3709_v56 = vrot.slane %v2836_v45, 5  ;;  %v7808_v49 = vld [vmem:[%s9766_s1] ss:$0 sm:$0xff] }
  0xd7   : > { %v1303_v15 = vsel %vm7999_vm2, %v1298_v60, %v1302_v16  ;;  %v6364_v59 = vcombine.low %v3693_v61, %v3696_v8  ;;  %v3700_v1 = vsel %vm8281_vm8, %v6333_v39, %v3699_v33  ;;  %v3701_v12 = vrot.slane %v3699_v33, 4  ;;  %v7809_v33 = vld [vmem:[#allocation2] sm:$0xf] }
  0xd8   : > { %v6151_v17 = vcombine.low %v1293_v35, %v1303_v15  ;;  %v3708_v47 = vrot.slane %v3706_v53, 4  ;;  %v3707_v44 = vsel %vm8281_vm8, %v6334_v46, %v3706_v53  ;;  %v6642_v22 = vunpack.c.l.bf16 %v6738_v30 }
  0xd9   : > { %v8622_v2 = vld [vmem:[#allocation2 + $0xbc] sm:$0x1]  ;;  %v3703_v36 = vsel %vm8281_vm8, %v3701_v12, %v3702_v50  ;;  %v6643_v43 = vunpack.c.h.bf16 %v6738_v30  ;;  %v8653_v50 = vld [vmem:[#allocation2 + $0x4] sm:$0xf]  ;;  %v7725_v30 = vld [vmem:[%s9768_s3 + $0x88] sm:$0xff]  }
  0xda   : > { %9805 = vst [vmem:[#allocation3_spill] sm:$0xff] %v8622_v2  ;;  %7014 = vmatprep.mubr.bf16.mxu1 %v6151_v17  ;;  %v8624_v52 = vld [vmem:[#allocation2 + $0xb4] sm:$0xf]  ;;  %v1324_v48 = vshll.u32 %v8622_v2, 16  ;;  %v8629_v27 = vld [vmem:[#allocation2 + $0xb8] sm:$0xf]  ;;  %v6365_v20 = vcombine.low %v3700_v1, %v3703_v36  ;;  %v3710_v9 = vsel %vm8281_vm8, %v3708_v47, %v3709_v56  ;;  %v372_v61 = vmul.f32 %v7808_v49, %v6642_v22 }
  0xdb   : > { %v1305_v57 = vshrl.u32 %v8624_v52, 16  ;;  %v1308_v23 = vshll.u32 %v8624_v52, 16  ;;  %v2838_v14 = vld [vmem:[#allocation2 + $0xb8] sm:$0xf]  ;;  %v1314_v11 = vshll.u32 %v8629_v27, 16  ;;  %v1318_v10 = vshrl.u32 %v8629_v27, 16 }
  0xdc   : > { %v2839_v4 = vld [vmem:[#allocation2 + $0xbc] sm:$0x1]  ;;  %v3563_v25 = vld [vmem:[#allocation2 + $0xb4] sm:$0xe]  ;;  %v1326_v60 = vrot.slane %v1324_v48, 5  ;;  %7247 = vmatmul.mubr.bf16.gmra.mrb[20].mxu0 %v6364_v59  ;;  %v3713_v35 = vrot.slane %v2838_v14, 5  ;;  %v6366_v17 = vcombine.low %v3707_v44, %v3710_v9  ;;  %v373_v51 = vmul.f32 %v7808_v49, %v6643_v43 }
  0xdd   : > { %v1307_v0 = vrot.slane %v1305_v57, 4  ;;  %v1310_v16 = vrot.slane %v1308_v23, 5  ;;  %v1316_v24 = vrot.slane %v1314_v11, 5  ;;  %v1320_v19 = vrot.slane %v1318_v10, 4  ;;  %7250 = vmatprep.mubr.bf16.mxu0 %v6365_v20  ;;  %v7811_v56 = vld [vmem:[%s9767_s2] ss:$0 sm:$0xff] }
  0xde   : > { %v6335_v32 = vrot.slane %v3563_v25, 9  ;;  %v3716_v42 = vrot.slane %v2839_v4, 5  ;;  %v3715_v28 = vrot.slane %v3713_v35, 4  ;;  %v6161_v46 = vcombine.low %v7809_v33, %v8653_v50  ;;  %v7812_v10 = vld [vmem:[#allocation2 + $0xc] sm:$0xf]  ;;  %v7729_v20 = vld [vmem:[%s9768_s3 + $0x90] sm:$0xff]  }
  0xdf   : > { %v1311_v41 = vor.u32 %v1310_v16, %v1307_v0  ;;  %v1321_v29 = vor.u32 %v1320_v19, %v1316_v24  ;;  %v411_v57 = vadd.f32 %v7811_v56, %v372_v61  ;;  %v412_v23 = vadd.f32 %v7811_v56, %v373_v51  ;;  %v8661_v1 = vld [vmem:[#allocation2 + $0x10] sm:$0xf]  ;;  %v7814_v16 = vld [vmem:[#allocation2 + $0x18] sm:$0xf]  ;;  %v8664_v47 = vld [vmem:[#allocation2 + $0x1c] sm:$0xf] }
  0xe0   : > { %v3714_v63 = vsel %vm8281_vm8, %v6335_v32, %v3713_v35  ;;  %v3717_v48 = vsel %vm8281_vm8, %v3715_v28, %v3716_v42  ;;  %v6162_v12 = vcombine.low %v7812_v10, %v8661_v1  ;;  %v6163_v25 = vcombine.low %v7814_v16, %v8664_v47  ;;  %v7817_v32 = vld [vmem:[#allocation2 + $0x24] sm:$0xf]  ;;  %v8680_v35 = vld [vmem:[#allocation2 + $0x28] sm:$0xf]  ;;  %v7819_v42 = vld [vmem:[#allocation2 + $0x30] sm:$0xf] }
  0xe1   : > { %v1312_v38 = vrot.slane %v1311_v41, 4  ;;  %v1322_v15 = vrot.slane %v1321_v29, 4  ;;  %v6367_v53 = vcombine.low %v3714_v63, %v3717_v48  ;;  %v443_v59 = vmax.f32 %v411_v57, 0.0  ;;  %v7816_v41 = vld [vmem:[%s9768_s3 + $0x80] sm:$0xff]   ;;  %v8683_v22 = vld [vmem:[#allocation2 + $0x34] sm:$0xf] }
  0xe2   : > { %v444_v14 = vmax.f32 %v412_v23, 0.0  ;;  %v6165_v43 = vcombine.low %v7819_v42, %v8683_v22  ;;  %v7737_v63 = vld [vmem:[%s9768_s3 + $0xa0] sm:$0xff]   ;;  %v7821_v28 = vld [vmem:[#allocation2 + $0x3c] sm:$0xf]  ;;  %v7823_v51 = vld [vmem:[#allocation2 + $0x48] sm:$0xf] }
  0xe3   : > { %v1317_v45 = vsel %vm7999_vm2, %v1312_v38, %v1316_v24  ;;  %v1327_v39 = vsel %vm7999_vm2, %v1322_v15, %v1326_v60  ;;  %v6164_v38 = vcombine.low %v7817_v32, %v8680_v35  ;;  %v3073_v56 = vshrl.u32 %v8590_v31, 16  ;;  %v7743_v57 = vld [vmem:[%s9768_s3 + $0xa8] sm:$0xff]   ;;  %v8722_v32 = vld [vmem:[#allocation2 + $0x64] sm:$0xf] }
  0xe4   : > { %v6152_v8 = vcombine.low %v1317_v45, %v1327_v39  ;;  %7251 = vmatmul.mubr.bf16.gmra.mrb[24].mxu0 %v6366_v17  ;;  %v460_v11 = vpack.c.bf16 %v444_v14, %v443_v59  ;;  %v8692_v45 = vld [vmem:[#allocation2 + $0x40] sm:$0xf]  ;;  %v8695_v39 = vld [vmem:[#allocation2 + $0x4c] sm:$0xf]  ;;  %v1990_v16 = vrot.slane %v8664_v47, 5 }
  0xe5   : > { %7254 = vmatprep.mubr.bf16.mxu0 %v6367_v53  ;;  %v6166_v17 = vcombine.low %v7821_v28, %v8692_v45  ;;  %v6167_v33 = vcombine.low %v7823_v51, %v8695_v39  ;;  %v3069_v53 = vshll.u32 %v8590_v31, 16  ;;  %v1923_v14 = vld [vmem:[#allocation2] sm:$0xe]  ;;  %v1976_v31 = vrot.slane %v8653_v50, 5  ;;  %v7826_v50 = vld [vmem:[#allocation2 + $0x14] sm:$0x1] }
  0xe6   : > { %7015 = vmatmul.mubr.bf16.gmra.mrb[28].mxu1 %v6152_v8  ;;  %v567_v4 = vshrl.u32 %v460_v11, 16  ;;  %v570_v0 = vshll.u32 %v460_v11, 16  ;;  %v1924_v11 = vld [vmem:[#allocation2 + $0xc] sm:$0xe]  ;;  %v6185_v42 = vrot.slane %v1923_v14, 9  ;;  %v1992_v28 = vrot.slane %v1990_v16, 4 }
  0xe7   : > { %7034 = vmatprep.mubr.bf16.mxu1 %v6161_v46  ;;  %v8729_v51 = vld [vmem:[#allocation2 + $0x6c] sm:$0xf]  ;;  %v2004_v14 = vrot.slane %v8683_v22, 5 }
  0xe8   : > { %v569_v24 = vrot.slane %v567_v4, 7  ;;  %v1983_v4 = vrot.slane %v8661_v1, 5  ;;  %v7827_v1 = vld [vmem:[#allocation2 + $0x54] sm:$0xf] }
  0xea   : > { %v572_v19 = vor.u32 %v570_v0, %v569_v24  ;;  %v639_v36 = vsel %vm8044_vm5, %v569_v24, 0  ;;  %v1925_v0 = vld [vmem:[#allocation2 + $0x18] sm:$0xe]  ;;  %v3079_v24 = vshll.u32 %v8588_v7, 16  ;;  %v7829_v7 = vld [vmem:[#allocation2 + $0x60] sm:$0xf] }
  0xeb   : > { %v6120_v60 = vcombine.low %v639_v36, %v639_v36  ;;  %v7749_v36 = vld [vmem:[%s9768_s3 + $0xb0] sm:$0xff]  }
  0xec   : > { %v623_v44 = vsel %vm8044_vm5, 0, %v572_v19 }
  0xed   : > { %v6118_v29 = vcombine.low %v623_v44, %v623_v44  ;;  %v6119_v9 = vcombine.high %v623_v44, %v623_v44  ;;  %873 = vst [vmem:[#allocation2 + $0xc8] sm:$0x1] %v6120_v60  ;;  %v8718_v44 = vld [vmem:[#allocation2 + $0x58] sm:$0xf] }
  0xee   : > { %7035 = vmatmul.mubr.bf16.vlgmr.msra.gmra.mrb[0].mxu1 %v6162_v12  ;;  %v7738_v12 = vld [vmem:[#allocation2 + $0x18] sm:$0xff]   ;;  %v6168_v47 = vcombine.low %v7827_v1, %v8718_v44 }
  0xef   : > { %7067 = vmatpush3.bf16.msra.mxu1 %v7816_v41  ;;  %7038 = vmatprep.mubr.bf16.mxu1 %v6163_v25  ;;  %871 = vst [vmem:[#allocation2 + $0xc0] sm:$0xf] %v6118_v29  ;;  %872 = vst [vmem:[#allocation2 + $0xc4] sm:$0xf] %v6119_v9  ;;  %v8710_v25 = vrot.slane %v3069_v53, 5  ;;  %v1997_v9 = vrot.slane %v8680_v35, 5 }
  0xf0   : > { %7068 = vmatprep.subr.bf16.mxu1 %v7725_v30  ;;  %v7825_v41 = vld [vmem:[#allocation2 + $0x8] sm:$0x1]  ;;  %v1926_v29 = vld [vmem:[#allocation2 + $0x24] sm:$0xe]  ;;  %v8727_v35 = vrot.slane %v3079_v24, 5 }
  0xf1   : > { %9806 = vst [vmem:[#allocation4_spill] sm:$0xff] %v8710_v25  ;;  %v1979_v60 = vrot.slane %v7825_v41, 5  ;;  %v1927_v53 = vld [vmem:[#allocation2 + $0x30] sm:$0xe]  ;;  %v8778_v1 = vld [vmem:[#allocation2 + $0x3c] sm:$0xe] }
  0xf2   : > { %9808 = vst [vmem:[#allocation6_spill] sm:$0xff] %v8727_v35 }
  0xf3   : > { %7069 = vmatpush3.bf16.msra.mxu1 %v7725_v30  ;;  %v8712_v30 = vrot.slane %v3073_v56, 4  ;;  %v6188_v56 = vrot.slane %v1926_v29, 9  ;;  %v8783_v29 = vld [vmem:[%s9768_s3 + $0xc0] sm:$0xff]  }
  0xf4   : > { %7070 = vmatprep.subr.bf16.mxu1 %v7729_v20  ;;  %v2842_v15 = vld [vmem:[#allocation2 + $0xc8] sm:$0x1] }
  0xf5   : > { %v3723_v8 = vrot.slane %v2842_v15, 5  ;;  %9807 = vst [vmem:[#allocation5_spill] sm:$0xff] %v8712_v30  ;;  %v1978_v15 = vrot.slane %v1976_v31, 4  ;;  %v7839_v30 = vld [vmem:[#allocation2 + $0x68] sm:$0x1] }
  0xf6   : > { %7039 = vmatmul.mubr.bf16.gmra.mrb[4].mxu1 %v6164_v38  ;;  %v2841_v49 = vld [vmem:[#allocation2 + $0xc4] sm:$0xf]  ;;  %v3564_v61 = vld [vmem:[#allocation2 + $0xc0] sm:$0xe]  ;;  %v6169_v38 = vcombine.low %v7829_v7, %v8722_v32  ;;  %v8787_v7 = vsel %vm8281_vm8, %v6188_v56, %v1997_v9 }
  0xf7   : > { %7042 = vmatprep.mubr.bf16.mxu1 %v6165_v43  ;;  %7071 = vmatpush3.bf16.msra.mxu1 %v7729_v20  ;;  %v6336_v46 = vrot.slane %v3564_v61, 9  ;;  %v3720_v48 = vrot.slane %v2841_v49, 5  ;;  %v1986_v20 = vrot.slane %v7826_v50, 5  ;;  %v6186_v43 = vrot.slane %v1924_v11, 9  ;;  %v7740_v11 = vld [vmem:[#allocation2 + $0x24] sm:$0xff]  }
  0xf8   : > { %7072 = vmatprep.subr.bf16.mxu1 %v7733_v18  ;;  %v8757_v22 = vsel %vm8281_vm8, %v1978_v15, %v1979_v60  ;;  %v4435_v15 = vld [vmem:[#allocation2 + $0x1c] sm:$0xf] }
  0xf9   : > { %v3721_v23 = vsel %vm8281_vm8, %v6336_v46, %v3720_v48  ;;  %v3722_v59 = vrot.slane %v3720_v48, 4  ;;  %v6171_v48 = vcombine.low %v8460_v21, %v8462_v26  ;;  %v4492_v61 = vshll.u32 %v4435_v15, 16  ;;  %v4438_v26 = vld [vmem:[#allocation2 + $0x28] sm:$0xf] }
  0xfa   : > { %v2035_v21 = vrot.slane %v7839_v30, 5  ;;  %v9809_v30 = vrot.slane %v8692_v45, 5 }
  0xfb   : > { %7073 = vmatpush3.bf16.msra.mxu1 %v7733_v18  ;;  %v3724_v10 = vsel %vm8281_vm8, %v3722_v59, %v3723_v8  ;;  %v6187_v18 = vrot.slane %v1925_v0, 9  ;;  %v7755_v8 = vld [vmem:[%s9768_s3 + $0xb8] sm:$0xff]   ;;  %v8749_v0 = vsel %vm8281_vm8, %v6186_v43, %v1983_v4 }
  0xfc   : > { %7074 = vmatprep.subr.bf16.mxu1 %v7737_v63  ;;  %v6368_v19 = vcombine.low %v3721_v23, %v3724_v10  ;;  %v7834_v23 = vld [vmem:[#allocation2 + $0x2c] sm:$0x1]  ;;  %v7835_v43 = vld [vmem:[#allocation2 + $0x38] sm:$0x1]  ;;  %v7838_v10 = vld [vmem:[#allocation2 + $0x5c] sm:$0x1] }
  0xfd   : > { %v2000_v59 = vrot.slane %v7834_v23, 5  ;;  %v8753_v24 = vsel %vm8281_vm8, %v6187_v18, %v1990_v16  ;;  %v7745_v16 = vld [vmem:[%s9768_s3 + $0x1c8] sm:$0xff]   ;;  %v2007_v18 = vrot.slane %v7835_v43, 5  ;;  %v1931_v43 = vld [vmem:[#allocation2 + $0x60] sm:$0xe]  ;;  %v2028_v56 = vrot.slane %v7838_v10, 5 }
  0xfe   : > { %7043 = vmatmul.mubr.bf16.gmra.mrb[8].mxu1 %v6166_v17  ;;  %7255 = vmatmul.mubr.bf16.gmra.mrb[28].mxu0 %v6368_v19  ;;  %v7831_v17 = vld [vmem:[#allocation2 + $0x20] sm:$0x1]  ;;  %v7744_v19 = vld [vmem:[#allocation2 + $0x30] sm:$0xff]   ;;  %v6193_v25 = vrot.slane %v1931_v43, 9 }
  0xff   : > { %7046 = vmatprep.mubr.bf16.mxu1 %v6167_v33  ;;  %7075 = vmatpush3.bf16.msra.mxu1 %v7737_v63  ;;  %v1985_v63 = vrot.slane %v1983_v4, 4  ;;  %v1993_v49 = vrot.slane %v7831_v17, 5  ;;  %v8731_v33 = vld [vmem:[#allocation2 + $0x70] sm:$0xf]  ;;  %v6189_v4 = vrot.slane %v1927_v53, 9  ;;  %v4496_v17 = vshrl.u32 %v4435_v15, 16 }
 0x100   : > { %7076 = vmatprep.subr.bf16.mxu1 %v7743_v57  ;;  %7274 = vmatprep.mubr.bf16.mxu0 %v7738_v12  ;;  %v6170_v46 = vcombine.low %v8729_v51, %v8731_v33  ;;  %v8745_v12 = vsel %vm8281_vm8, %v6185_v42, %v1976_v31  ;;  %v2006_v42 = vrot.slane %v2004_v14, 4  ;;  %v7757_v15 = vld [vmem:[%s9768_s3 + $0x1d8] sm:$0xff]  }
 0x101   : > { %v8761_v41 = vsel %vm8281_vm8, %v1985_v63, %v1986_v20  ;;  %v8765_v31 = vsel %vm8281_vm8, %v1992_v28, %v1993_v49  ;;  %v8800_v49 = vld [vmem:[#allocation2 + $0x48] sm:$0xe]  ;;  %v8805_v53 = vsel %vm8281_vm8, %v6189_v4, %v2004_v14  ;;  %v4437_v14 = vld [vmem:[#allocation2 + $0x24] sm:$0xf]  ;;  %v2018_v63 = vrot.slane %v8695_v39, 5 }
 0x102   : > { %v7750_v4 = vld [vmem:[#allocation2 + $0x48] sm:$0xff]   ;;  %v6191_v28 = vrot.slane %v8800_v49, 9  ;;  %v2025_v20 = vrot.slane %v8718_v44, 5  ;;  %v2032_v49 = vrot.slane %v8722_v32, 5  ;;  %v2039_v39 = vrot.slane %v8731_v33, 5 }
 0x103   : > { %7077 = vmatpush3.bf16.msra.mxu1 %v7743_v57  ;;  %v1999_v57 = vrot.slane %v1997_v9, 4  ;;  %v9772_v9 = vrot.slane %v8692_v45, 5  ;;  %v1932_v44 = vld [vmem:[#allocation2 + $0x6c] sm:$0xe]  ;;  %v4507_v50 = vshrl.u32 %v4437_v14, 16  ;;  %v4510_v60 = vshll.u32 %v4437_v14, 16 }
 0x104   : > { %7078 = vmatprep.subr.bf16.mxu1 %v7749_v36  ;;  %v4498_v32 = vrot.slane %v4496_v17, 4  ;;  %v2020_v35 = vrot.slane %v2018_v63, 4  ;;  %v2027_v33 = vrot.slane %v2025_v20, 4  ;;  %v7761_v17 = vld [vmem:[%s9768_s3 + $0x1e0] sm:$0xff]  }
 0x105   : > { %v4509_v2 = vrot.slane %v4507_v50, 4  ;;  %v8854_v50 = vsel %vm8281_vm8, %v6191_v28, %v2018_v63  ;;  %v8873_v63 = vsel %vm8281_vm8, %v6193_v25, %v2032_v49  ;;  %v7765_v25 = vld [vmem:[%s9768_s3 + $0x1e8] sm:$0xff]  }
 0x106   : > { %7047 = vmatmul.mubr.bf16.gmra.mrb[12].mxu1 %v6168_v47  ;;  %v4434_v47 = vld [vmem:[#allocation2 + $0x18] sm:$0xf]  ;;  %7275 = vmatmul.mubr.bf16.vlgmr.msra.gmra.mrb[0].mxu0 %v7740_v11  ;;  %v7751_v11 = vld [vmem:[%s9768_s3 + $0x1d0] sm:$0xff]  }
 0x107   : > { %7050 = vmatprep.mubr.bf16.mxu1 %v6169_v38  ;;  %7079 = vmatpush3.bf16.msra.mxu1 %v7749_v36  ;;  %v8791_v38 = vsel %vm8281_vm8, %v1999_v57, %v2000_v59  ;;  %v4483_v57 = vshrl.u32 %v4434_v47, 16  ;;  %v4486_v23 = vshll.u32 %v4434_v47, 16  ;;  %v7746_v59 = vld [vmem:[#allocation2 + $0x3c] sm:$0xff]   ;;  %v8816_v47 = vsel %vm8281_vm8, %v2006_v42, %v2007_v18  ;;  %v7837_v42 = vld [vmem:[#allocation2 + $0x50] sm:$0x1] }
 0x108   : > { %7080 = vmatprep.subr.bf16.mxu1 %v7755_v8  ;;  %7307 = vmatpush3.bf16.msra.mxu0 %v8530_v58  ;;  %v7836_v58 = vld [vmem:[#allocation2 + $0x44] sm:$0x1]  ;;  %v2021_v18 = vrot.slane %v7837_v42, 5  ;;  %v4436_v42 = vld [vmem:[#allocation2 + $0x20] sm:$0x1] }
 0x109   : > { %7278 = vmatprep.mubr.bf16.mxu0 %v7744_v19  ;;  %7308 = vmatprep.subr.bf16.mxu0 %v7745_v16  ;;  %v2014_v19 = vrot.slane %v7836_v58, 5  ;;  %v2013_v58 = vrot.slane %v9772_v9, 4  ;;  %v4485_v51 = vrot.slane %v4483_v57, 4  ;;  %v8834_v9 = vrot.slane %v4492_v61, 5 }
 0x10a   : > { %v2041_v57 = vrot.slane %v2039_v39, 4  ;;  %v4502_v10 = vshll.u32 %v4436_v42, 16  ;;  %v4512_v61 = vrot.slane %v4510_v60, 5  ;;  %v8858_v45 = vsel %vm8281_vm8, %v2020_v35, %v2021_v18  ;;  %v4439_v18 = vld [vmem:[#allocation2 + $0x2c] sm:$0x1] }
 0x10b   : > { %7081 = vmatpush3.bf16.msra.mxu1 %v7755_v8  ;;  %v1930_v8 = vld [vmem:[#allocation2 + $0x54] sm:$0xe]  ;;  %v8850_v60 = vsel %vm8281_vm8, %v2013_v58, %v2014_v19  ;;  %v8869_v19 = vsel %vm8281_vm8, %v2027_v33, %v2028_v56 }
 0x10c   : > { %7114 = vmatprep.subr.bf16.mxu1 %v8783_v29  ;;  %7309 = vmatpush3.bf16.msra.mxu0 %v7745_v16  ;;  %v6192_v36 = vrot.slane %v1930_v8, 9  ;;  %v6194_v16 = vrot.slane %v1932_v44, 9  ;;  %v4520_v44 = vshrl.u32 %v4438_v26, 16  ;;  %v4504_v58 = vrot.slane %v4502_v10, 5 }
 0x10d   : > { %7310 = vmatprep.subr.bf16.mxu0 %v7751_v11 }
 0x10e   : > { %7051 = vmatmul.mubr.bf16.gmra.mrb[16].mxu1 %v6170_v46  ;;  %v4488_v46 = vrot.slane %v4486_v23, 5  ;;  %7279 = vmatmul.mubr.bf16.gmra.mrb[4].mxu0 %v7746_v59  ;;  %v7840_v23 = vld [vmem:[#allocation2 + $0x74] sm:$0x1]  ;;  %v9810_v59 = vrot.slane %v8778_v1, 9  ;;  %v8862_v1 = vsel %vm8281_vm8, %v6192_v36, %v2025_v20  ;;  %v8881_v36 = vsel %vm8281_vm8, %v6194_v16, %v2039_v39  ;;  %v4440_v20 = vld [vmem:[#allocation2 + $0x30] sm:$0xf] }
 0x10f   : > { %7054 = vmatprep.mubr.bf16.mxu1 %v6171_v48  ;;  %v2034_v48 = vrot.slane %v2032_v49, 4  ;;  %v2042_v14 = vrot.slane %v7840_v23, 5  ;;  %7282 = vmatprep.mubr.bf16.mxu0 %v7750_v4  ;;  %v4499_v4 = vor.u32 %v4498_v32, %v8834_v9  ;;  %9813 = vst [vmem:[#allocation8_spill] sm:$0xff] %v8881_v36  ;;  %v4513_v49 = vor.u32 %v4512_v61, %v4509_v2  ;;  %v7841_v32 = vld [vmem:[#allocation2 + $0x7c] sm:$0xf] }
 0x110   : > { %7311 = vmatpush3.bf16.msra.mxu0 %v7751_v11  ;;  %v4489_v8 = vor.u32 %v4488_v46, %v4485_v51  ;;  %v8845_v43 = vsel %vm8281_vm8, %v9810_v59, %v9809_v30  ;;  %v4516_v11 = vshll.u32 %v4438_v26, 16  ;;  %v9811_v51 = vcombine.low %v8475_v6, %v8477_v55  ;;  %v7752_v46 = vld [vmem:[#allocation2 + $0x54] sm:$0xff]   ;;  %v7756_v55 = vld [vmem:[#allocation2 + $0x60] sm:$0xff]  }
 0x111   : > { %7312 = vmatprep.subr.bf16.mxu0 %v7757_v15  ;;  %v8877_v35 = vsel %vm8281_vm8, %v2034_v48, %v2035_v21  ;;  %v9814_v6 = vcombine.low %v8539_v5, %v8541_v54  ;;  %v8891_v28 = vsel %vm8281_vm8, %v2041_v57, %v2042_v14  ;;  %v4500_v39 = vrot.slane %v4499_v4, 4  ;;  %v1933_v54 = vld [vmem:[#allocation2 + $0x78] sm:$0xe]  ;;  %v4441_v14 = vld [vmem:[#allocation2 + $0x34] sm:$0xf] }
 0x112   : > { %9812 = vst [vmem:[#allocation7_spill] sm:$0xff] %v8877_v35  ;;  %9815 = vst [vmem:[#allocation9_spill] sm:$0xff] %v8891_v28  ;;  %v4490_v56 = vrot.slane %v4489_v8, 4  ;;  %v8893_v42 = vrot.slane %v4516_v11, 5  ;;  %v4522_v5 = vrot.slane %v4520_v44, 4  ;;  %v4531_v26 = vshrl.u32 %v4440_v20, 16 }
 0x113   : > { %v4534_v48 = vshll.u32 %v4440_v20, 16  ;;  %v4443_v8 = vld [vmem:[#allocation2 + $0x3c] sm:$0xf]  ;;  %v8910_v61 = vrot.slane %v4513_v49, 4  ;;  %v4526_v30 = vshll.u32 %v4439_v18, 16  ;;  %v6195_v59 = vrot.slane %v1933_v54, 9 }
 0x114   : > { %7313 = vmatpush3.bf16.msra.mxu0 %v7757_v15  ;;  %v2046_v15 = vrot.slane %v7841_v32, 5  ;;  %v4495_v10 = vsel %vm7999_vm2, %v4490_v56, %v8834_v9  ;;  %v4444_v4 = vld [vmem:[#allocation2 + $0x40] sm:$0xf]  ;;  %v7769_v11 = vld [vmem:[%s9768_s3 + $0x1f0] sm:$0xff]   ;;  %v4505_v44 = vsel %vm7999_vm2, %v4500_v39, %v4504_v58  ;;  %v4540_v18 = vshll.u32 %v4441_v14, 16 }
 0x115   : > { %7314 = vmatprep.subr.bf16.mxu0 %v7761_v17  ;;  %v7758_v9 = vld [vmem:[#allocation2 + $0x6c] sm:$0xff]   ;;  %v4536_v56 = vrot.slane %v4534_v48, 5  ;;  %v4544_v49 = vshrl.u32 %v4441_v14, 16  ;;  %v9816_v54 = vcombine.low %v8556_v37, %v8558_v40  ;;  %v4442_v32 = vld [vmem:[#allocation2 + $0x38] sm:$0x1]  ;;  %v4555_v23 = vshrl.u32 %v4443_v8, 16 }
 0x116   : > { %7055 = vmatmul.mubr.bf16.gmra.mrb[20].mxu1 %v9811_v51  ;;  %7283 = vmatmul.mubr.bf16.gmra.mrb[8].mxu0 %v7752_v46  ;;  %v4523_v51 = vor.u32 %v4522_v5, %v8893_v42  ;;  %v7842_v46 = vld [vmem:[#allocation2 + $0x80] sm:$0x1]  ;;  %v4558_v57 = vshll.u32 %v4443_v8, 16  ;;  %v4564_v16 = vshll.u32 %v4444_v4, 16  ;;  %v4568_v58 = vshrl.u32 %v4444_v4, 16  ;;  %v7760_v5 = vld [vmem:[#allocation2 + $0x78] sm:$0xff]  }
 0x117   : > { %7058 = vmatprep.mubr.bf16.mxu1 %v9814_v6  ;;  %7286 = vmatprep.mubr.bf16.mxu0 %v7756_v55  ;;  %v2049_v20 = vrot.slane %v7842_v46, 5  ;;  %v1934_v6 = vld [vmem:[#allocation2 + $0x84] sm:$0xe]  ;;  %v4533_v55 = vrot.slane %v4531_v26, 4  ;;  %v9817_v39 = vcombine.low %v8594_v62, %v8598_v13  ;;  %v7773_v26 = vld [vmem:[%s9768_s3 + $0x1f8] sm:$0xff]   ;;  %v8927_v48 = vcombine.low %v4495_v10, %v4505_v44 }
 0x118   : > { %7315 = vmatpush3.bf16.msra.mxu0 %v7761_v17  ;;  %v2048_v17 = vrot.slane %v2046_v15, 4  ;;  %v8929_v14 = vrot.slane %v4526_v30, 5  ;;  %v8933_v37 = vsel %vm8281_vm8, %v6195_v59, %v2046_v15  ;;  %v6196_v40 = vrot.slane %v1934_v6, 9  ;;  %v7843_v10 = vld [vmem:[#allocation2 + $0x88] sm:$0xf] }
 0x119   : > { %7316 = vmatprep.subr.bf16.mxu0 %v7765_v25  ;;  %9818 = vst [vmem:[#allocation10_spill] sm:$0xff] %v8933_v37  ;;  %v2053_v30 = vrot.slane %v7843_v10, 5  ;;  %v4446_v4 = vld [vmem:[#allocation2 + $0x48] sm:$0xf]  ;;  %v8945_v44 = vld [vmem:[#allocation2 + $0x4c] sm:$0xf]  ;;  %v4537_v15 = vor.u32 %v4536_v56, %v4533_v55 }
 0x11a   : > { %v8943_v8 = vsel %vm8281_vm8, %v2048_v17, %v2049_v20  ;;  %9820 = vst [vmem:[#allocation12_spill] sm:$0xff] %v8945_v44  ;;  %v8947_v59 = vrot.slane %v4540_v18, 5  ;;  %v4546_v46 = vrot.slane %v4544_v49, 4  ;;  %v4550_v6 = vshll.u32 %v4442_v32, 16  ;;  %v8956_v55 = vld [vmem:[%s9768_s3 + $0x200] sm:$0xff]  }
 0x11b   : > { %9819 = vst [vmem:[#allocation11_spill] sm:$0xff] %v8943_v8  ;;  %v4560_v2 = vrot.slane %v4558_v57, 5  ;;  %v4570_v21 = vrot.slane %v4568_v58, 4  ;;  %v4579_v17 = vshrl.u32 %v4446_v4, 16  ;;  %v4582_v20 = vshll.u32 %v4446_v4, 16  ;;  %9821 = vst [vmem:[#allocation13_spill] sm:$0xff] %v8956_v55 }
 0x11c   : > { %7317 = vmatpush3.bf16.msra.mxu0 %v7765_v25  ;;  %v8939_v25 = vrot.slane %v4523_v51, 4  ;;  %v8949_v51 = vrot.slane %v4564_v16, 5  ;;  %v4588_v10 = vshll.u32 %v8945_v44, 16  ;;  %v4592_v33 = vshrl.u32 %v8945_v44, 16  ;;  %v1935_v58 = vld [vmem:[#allocation2 + $0x90] sm:$0xe] }
 0x11d   : > { %7318 = vmatprep.subr.bf16.mxu0 %v7769_v11  ;;  %v8962_v16 = vsel %vm8281_vm8, %v6196_v40, %v2053_v30  ;;  %v4547_v18 = vor.u32 %v4546_v46, %v8947_v59  ;;  %v8969_v49 = vrot.slane %v4550_v6, 5  ;;  %v9822_v4 = vcombine.low %v8624_v52, %v8629_v27  ;;  %v7762_v40 = vld [vmem:[#allocation2 + $0x84] sm:$0xff]   ;;  %v7845_v44 = vld [vmem:[#allocation2 + $0x94] sm:$0xf]  ;;  %v8977_v8 = vld [vmem:[#allocation2 + $0x58] sm:$0xf] }
 0x11e   : > { %7059 = vmatmul.mubr.bf16.gmra.mrb[24].mxu1 %v9816_v54  ;;  %7287 = vmatmul.mubr.bf16.gmra.mrb[12].mxu0 %v7758_v9  ;;  %v4445_v54 = vld [vmem:[#allocation2 + $0x44] sm:$0x1]  ;;  %v8974_v57 = vrot.slane %v4537_v15, 4  ;;  %v4571_v62 = vor.u32 %v4570_v21, %v8949_v51  ;;  %v2060_v56 = vrot.slane %v7845_v44, 5  ;;  %9823 = vst [vmem:[#allocation14_spill] sm:$0xff] %v8977_v8  ;;  %v9824_v46 = vcombine.low %v8745_v12, %v8757_v22 }
 0x11f   : > { %7062 = vmatprep.mubr.bf16.mxu1 %v9817_v39  ;;  %v4557_v39 = vrot.slane %v4555_v23, 4  ;;  %7290 = vmatprep.mubr.bf16.mxu0 %v7760_v5  ;;  %v2055_v23 = vrot.slane %v2053_v30, 4  ;;  %v4574_v32 = vshll.u32 %v4445_v54, 16  ;;  %v4449_v5 = vld [vmem:[#allocation2 + $0x54] sm:$0xf]  ;;  %v4581_v54 = vrot.slane %v4579_v17, 4 }
 0x120   : > { %7319 = vmatpush3.bf16.msra.mxu0 %v7769_v11  ;;  %v7844_v11 = vld [vmem:[#allocation2 + $0x8c] sm:$0x1]  ;;  %v7764_v30 = vld [vmem:[#allocation2 + $0x90] sm:$0xff]   ;;  %v1936_v6 = vld [vmem:[#allocation2 + $0x9c] sm:$0xe]  ;;  %v4584_v52 = vrot.slane %v4582_v20, 5 }
 0x121   : > { %7320 = vmatprep.subr.bf16.mxu0 %v7773_v26  ;;  %v2056_v9 = vrot.slane %v7844_v11, 5  ;;  %v4561_v11 = vor.u32 %v4560_v2, %v4557_v39  ;;  %v4594_v37 = vrot.slane %v4592_v33, 4  ;;  %v6197_v2 = vrot.slane %v1935_v58, 9  ;;  %v7846_v15 = vld [vmem:[#allocation2 + $0xa0] sm:$0xf] }
 0x122   : > { %v2067_v21 = vrot.slane %v7846_v15, 5  ;;  %v8985_v39 = vld [vmem:[#allocation2 + $0x50] sm:$0x1]  ;;  %v4603_v44 = vshrl.u32 %v4449_v5, 16  ;;  %v4606_v28 = vshll.u32 %v4449_v5, 16  ;;  %v4548_v36 = vrot.slane %v4547_v18, 4 }
 0x123   : > { %v4576_v35 = vrot.slane %v4574_v32, 5  ;;  %v4612_v12 = vshll.u32 %v8977_v8, 16  ;;  %v4616_v22 = vshrl.u32 %v8977_v8, 16  ;;  %v2062_v17 = vrot.slane %v2060_v56, 4  ;;  %v7847_v20 = vld [vmem:[#allocation2 + $0x98] sm:$0x1] }
 0x124   : > { %7321 = vmatpush3.bf16.msra.mxu0 %v7773_v26  ;;  %v4562_v26 = vrot.slane %v4561_v11, 4  ;;  %v2063_v33 = vrot.slane %v7847_v20, 5  ;;  %v4572_v58 = vrot.slane %v4571_v62, 4  ;;  %v7763_v18 = vld [vmem:[%s9768_s3 + $0xc8] sm:$0xff]   ;;  %v2069_v32 = vrot.slane %v2067_v21, 4 }
 0x125   : > { %7354 = vmatprep.subr.bf16.mxu0 %v8956_v55  ;;  %v4598_v55 = vshll.u32 %v8985_v39, 16  ;;  %v7848_v5 = vld [vmem:[#allocation2 + $0xa4] sm:$0x1]  ;;  %v4608_v11 = vrot.slane %v4606_v28, 5  ;;  %v8996_v20 = vsel %vm8281_vm8, %v2055_v23, %v2056_v9  ;;  %v9002_v62 = vld [vmem:[#allocation2 + $0x5c] sm:$0x1]  ;;  %v4553_v28 = vsel %vm7999_vm2, %v4548_v36, %v8969_v49 }
 0x126   : > { %7063 = vmatmul.mubr.bf16.gmra.mrb[28].mxu1 %v9822_v4  ;;  %v8982_v4 = vrot.slane %v4588_v10, 5  ;;  %7291 = vmatmul.mubr.bf16.gmra.mrb[16].mxu0 %v7762_v40  ;;  %v6198_v10 = vrot.slane %v1936_v6, 9  ;;  %v2070_v8 = vrot.slane %v7848_v5, 5  ;;  %v4605_v40 = vrot.slane %v4603_v44, 4  ;;  %v1937_v9 = vld [vmem:[#allocation2 + $0xa8] sm:$0xe] }
 0x127   : > { %7082 = vmatprep.mubr.bf16.mxu1 %v9824_v46  ;;  %7294 = vmatprep.mubr.bf16.mxu0 %v7764_v30  ;;  %v4585_v46 = vor.u32 %v4584_v52, %v4581_v54  ;;  %v9004_v30 = vrot.slane %v4612_v12, 5  ;;  %v4618_v6 = vrot.slane %v4616_v22, 4  ;;  %v9825_v54 = vcombine.low %v8749_v0, %v8761_v41  ;;  %v7766_v52 = vld [vmem:[#allocation2 + $0x9c] sm:$0xff]   ;;  %v7768_v41 = vld [vmem:[#allocation2 + $0xa8] sm:$0xff]  }
 0x128   : > { %v4595_v15 = vor.u32 %v4594_v37, %v8982_v4  ;;  %v4543_v37 = vsel %vm7999_vm2, %v8974_v57, %v8947_v59  ;;  %v4567_v23 = vsel %vm7999_vm2, %v4562_v26, %v8949_v51  ;;  %v9017_v59 = vsel %vm8281_vm8, %v6197_v2, %v2060_v56  ;;  %v7767_v56 = vld [vmem:[%s9768_s3 + $0xd0] sm:$0xff]  }
 0x129   : > { %9826 = vst [vmem:[#allocation15_spill] sm:$0xff] %v9017_v59  ;;  %v9021_v57 = vsel %vm8281_vm8, %v2062_v17, %v2063_v33  ;;  %v9828_v0 = vcombine.low %v8753_v24, %v8765_v31  ;;  %v4577_v36 = vsel %vm7999_vm2, %v4572_v58, %v4576_v35  ;;  %v4586_v51 = vrot.slane %v4585_v46, 4  ;;  %v1938_v26 = vld [vmem:[#allocation2 + $0xb4] sm:$0xe]  ;;  %v7771_v17 = vld [vmem:[%s9768_s3 + $0xd8] sm:$0xff]  }
 0x12a   : > { %9827 = vst [vmem:[#allocation16_spill] sm:$0xff] %v9021_v57  ;;  %v4596_v49 = vrot.slane %v4595_v15, 4  ;;  %v4600_v44 = vrot.slane %v4598_v55, 5  ;;  %v9034_v2 = vsel %vm8281_vm8, %v6198_v10, %v2067_v21  ;;  %v9038_v24 = vsel %vm8281_vm8, %v2069_v32, %v2070_v8  ;;  %v4452_v58 = vld [vmem:[#allocation2 + $0x60] sm:$0xf] }
 0x12b   : > { %9829 = vst [vmem:[#allocation17_spill] sm:$0xff] %v9034_v2  ;;  %9830 = vst [vmem:[#allocation18_spill] sm:$0xff] %v9038_v24  ;;  %v4609_v31 = vor.u32 %v4608_v11, %v4605_v40  ;;  %v9831_v35 = vsel %vm7999_vm2, %v8939_v25, %v8929_v14  ;;  %v9832_v55 = vsel %vm7999_vm2, %v8910_v61, %v8893_v42  ;;  %v6199_v22 = vrot.slane %v1937_v9, 9  ;;  %v9073_v46 = vld [vmem:[#allocation2 + $0x64] sm:$0xf]  ;;  %v7770_v9 = vld [vmem:[#allocation2 + $0xb4] sm:$0xff]  }
 0x12c   : > { %v9051_v12 = vcombine.low %v9832_v55, %v9831_v35  ;;  %v4619_v21 = vor.u32 %v4618_v6, %v9004_v30  ;;  %v2074_v8 = vrot.slane %v8598_v13, 5  ;;  %v9060_v25 = vcombine.low %v4543_v37, %v4553_v28  ;;  %v4455_v15 = vld [vmem:[#allocation2 + $0x6c] sm:$0xf]  ;;  %v9079_v37 = vld [vmem:[#allocation2 + $0x70] sm:$0xf]  ;;  %v7775_v55 = vld [vmem:[%s9768_s3 + $0xe0] sm:$0xff]  }
 0x12d   : > { %v9062_v33 = vcombine.low %v4567_v23, %v4577_v36  ;;  %v4591_v61 = vsel %vm7999_vm2, %v4586_v51, %v8982_v4  ;;  %v4601_v10 = vsel %vm7999_vm2, %v4596_v49, %v4600_v44  ;;  %v9075_v32 = vrot.slane %v4609_v31, 4  ;;  %v4458_v28 = vld [vmem:[#allocation2 + $0x78] sm:$0xf]  ;;  %v9094_v44 = vld [vmem:[#allocation2 + $0x7c] sm:$0xf] }
 0x12e   : > { %7083 = vmatmul.mubr.bf16.vlgmr.msra.gmra.mrb[0].mxu1 %v9825_v54  ;;  %7295 = vmatmul.mubr.bf16.gmra.mrb[20].mxu0 %v7766_v52  ;;  %v6200_v11 = vrot.slane %v1938_v26, 9  ;;  %v9081_v6 = vrot.slane %v4619_v21, 4  ;;  %v9085_v4 = vsel %vm8281_vm8, %v6199_v22, %v2074_v8  ;;  %v2076_v54 = vrot.slane %v2074_v8, 4  ;;  %v9133_v14 = vld [vmem:[#allocation2 + $0x88] sm:$0xf] }
 0x12f   : > { %7115 = vmatpush3.bf16.msra.mxu1 %v8783_v29  ;;  %7086 = vmatprep.mubr.bf16.mxu1 %v9828_v0  ;;  %v4622_v29 = vshll.u32 %v9002_v62, 16  ;;  %v2081_v52 = vrot.slane %v8629_v27, 5  ;;  %v9833_v23 = vcombine.low %v8787_v7, %v8791_v38  ;;  %v9091_v0 = vcombine.low %v4591_v61, %v4601_v10  ;;  %v7772_v27 = vld [vmem:[#allocation2 + $0xc0] sm:$0xff]   ;;  %v7777_v10 = vld [vmem:[%s9768_s3 + $0xe8] sm:$0xff]   ;;  %9837 = vst [vmem:[#allocation19_spill] sm:$0xff] %v9133_v14 }
 0x130   : > { %7116 = vmatprep.subr.bf16.mxu1 %v7763_v18  ;;  %7298 = vmatprep.mubr.bf16.mxu0 %v7768_v41  ;;  %v9834_v41 = vld [vmem:[#allocation3_spill] sm:$0xff]  ;;  %v4627_v51 = vshrl.u32 %v4452_v58, 16  ;;  %v4630_v49 = vshll.u32 %v4452_v58, 16  ;;  %v9836_v31 = vcombine.low %v8805_v53, %v8816_v47  ;;  %v4640_v7 = vshrl.u32 %v9073_v46, 16  ;;  %v7774_v47 = vld [vmem:[#allocation2 + $0xcc] sm:$0xff]  }
 0x131   : > { %v9077_v5 = vrot.slane %v4622_v29, 5  ;;  %9835 = vst [vmem:[#allocation3_spill] sm:$0xff] %v9094_v44  ;;  %v4636_v29 = vshll.u32 %v9073_v46, 16  ;;  %v4651_v38 = vshrl.u32 %v4455_v15, 16  ;;  %v4654_v35 = vshll.u32 %v4455_v15, 16 }
 0x132   : > { %v4660_v21 = vshll.u32 %v9079_v37, 16  ;;  %v4664_v22 = vshrl.u32 %v9079_v37, 16  ;;  %v4675_v8 = vshrl.u32 %v4458_v28, 16  ;;  %v4678_v53 = vshll.u32 %v4458_v28, 16  ;;  %v4461_v28 = vld [vmem:[#allocation2 + $0x84] sm:$0xf] }
 0x133   : > { %7117 = vmatpush3.bf16.msra.mxu1 %v7763_v18  ;;  %v7849_v18 = vld [vmem:[#allocation2 + $0xb0] sm:$0x1]  ;;  %v4684_v26 = vshll.u32 %v9094_v44, 16  ;;  %v4688_v61 = vshrl.u32 %v9094_v44, 16  ;;  %v9125_v15 = vsel %vm8281_vm8, %v6200_v11, %v2081_v52  ;;  %v4653_v13 = vrot.slane %v4651_v38, 4 }
 0x134   : > { %7118 = vmatprep.subr.bf16.mxu1 %v7767_v56  ;;  %v2077_v40 = vrot.slane %v7849_v18, 5  ;;  %v9127_v18 = vld [vmem:[#allocation2 + $0x68] sm:$0x1]  ;;  %v4656_v42 = vrot.slane %v4654_v35, 5  ;;  %v9135_v11 = vrot.slane %v4660_v21, 5  ;;  %v4666_v58 = vrot.slane %v4664_v22, 4 }
 0x135   : > { %v4677_v36 = vrot.slane %v4675_v8, 4  ;;  %v9137_v24 = vrot.slane %v2081_v52, 4  ;;  %v9839_v38 = vcombine.low %v8845_v43, %v8850_v60  ;;  %v4699_v35 = vshrl.u32 %v4461_v28, 16  ;;  %v7779_v43 = vld [vmem:[%s9768_s3 + $0xf0] sm:$0xff]   ;;  %v4467_v59 = vld [vmem:[#allocation2 + $0x9c] sm:$0xf] }
 0x136   : > { %7087 = vmatmul.mubr.bf16.gmra.mrb[4].mxu1 %v9833_v23  ;;  %7299 = vmatmul.mubr.bf16.gmra.mrb[24].mxu0 %v7770_v9  ;;  %v9129_v23 = vrot.slane %v4636_v29, 5  ;;  %v4642_v9 = vrot.slane %v4640_v7, 4  ;;  %v9142_v29 = vrot.slane %v4684_v26, 5  ;;  %v4690_v7 = vrot.slane %v4688_v61, 4 }
 0x137   : > { %7090 = vmatprep.mubr.bf16.mxu1 %v9836_v31  ;;  %7119 = vmatpush3.bf16.msra.mxu1 %v7767_v56  ;;  %v9112_v56 = vsel %vm8281_vm8, %v2076_v54, %v2077_v40  ;;  %v4629_v40 = vrot.slane %v4627_v51, 4  ;;  %v4632_v54 = vrot.slane %v4630_v49, 5  ;;  %v9131_v31 = vld [vmem:[#allocation2 + $0x74] sm:$0x1]  ;;  %v4680_v51 = vrot.slane %v4678_v53, 5 }
 0x138   : > { %7120 = vmatprep.subr.bf16.mxu1 %v7771_v17  ;;  %7302 = vmatprep.mubr.bf16.mxu0 %v7772_v27  ;;  %v4464_v49 = vld [vmem:[#allocation2 + $0x90] sm:$0xf]  ;;  %v9140_v27 = vld [vmem:[#allocation2 + $0x80] sm:$0x1]  ;;  %v4702_v21 = vshll.u32 %v4461_v28, 16  ;;  %v4708_v22 = vshll.u32 %v9133_v14, 16  ;;  %v9841_v52 = vcombine.low %v8854_v50, %v8858_v45  ;;  %v4643_v61 = vor.u32 %v4642_v9, %v9129_v23 }
 0x139   : > { %9838 = vst [vmem:[#allocation20_spill] sm:$0xff] %v9140_v27  ;;  %v4712_v8 = vshrl.u32 %v9133_v14, 16  ;;  %v9149_v53 = vld [vmem:[#allocation2 + $0x94] sm:$0xf]  ;;  %v4633_v26 = vor.u32 %v4632_v54, %v4629_v40  ;;  %v4723_v2 = vshrl.u32 %v4464_v49, 16  ;;  %v4726_v44 = vshll.u32 %v4464_v49, 16 }
 0x13a   : > { %9840 = vst [vmem:[#allocation21_spill] sm:$0xff] %v9149_v53  ;;  %v4657_v60 = vor.u32 %v4656_v42, %v4653_v13  ;;  %v4667_v28 = vor.u32 %v4666_v58, %v9135_v11  ;;  %v4681_v14 = vor.u32 %v4680_v51, %v4677_v36  ;;  %v4691_v50 = vor.u32 %v4690_v7, %v9142_v29  ;;  %v9167_v54 = vld [vmem:[%s9768_s3 + $0xf8] sm:$0xff]   ;;  %v9172_v49 = vld [vmem:[#allocation2 + $0x8c] sm:$0x1] }
 0x13b   : > { %7121 = vmatpush3.bf16.msra.mxu1 %v7771_v17  ;;  %v4646_v17 = vshll.u32 %v9127_v18, 16  ;;  %v4694_v45 = vshll.u32 %v9140_v27, 16  ;;  %v4736_v40 = vshrl.u32 %v9149_v53, 16  ;;  %v4701_v42 = vrot.slane %v4699_v35, 4 }
 0x13c   : > { %7122 = vmatprep.subr.bf16.mxu1 %v7775_v55  ;;  %v4704_v13 = vrot.slane %v4702_v21, 5  ;;  %v9169_v58 = vrot.slane %v4708_v22, 5  ;;  %v4714_v9 = vrot.slane %v4712_v8, 4  ;;  %v4634_v36 = vrot.slane %v4633_v26, 4  ;;  %v9181_v26 = vld [vmem:[#allocation2 + $0x98] sm:$0x1] }
 0x13d   : > { %v4648_v51 = vrot.slane %v4646_v17, 5  ;;  %v4725_v7 = vrot.slane %v4723_v2, 4  ;;  %v4668_v27 = vrot.slane %v4667_v28, 4  ;;  %v4682_v35 = vrot.slane %v4681_v14, 4  ;;  %v9873_v14 = vld [vmem:[#allocation18_spill] sm:$0xff] }
 0x13e   : > { %7091 = vmatmul.mubr.bf16.gmra.mrb[8].mxu1 %v9839_v38  ;;  %v4670_v38 = vshll.u32 %v9131_v31, 16  ;;  %7303 = vmatmul.mubr.bf16.gmra.mrb[28].mxu0 %v7774_v47  ;;  %v4644_v47 = vrot.slane %v4643_v61, 4  ;;  %v4696_v21 = vrot.slane %v4694_v45, 5  ;;  %v4738_v8 = vrot.slane %v4736_v40, 4  ;;  %v9843_v61 = vld [vmem:[#allocation7_spill] sm:$0xff] }
 0x13f   : > { %7094 = vmatprep.mubr.bf16.mxu1 %v9841_v52  ;;  %7123 = vmatpush3.bf16.msra.mxu1 %v7775_v55  ;;  %v4732_v55 = vshll.u32 %v9149_v53, 16  ;;  %v4728_v52 = vrot.slane %v4726_v44, 5  ;;  %v4658_v53 = vrot.slane %v4657_v60, 4  ;;  %v4705_v17 = vor.u32 %v4704_v13, %v4701_v42 }
 0x140   : > { %7124 = vmatprep.subr.bf16.mxu1 %v7777_v10  ;;  %7322 = vmatprep.mubr.bf16.mxu0 %v8927_v48  ;;  %v4672_v57 = vrot.slane %v4670_v38, 5  ;;  %v9842_v48 = vcombine.low %v8862_v1, %v8869_v19  ;;  %v4715_v2 = vor.u32 %v4714_v9, %v9169_v58  ;;  %v4718_v44 = vshll.u32 %v9172_v49, 16  ;;  %v7778_v19 = vld [vmem:[%s9768_s3 + $0x208] sm:$0xff]  }
 0x141   : > { %v9174_v22 = vrot.slane %v4732_v55, 5  ;;  %v9844_v60 = vcombine.low %v8873_v63, %v9843_v61  ;;  %v4729_v28 = vor.u32 %v4728_v52, %v4725_v7  ;;  %v4747_v38 = vshrl.u32 %v4467_v59, 16  ;;  %v9207_v55 = vld [vmem:[#allocation2 + $0xa0] sm:$0xf] }
 0x142   : > { %v4750_v1 = vshll.u32 %v4467_v59, 16  ;;  %v4639_v63 = vsel %vm7999_vm2, %v4634_v36, %v9129_v23  ;;  %v4649_v59 = vsel %vm7999_vm2, %v4644_v47, %v4648_v51  ;;  %v4742_v23 = vshll.u32 %v9181_v26, 16  ;;  %v9847_v51 = vld [vmem:[#allocation5_spill] sm:$0xff]  ;;  %v9848_v7 = vld [vmem:[#allocation4_spill] sm:$0xff] }
 0x143   : > { %7125 = vmatpush3.bf16.msra.mxu1 %v7777_v10  ;;  %v4692_v10 = vrot.slane %v4691_v50, 4  ;;  %v9845_v50 = vrot.slane %v9834_v41, 5  ;;  %v4673_v41 = vsel %vm7999_vm2, %v4668_v27, %v4672_v57  ;;  %v4739_v40 = vor.u32 %v4738_v8, %v9174_v22  ;;  %v9846_v57 = vld [vmem:[#allocation13_spill] sm:$0xff]  ;;  %v9852_v61 = vld [vmem:[#allocation8_spill] sm:$0xff] }
 0x144   : > { %7126 = vmatprep.subr.bf16.mxu1 %v7779_v43  ;;  %v9219_v13 = vrot.slane %v4705_v17, 4  ;;  %v9227_v27 = vrot.slane %v4729_v28, 4  ;;  %v4752_v9 = vrot.slane %v4750_v1, 5  ;;  %v4756_v36 = vshll.u32 %v9207_v55, 16  ;;  %v9255_v17 = vld [vmem:[#allocation2 + $0xa4] sm:$0x1] }
 0x145   : > { %v9196_v45 = vsel %vm8281_vm8, %v9137_v24, %v9845_v50  ;;  %v4687_v24 = vsel %vm7999_vm2, %v4682_v35, %v9142_v29  ;;  %v4697_v42 = vsel %vm7999_vm2, %v4692_v10, %v4696_v21  ;;  %v4749_v29 = vrot.slane %v4747_v38, 4  ;;  %v7780_v35 = vld [vmem:[%s9768_s3 + $0x210] sm:$0xff]   ;;  %v9283_v50 = vld [vmem:[#allocation2 + $0xac] sm:$0xf] }
 0x146   : > { %7095 = vmatmul.mubr.bf16.gmra.mrb[12].mxu1 %v9842_v48  ;;  %7323 = vmatmul.mubr.bf16.vlgmr.msra.gmra.mrb[0].mxu0 %v9051_v12  ;;  %v4470_v12 = vld [vmem:[#allocation2 + $0xa8] sm:$0xf]  ;;  %v9849_v52 = vor.u32 %v9847_v51, %v9848_v7  ;;  %v9851_v21 = vsel %vm7999_vm2, %v9075_v32, %v9004_v30  ;;  %v9252_v10 = vcombine.low %v4639_v63, %v4649_v59  ;;  %v9265_v30 = vrot.slane %v4739_v40, 4  ;;  %v5193_v59 = vld [vmem:[#allocation2 + $0x54] sm:$0xe] }
 0x147   : > { %7098 = vmatprep.mubr.bf16.mxu1 %v9844_v60  ;;  %7127 = vmatpush3.bf16.msra.mxu1 %v7779_v43  ;;  %v4663_v43 = vsel %vm7999_vm2, %v4658_v53, %v9135_v11  ;;  %v9221_v11 = vrot.slane %v4715_v2, 4  ;;  %v9223_v53 = vrot.slane %v4718_v44, 5  ;;  %v9267_v32 = vrot.slane %v4742_v23, 5  ;;  %v5192_v44 = vld [vmem:[#allocation2 + $0x48] sm:$0xe]  ;;  %v9864_v23 = vld [vmem:[#allocation16_spill] sm:$0xff] }
 0x148   : > { %7128 = vmatprep.subr.bf16.mxu1 %v9167_v54  ;;  %7355 = vmatpush3.bf16.msra.mxu0 %v9846_v57  ;;  %v9233_v47 = vrot.slane %v9849_v52, 4  ;;  %v9257_v2 = vcombine.low %v4663_v43, %v4673_v41  ;;  %v9273_v28 = vcombine.low %v4687_v24, %v4697_v42  ;;  %v4771_v63 = vshrl.u32 %v4470_v12, 16  ;;  %v9855_v43 = vld [vmem:[#allocation10_spill] sm:$0xff]  ;;  %v9856_v41 = vld [vmem:[#allocation11_spill] sm:$0xff]  ;;  %v9872_v48 = vld [vmem:[#allocation17_spill] sm:$0xff] }
 0x149   : > { %7326 = vmatprep.mubr.bf16.mxu0 %v9060_v25  ;;  %7356 = vmatprep.subr.bf16.mxu0 %v7778_v19  ;;  %v9850_v25 = vsel %vm7999_vm2, %v9081_v6, %v9077_v5  ;;  %v9262_v5 = vld [vmem:[%s9768_s3 + $0x100] sm:$0xff]   ;;  %v4760_v6 = vshrl.u32 %v9207_v55, 16  ;;  %v9857_v40 = vcombine.low %v9855_v43, %v9856_v41  ;;  %v7782_v24 = vld [vmem:[%s9768_s3 + $0x218] sm:$0xff]   ;;  %v4753_v42 = vor.u32 %v4752_v9, %v4749_v29 }
 0x14a   : > { %v9248_v8 = vcombine.low %v9851_v21, %v9850_v25  ;;  %v9295_v57 = vrot.slane %v4756_v36, 5  ;;  %v4766_v51 = vshll.u32 %v9255_v17, 16  ;;  %v4774_v52 = vshll.u32 %v4470_v12, 16  ;;  %v9858_v21 = vld [vmem:[#allocation12_spill] sm:$0xff] }
 0x14b   : > { %7129 = vmatpush3.bf16.msra.mxu1 %v9167_v54  ;;  %v9853_v54 = vld [vmem:[#allocation9_spill] sm:$0xff]  ;;  %v6461_v25 = vrot.slane %v5192_v44, 9  ;;  %v9304_v43 = vrot.slane %v4760_v6, 4  ;;  %v4780_v29 = vshll.u32 %v9283_v50, 16  ;;  %v6462_v9 = vrot.slane %v5193_v59, 9  ;;  %v9859_v44 = vld [vmem:[#allocation14_spill] sm:$0xff] }
 0x14c   : > { %7402 = vmatprep.subr.bf16.mxu1 %v9262_v5  ;;  %v9854_v60 = vcombine.low %v9852_v61, %v9853_v54  ;;  %7357 = vmatpush3.bf16.msra.mxu0 %v7778_v19  ;;  %v5282_v61 = vrot.slane %v9858_v21, 5  ;;  %v5285_v19 = vrot.slane %v8985_v39, 5  ;;  %v5194_v54 = vld [vmem:[#allocation2 + $0x60] sm:$0xe]  ;;  %v9308_v36 = vrot.slane %v4771_v63, 4 }
 0x14d   : > { %7358 = vmatprep.subr.bf16.mxu0 %v7780_v35  ;;  %v5289_v41 = vrot.slane %v9859_v44, 5  ;;  %v5292_v6 = vrot.slane %v9002_v62, 5  ;;  %v6463_v21 = vrot.slane %v5194_v54, 9  ;;  %v5296_v59 = vrot.slane %v9073_v46, 5  ;;  %v7785_v63 = vld [vmem:[%s9768_s3 + $0x220] sm:$0xff]  }
 0x14e   : > { %7099 = vmatmul.mubr.bf16.gmra.mrb[16].mxu1 %v9854_v60  ;;  %7327 = vmatmul.mubr.bf16.gmra.mrb[4].mxu0 %v9062_v33  ;;  %v9312_v12 = vsel %vm8281_vm8, %v6461_v25, %v5282_v61  ;;  %v5284_v39 = vrot.slane %v5282_v61, 4  ;;  %v5195_v33 = vld [vmem:[#allocation2 + $0x6c] sm:$0xe]  ;;  %v9323_v25 = vrot.slane %v4774_v52, 5  ;;  %v5299_v54 = vrot.slane %v9127_v18, 5 }
 0x14f   : > { %7102 = vmatprep.mubr.bf16.mxu1 %v9857_v40  ;;  %7330 = vmatprep.mubr.bf16.mxu0 %v9091_v0  ;;  %v9316_v40 = vrot.slane %v4753_v42, 4  ;;  %v9331_v0 = vsel %vm8281_vm8, %v6462_v9, %v5289_v41  ;;  %v5291_v62 = vrot.slane %v5289_v41, 4  ;;  %v9339_v42 = vsel %vm8281_vm8, %v6463_v21, %v5296_v59  ;;  %v9863_v21 = vld [vmem:[#allocation15_spill] sm:$0xff]  ;;  %v5197_v60 = vld [vmem:[#allocation2 + $0x84] sm:$0xe] }
 0x150   : > { %7359 = vmatpush3.bf16.msra.mxu0 %v7780_v35  ;;  %v9327_v61 = vsel %vm8281_vm8, %v5284_v39, %v5285_v19  ;;  %v9333_v35 = vld [vmem:[#allocation2 + $0xb4] sm:$0xf]  ;;  %9860 = vst [vmem:[#allocation7_spill] sm:$0xff] %v9339_v42  ;;  %v5298_v52 = vrot.slane %v5296_v59, 4  ;;  %v9861_v19 = vcombine.low %v8962_v16, %v8996_v20  ;;  %v9345_v39 = vld [vmem:[#allocation2 + $0xb0] sm:$0x1]  ;;  %v9865_v59 = vcombine.low %v9863_v21, %v9864_v23 }
 0x151   : > { %7360 = vmatprep.subr.bf16.mxu0 %v7782_v24  ;;  %v9349_v9 = vsel %vm8281_vm8, %v5291_v62, %v5292_v6  ;;  %v6464_v44 = vrot.slane %v5195_v33, 9  ;;  %v5303_v41 = vrot.slane %v9079_v37, 5  ;;  %v5306_v46 = vrot.slane %v9131_v31, 5  ;;  %v2822_v33 = vld [vmem:[#allocation2 + $0x78] sm:$0xf]  ;;  %v7788_v37 = vld [vmem:[%s9768_s3 + $0x228] sm:$0xff]  }
 0x152   : > { %9862 = vst [vmem:[#allocation13_spill] sm:$0xff] %v9349_v9  ;;  %v9356_v18 = vrot.slane %v4766_v51, 5  ;;  %v4784_v16 = vshrl.u32 %v9283_v50, 16  ;;  %v9363_v6 = vsel %vm8281_vm8, %v5298_v52, %v5299_v54  ;;  %v9368_v31 = vrot.slane %v4780_v29, 5  ;;  %v5196_v21 = vld [vmem:[#allocation2 + $0x78] sm:$0xe] }
 0x153   : > { %9866 = vst [vmem:[#allocation5_spill] sm:$0xff] %v9363_v6  ;;  %v9376_v51 = vsel %vm8281_vm8, %v6464_v44, %v5303_v41  ;;  %v5305_v62 = vrot.slane %v5303_v41, 4  ;;  %v4763_v54 = vor.u32 %v9304_v43, %v9295_v57  ;;  %v4790_v29 = vshll.u32 %v9345_v39, 16  ;;  %v9875_v6 = vld [vmem:[#allocation19_spill] sm:$0xff] }
 0x154   : > { %7361 = vmatpush3.bf16.msra.mxu0 %v7782_v24  ;;  %v9370_v24 = vld [vmem:[#allocation2 + $0xb8] sm:$0xf]  ;;  %9867 = vst [vmem:[#allocation4_spill] sm:$0xff] %v9376_v51  ;;  %v4777_v44 = vor.u32 %v9323_v25, %v9308_v36  ;;  %v3063_v23 = vshll.u32 %v2822_v33, 16  ;;  %v4786_v43 = vrot.slane %v4784_v16, 4  ;;  %v4798_v20 = vshll.u32 %v9333_v35, 16 }
 0x155   : > { %7362 = vmatprep.subr.bf16.mxu0 %v7785_v63  ;;  %v9391_v41 = vsel %vm8281_vm8, %v5305_v62, %v5306_v46  ;;  %v4804_v52 = vshll.u32 %v9370_v24, 16  ;;  %v7791_v36 = vld [vmem:[%s9768_s3 + $0x230] sm:$0xff]   ;;  %v9870_v62 = vld [vmem:[#allocation3_spill] sm:$0xff]  ;;  %v4476_v51 = vld [vmem:[#allocation2 + $0xc0] sm:$0xf]  ;;  %v5317_v42 = vrot.slane %v9875_v6, 5  ;;  %v9884_v3 = vcombine.low %v9312_v12, %v9327_v61 }
 0x156   : > { %7103 = vmatmul.mubr.bf16.gmra.mrb[20].mxu1 %v9861_v19  ;;  %v4795_v19 = vshrl.u32 %v9333_v35, 16  ;;  %7331 = vmatmul.mubr.bf16.gmra.mrb[8].mxu0 %v9248_v8  ;;  %9868 = vst [vmem:[#allocation8_spill] sm:$0xff] %v9391_v41  ;;  %v3065_v46 = vrot.slane %v3063_v23, 5  ;;  %v4764_v35 = vrot.slane %v4763_v54, 4  ;;  %v5310_v38 = vrot.slane %v9870_v62, 5  ;;  %v9871_v8 = vld [vmem:[#allocation20_spill] sm:$0xff] }
 0x157   : > { %7106 = vmatprep.mubr.bf16.mxu1 %v9865_v59  ;;  %v3060_v59 = vshrl.u32 %v2822_v33, 16  ;;  %7334 = vmatprep.mubr.bf16.mxu0 %v9252_v10  ;;  %v9869_v33 = vld [vmem:[#allocation6_spill] sm:$0xff]  ;;  %v5313_v1 = vrot.slane %v9871_v8, 5  ;;  %v9874_v41 = vcombine.low %v9872_v48, %v9873_v14  ;;  %v6466_v23 = vrot.slane %v5197_v60, 9  ;;  %v9425_v6 = vld [vmem:[#allocation2 + $0xc4] sm:$0xf] }
 0x158   : > { %7363 = vmatpush3.bf16.msra.mxu0 %v7785_v63  ;;  %v3082_v10 = vsel %vm7999_vm2, %v9233_v47, %v9869_v33  ;;  %v6465_v63 = vrot.slane %v5196_v21, 9  ;;  %v9405_v16 = vrot.slane %v4795_v19, 4  ;;  %v5320_v9 = vrot.slane %v9172_v49, 5  ;;  %v5198_v62 = vld [vmem:[#allocation2 + $0x90] sm:$0xe] }
 0x159   : > { %7364 = vmatprep.subr.bf16.mxu0 %v7788_v37  ;;  %v3062_v25 = vrot.slane %v3060_v59, 4  ;;  %v9876_v47 = vcombine.low %v9085_v4, %v9112_v56  ;;  %v9417_v54 = vrot.slane %v4777_v44, 4  ;;  %v4808_v19 = vshrl.u32 %v9370_v24, 16  ;;  %v7794_v4 = vld [vmem:[%s9768_s3 + $0x238] sm:$0xff]   ;;  %v9885_v12 = vld [vmem:[#allocation13_spill] sm:$0xff] }
 0x15a   : > { %v9422_v14 = vsel %vm8281_vm8, %v6465_v63, %v5310_v38  ;;  %v5312_v48 = vrot.slane %v5310_v38, 4  ;;  %v4787_v60 = vor.u32 %v4786_v43, %v9368_v31  ;;  %v9432_v49 = vsel %vm8281_vm8, %v6466_v23, %v5317_v42  ;;  %v4479_v23 = vld [vmem:[#allocation2 + $0xcc] sm:$0xf] }
 0x15b   : > { %v3066_v59 = vor.u32 %v3065_v46, %v3062_v25  ;;  %v4800_v21 = vrot.slane %v4798_v20, 5  ;;  %v4819_v44 = vshrl.u32 %v4476_v51, 16  ;;  %v4769_v43 = vsel %vm7999_vm2, %v4764_v35, %v9356_v18 }
 0x15c   : > { %7365 = vmatpush3.bf16.msra.mxu0 %v7788_v37  ;;  %v5319_v37 = vrot.slane %v5317_v42, 4  ;;  %v9436_v38 = vsel %vm8281_vm8, %v5312_v48, %v5313_v1  ;;  %v9452_v1 = vld [vmem:[#allocation2 + $0xbc] sm:$0x1]  ;;  %v4832_v18 = vshrl.u32 %v9425_v6, 16  ;;  %v4788_v46 = vrot.slane %v4787_v60, 4  ;;  %v9883_v60 = vld [vmem:[#allocation21_spill] sm:$0xff] }
 0x15d   : > { %7366 = vmatprep.subr.bf16.mxu0 %v7791_v36  ;;  %v3067_v56 = vrot.slane %v3066_v59, 4  ;;  %v6497_v42 = vcombine.low %v9422_v14, %v9436_v38  ;;  %v4792_v33 = vrot.slane %v4790_v29, 5  ;;  %v9460_v63 = vrot.slane %v4804_v52, 5 }
 0x15e   : > { %7107 = vmatmul.mubr.bf16.gmra.mrb[24].mxu1 %v9874_v41  ;;  %v4822_v41 = vshll.u32 %v4476_v51, 16  ;;  %7335 = vmatmul.mubr.bf16.gmra.mrb[12].mxu0 %v9257_v2  ;;  %v9449_v20 = vsel %vm8281_vm8, %v5319_v37, %v5320_v9  ;;  %v7783_v51 = vld [vmem:[#allocation2 + $0xc] sm:$0xff]   ;;  %v4828_v2 = vshll.u32 %v9425_v6, 16  ;;  %v4810_v9 = vrot.slane %v4808_v19, 4 }
 0x15f   : > { %7110 = vmatprep.mubr.bf16.mxu1 %v9876_v47  ;;  %v3072_v8 = vsel %vm7999_vm2, %v3067_v56, %v9848_v7  ;;  %7338 = vmatprep.mubr.bf16.mxu0 %v9273_v28  ;;  %v6498_v7 = vcombine.low %v9432_v49, %v9449_v20  ;;  %v4821_v35 = vrot.slane %v4819_v44, 4  ;;  %v9879_v52 = vsel %vm7999_vm2, %v9219_v13, %v9169_v58  ;;  %v9491_v13 = vld [vmem:[#allocation2 + $0xc8] sm:$0x1]  ;;  %v5199_v47 = vld [vmem:[#allocation2 + $0x9c] sm:$0xe] }
 0x160   : > { %7367 = vmatpush3.bf16.msra.mxu0 %v7791_v36  ;;  %v9456_v25 = vcombine.low %v3072_v8, %v3082_v10  ;;  %v4824_v28 = vrot.slane %v4822_v41, 5  ;;  %v9877_v36 = vcombine.low %v9125_v15, %v9196_v45  ;;  %v9878_v10 = vsel %vm7999_vm2, %v9221_v11, %v9223_v53  ;;  %v9503_v19 = vld [vmem:[#allocation2 + $0xd0] sm:$0xf]  ;;  %v7786_v8 = vld [vmem:[#allocation2 + $0x24] sm:$0xff]  }
 0x161   : > { %7368 = vmatprep.subr.bf16.mxu0 %v7794_v4  ;;  %v6442_v29 = vcombine.low %v9879_v52, %v9878_v10  ;;  %v9880_v59 = vsel %vm7999_vm2, %v9265_v30, %v9267_v32  ;;  %v9881_v15 = vsel %vm7999_vm2, %v9227_v27, %v9174_v22  ;;  %v9882_v11 = vsel %vm7999_vm2, %v9316_v40, %v9295_v57  ;;  %v7876_v20 = vld [vmem:[#allocation2 + $0xb0] sm:$0x1] }
 0x162   : > { %v6443_v45 = vcombine.low %v9881_v15, %v9880_v59  ;;  %v6444_v53 = vcombine.low %v9882_v11, %v4769_v43  ;;  %v4814_v58 = vshll.u32 %v9452_v1, 16  ;;  %v4783_v30 = vsel %vm7999_vm2, %v9417_v54, %v9368_v31 }
 0x163   : > { %v4801_v22 = vor.u32 %v4800_v21, %v9405_v16  ;;  %v9498_v27 = vrot.slane %v4828_v2, 5  ;;  %v4834_v32 = vrot.slane %v4832_v18, 4  ;;  %v4793_v57 = vsel %vm7999_vm2, %v4788_v46, %v4792_v33  ;;  %v7784_v21 = vld [vmem:[#allocation2 + $0x18] sm:$0xff]  }
 0x164   : > { %7369 = vmatpush3.bf16.msra.mxu0 %v7794_v4  ;;  %v4811_v40 = vor.u32 %v4810_v9, %v9460_v63  ;;  %v6467_v48 = vrot.slane %v5198_v62, 9  ;;  %v5324_v56 = vrot.slane %v9883_v60, 5  ;;  %v4825_v37 = vor.u32 %v4824_v28, %v4821_v35  ;;  %v7789_v60 = vld [vmem:[#allocation2 + $0x3c] sm:$0xff]  }
 0x165   : > { %v4838_v31 = vshll.u32 %v9491_v13, 16  ;;  %v4843_v54 = vshrl.u32 %v4479_v23, 16  ;;  %v5327_v16 = vrot.slane %v9181_v26, 5  ;;  %v4846_v4 = vshll.u32 %v4479_v23, 16  ;;  %v7851_v23 = vld [vmem:[%s9768_s3 + $0x108] sm:$0xff]  }
 0x166   : > { %7111 = vmatmul.mubr.bf16.gmra.mrb[28].mxu1 %v9877_v36  ;;  %7339 = vmatmul.mubr.bf16.gmra.mrb[16].mxu0 %v6442_v29  ;;  %v9510_v44 = vsel %vm8281_vm8, %v6467_v48, %v5324_v56  ;;  %v5326_v41 = vrot.slane %v5324_v56, 4  ;;  %v6468_v43 = vrot.slane %v5199_v47, 9  ;;  %v4852_v2 = vshll.u32 %v9503_v19, 16  ;;  %v9523_v29 = vld [vmem:[#allocation2 + $0xd4] sm:$0x1] }
 0x167   : > { %7130 = vmatprep.mubr.bf16.mxu1 %v7783_v51  ;;  %7342 = vmatprep.mubr.bf16.mxu0 %v6443_v45  ;;  %v4835_v51 = vor.u32 %v4834_v32, %v9498_v27  ;;  %v4856_v18 = vshrl.u32 %v9503_v19, 16  ;;  %v5331_v46 = vrot.slane %v9207_v55, 5  ;;  %v4802_v26 = vrot.slane %v4801_v22, 4  ;;  %v5200_v32 = vld [vmem:[#allocation2 + $0xa8] sm:$0xe]  ;;  %v7787_v47 = vld [vmem:[#allocation2 + $0x30] sm:$0xff]  }
 0x168   : > { %v4816_v33 = vrot.slane %v4814_v58, 5  ;;  %v9518_v9 = vsel %vm8281_vm8, %v5326_v41, %v5327_v16  ;;  %v5334_v35 = vrot.slane %v9255_v17, 5  ;;  %v6445_v28 = vcombine.low %v4783_v30, %v4793_v57 }
 0x169   : > { %v4812_v62 = vrot.slane %v4811_v40, 4  ;;  %v4840_v36 = vrot.slane %v4838_v31, 5  ;;  %v6499_v10 = vcombine.low %v9510_v44, %v9518_v9  ;;  %v4826_v52 = vrot.slane %v4825_v37, 4  ;;  %v5201_v31 = vld [vmem:[#allocation2 + $0xb4] sm:$0xe] }
 0x16a   : > { %v4845_v59 = vrot.slane %v4843_v54, 4  ;;  %v9527_v55 = vsel %vm8281_vm8, %v6468_v43, %v5331_v46  ;;  %v5333_v15 = vrot.slane %v5331_v46, 4  ;;  %v4836_v17 = vrot.slane %v4835_v51, 4  ;;  %v7853_v54 = vld [vmem:[#allocation2 + $0x1c] sm:$0xf] }
 0x16b   : > { %v4848_v45 = vrot.slane %v4846_v4, 5  ;;  %v9530_v11 = vrot.slane %v4852_v2, 5  ;;  %v4858_v58 = vrot.slane %v4856_v18, 4  ;;  %v4862_v22 = vshll.u32 %v9523_v29, 16 }
 0x16c   : > { %v9537_v30 = vsel %vm8281_vm8, %v5333_v15, %v5334_v35  ;;  %v4807_v57 = vsel %vm7999_vm2, %v4802_v26, %v9460_v63  ;;  %v4817_v40 = vsel %vm7999_vm2, %v4812_v62, %v4816_v33  ;;  %v4831_v48 = vsel %vm7999_vm2, %v4826_v52, %v9498_v27  ;;  %v7852_v63 = vld [vmem:[%s9768_s3 + $0x110] sm:$0xff]  }
 0x16d   : > { %v4841_v56 = vsel %vm7999_vm2, %v4836_v17, %v4840_v36  ;;  %v4849_v37 = vor.u32 %v4848_v45, %v4845_v59  ;;  %v5254_v16 = vrot.slane %v7853_v54, 5  ;;  %v5338_v27 = vrot.slane %v9283_v50, 5  ;;  %v7855_v36 = vld [vmem:[#allocation2 + $0x20] sm:$0x1]  ;;  %v7790_v17 = vld [vmem:[#allocation2 + $0x48] sm:$0xff]   ;;  %v7792_v45 = vld [vmem:[#allocation2 + $0x54] sm:$0xff]  }
 0x16e   : > { %7131 = vmatmul.mubr.bf16.vlgmr.msra.gmra.mrb[0].mxu1 %v7784_v21  ;;  %7343 = vmatmul.mubr.bf16.gmra.mrb[20].mxu0 %v6444_v53  ;;  %v4859_v53 = vor.u32 %v4858_v58, %v9530_v11  ;;  %v6469_v21 = vrot.slane %v5200_v32, 9  ;;  %v5341_v4 = vrot.slane %v9345_v39, 5  ;;  %v6446_v41 = vcombine.low %v4807_v57, %v4817_v40  ;;  %v7854_v39 = vld [vmem:[%s9768_s3 + $0x118] sm:$0xff]   ;;  %v7856_v32 = vld [vmem:[#allocation2 + $0x28] sm:$0xf]  ;;  %v7857_v40 = vld [vmem:[%s9768_s3 + $0x120] sm:$0xff]  }
 0x16f   : > { %7410 = vmatpush3.bf16.msra.mxu1 %v9262_v5  ;;  %7134 = vmatprep.mubr.bf16.mxu1 %v7786_v8  ;;  %v6500_v5 = vcombine.low %v9527_v55, %v9537_v30  ;;  %v4864_v43 = vrot.slane %v4862_v22, 5  ;;  %v5188_v8 = vld [vmem:[#allocation2 + $0x18] sm:$0xe]  ;;  %v6447_v51 = vcombine.low %v4831_v48, %v4841_v56  ;;  %v5340_v18 = vrot.slane %v5338_v27, 4  ;;  %v5189_v22 = vld [vmem:[#allocation2 + $0x24] sm:$0xe] }
 0x170   : > { %7403 = vmatprep.subr.bf16.mxu1 %v7851_v23  ;;  %7346 = vmatprep.mubr.bf16.mxu0 %v6445_v28  ;;  %v9560_v2 = vsel %vm8281_vm8, %v6469_v21, %v5338_v27  ;;  %v6470_v46 = vrot.slane %v5201_v31, 9  ;;  %v4850_v26 = vrot.slane %v4849_v37, 4  ;;  %v4860_v33 = vrot.slane %v4859_v53, 4  ;;  %v5202_v53 = vld [vmem:[#allocation2 + $0xc0] sm:$0xe] }
 0x171   : > { %v5345_v35 = vrot.slane %v9370_v24, 5  ;;  %v5348_v50 = vrot.slane %v9452_v1, 5  ;;  %v6457_v28 = vrot.slane %v5188_v8, 9  ;;  %v5256_v62 = vrot.slane %v5254_v16, 4  ;;  %v5190_v31 = vld [vmem:[#allocation2 + $0x30] sm:$0xe] }
 0x172   : > { %v5257_v52 = vrot.slane %v7855_v36, 5  ;;  %v9569_v59 = vsel %vm8281_vm8, %v5340_v18, %v5341_v4  ;;  %v4855_v58 = vsel %vm7999_vm2, %v4850_v26, %v9530_v11  ;;  %v6458_v54 = vrot.slane %v5189_v22, 9  ;;  %v7859_v21 = vld [vmem:[#allocation2 + $0x2c] sm:$0x1]  ;;  %v5203_v8 = vld [vmem:[#allocation2 + $0xcc] sm:$0xe] }
 0x173   : > { %7411 = vmatpush3.bf16.msra.mxu1 %v7851_v23  ;;  %v6501_v15 = vcombine.low %v9560_v2, %v9569_v59  ;;  %v9575_v24 = vsel %vm8281_vm8, %v6470_v46, %v5345_v35  ;;  %v5347_v1 = vrot.slane %v5345_v35, 4  ;;  %v4865_v23 = vsel %vm7999_vm2, %v4860_v33, %v4864_v43  ;;  %v7861_v26 = vld [vmem:[#allocation2 + $0x38] sm:$0x1]  ;;  %v7795_v36 = vld [vmem:[#allocation2 + $0x6c] sm:$0xff]  }
 0x174   : > { %7404 = vmatprep.subr.bf16.mxu1 %v7852_v63  ;;  %v5255_v48 = vsel %vm8281_vm8, %v6457_v28, %v5254_v16  ;;  %v5258_v11 = vsel %vm8281_vm8, %v5256_v62, %v5257_v52  ;;  %v5264_v27 = vrot.slane %v7859_v21, 5  ;;  %v6471_v16 = vrot.slane %v5202_v53, 9  ;;  %v7864_v53 = vld [vmem:[#allocation2 + $0x44] sm:$0x1] }
 0x175   : > { %v9584_v57 = vsel %vm8281_vm8, %v5347_v1, %v5348_v50  ;;  %v6489_v4 = vcombine.low %v5255_v48, %v5258_v11  ;;  %v5352_v43 = vrot.slane %v9425_v6, 5  ;;  %v6459_v18 = vrot.slane %v5190_v31, 9  ;;  %v7793_v50 = vld [vmem:[#allocation2 + $0x60] sm:$0xff]   ;;  %v5191_v1 = vld [vmem:[#allocation2 + $0x3c] sm:$0xe] }
 0x176   : > { %7135 = vmatmul.mubr.bf16.gmra.mrb[4].mxu1 %v7787_v47  ;;  %7347 = vmatmul.mubr.bf16.gmra.mrb[24].mxu0 %v6446_v41  ;;  %v5261_v47 = vrot.slane %v7856_v32, 5  ;;  %v6502_v37 = vcombine.low %v9575_v24, %v9584_v57  ;;  %v5271_v33 = vrot.slane %v7861_v26, 5  ;;  %v5355_v6 = vrot.slane %v9491_v13, 5  ;;  %v7863_v32 = vld [vmem:[%s9768_s3 + $0x130] sm:$0xff]  }
 0x177   : > { %7138 = vmatprep.mubr.bf16.mxu1 %v7789_v60  ;;  %7412 = vmatpush3.bf16.msra.mxu1 %v7852_v63  ;;  %v7858_v60 = vld [vmem:[#allocation2 + $0x34] sm:$0xf]  ;;  %v6448_v63 = vcombine.low %v4855_v58, %v4865_v23  ;;  %v5354_v35 = vrot.slane %v5352_v43, 4  ;;  %v9603_v28 = vsel %vm8281_vm8, %v6471_v16, %v5352_v43  ;;  %v6472_v62 = vrot.slane %v5203_v8, 9 }
 0x178   : > { %7405 = vmatprep.subr.bf16.mxu1 %v7854_v39  ;;  %7350 = vmatprep.mubr.bf16.mxu0 %v6447_v51  ;;  %v5268_v56 = vrot.slane %v7858_v60, 5  ;;  %v5263_v41 = vrot.slane %v5261_v47, 4  ;;  %v7860_v51 = vld [vmem:[%s9768_s3 + $0x128] sm:$0xff]   ;;  %v5359_v58 = vrot.slane %v9503_v19, 5  ;;  %v5362_v23 = vrot.slane %v9523_v29, 5 }
 0x179   : > { %v6460_v11 = vrot.slane %v5191_v1, 9  ;;  %v5278_v31 = vrot.slane %v7864_v53, 5  ;;  %v7800_v53 = vld [vmem:[#allocation2 + $0xa8] sm:$0xff]   ;;  %v9886_v61 = vcombine.low %v9331_v0, %v9885_v12 }
 0x17a   : > { %v5270_v46 = vrot.slane %v5268_v56, 4  ;;  %v5265_v52 = vsel %vm8281_vm8, %v5263_v41, %v5264_v27  ;;  %v5269_v22 = vsel %vm8281_vm8, %v6459_v18, %v5268_v56  ;;  %v9625_v29 = vsel %vm8281_vm8, %v6472_v62, %v5359_v58  ;;  %v2819_v27 = vld [vmem:[#allocation2 + $0x6c] sm:$0xf]  ;;  %v7797_v41 = vld [vmem:[#allocation2 + $0x84] sm:$0xff]   ;;  %v7866_v18 = vld [vmem:[#allocation2 + $0x70] sm:$0xf] }
 0x17b   : > { %7413 = vmatpush3.bf16.msra.mxu1 %v7854_v39  ;;  %v5262_v39 = vsel %vm8281_vm8, %v6458_v54, %v5261_v47  ;;  %v9619_v47 = vsel %vm8281_vm8, %v5354_v35, %v5355_v6  ;;  %v7865_v54 = vld [vmem:[%s9768_s3 + $0x138] sm:$0xff]   ;;  %v3036_v8 = vshrl.u32 %v2819_v27, 16  ;;  %v3049_v26 = vshrl.u32 %v7866_v18, 16  ;;  %v7798_v62 = vld [vmem:[#allocation2 + $0x90] sm:$0xff]  }
 0x17c   : > { %7406 = vmatprep.subr.bf16.mxu1 %v7857_v40  ;;  %v5272_v13 = vsel %vm8281_vm8, %v5270_v46, %v5271_v33  ;;  %v6503_v19 = vcombine.low %v9603_v28, %v9619_v47  ;;  %v6490_v48 = vcombine.low %v5262_v39, %v5265_v52  ;;  %v3045_v46 = vshll.u32 %v7866_v18, 16  ;;  %v2825_v52 = vld [vmem:[#allocation2 + $0x84] sm:$0xf] }
 0x17d   : > { %v6491_v60 = vcombine.low %v5269_v22, %v5272_v13  ;;  %v3038_v35 = vrot.slane %v3036_v8, 4  ;;  %v3051_v6 = vrot.slane %v3049_v26, 4  ;;  %v3087_v22 = vshll.u32 %v2825_v52, 16  ;;  %v7868_v13 = vld [vmem:[#allocation2 + $0x88] sm:$0xf] }
 0x17e   : > { %7139 = vmatmul.mubr.bf16.gmra.mrb[8].mxu1 %v7790_v17  ;;  %7351 = vmatmul.mubr.bf16.gmra.mrb[28].mxu0 %v6448_v63  ;;  %v7862_v17 = vld [vmem:[#allocation2 + $0x40] sm:$0xf]  ;;  %v3047_v39 = vrot.slane %v3045_v46, 5  ;;  %v2831_v46 = vld [vmem:[#allocation2 + $0x9c] sm:$0xf] }
 0x17f   : > { %7142 = vmatprep.mubr.bf16.mxu1 %v7792_v45  ;;  %7414 = vmatpush3.bf16.msra.mxu1 %v7857_v40  ;;  %v5275_v45 = vrot.slane %v7862_v17, 5  ;;  %v5361_v40 = vrot.slane %v5359_v58, 4 }
 0x180   : > { %7407 = vmatprep.subr.bf16.mxu1 %v7860_v51  ;;  %7370 = vmatprep.mubr.bf16.mxu0 %v6489_v4  ;;  %v7796_v4 = vld [vmem:[#allocation2 + $0x78] sm:$0xff]   ;;  %v3052_v17 = vor.u32 %v3051_v6, %v3047_v39 }
 0x181   : > { %v5277_v56 = vrot.slane %v5275_v45, 4  ;;  %v9629_v63 = vsel %vm8281_vm8, %v5361_v40, %v5362_v23  ;;  %v5276_v16 = vsel %vm8281_vm8, %v6460_v11, %v5275_v45  ;;  %v7867_v45 = vld [vmem:[#allocation2 + $0x74] sm:$0x1]  ;;  %v3084_v23 = vshrl.u32 %v2825_v52, 16  ;;  %v2828_v11 = vld [vmem:[#allocation2 + $0x90] sm:$0xf] }
 0x182   : > { %v6504_v21 = vcombine.low %v9625_v29, %v9629_v63  ;;  %v3055_v58 = vshll.u32 %v7867_v45, 16  ;;  %v3097_v40 = vshrl.u32 %v7868_v13, 16  ;;  %v3111_v18 = vshll.u32 %v2828_v11, 16  ;;  %v7871_v52 = vld [vmem:[#allocation2 + $0xa0] sm:$0xf] }
 0x183   : > { %7415 = vmatpush3.bf16.msra.mxu1 %v7860_v51  ;;  %v5279_v43 = vsel %vm8281_vm8, %v5277_v56, %v5278_v31  ;;  %v3039_v51 = vshll.u32 %v2819_v27, 16  ;;  %v7801_v31 = vld [vmem:[#allocation2 + $0xb4] sm:$0xff]   ;;  %v3089_v27 = vrot.slane %v3087_v22, 5  ;;  %v7802_v22 = vld [vmem:[#allocation2 + $0xc0] sm:$0xff]  }
 0x184   : > { %7408 = vmatprep.subr.bf16.mxu1 %v7863_v32  ;;  %v6492_v33 = vcombine.low %v5276_v16, %v5279_v43  ;;  %v3057_v56 = vrot.slane %v3055_v58, 5  ;;  %v3099_v8 = vrot.slane %v3097_v40, 4 }
 0x186   : > { %7143 = vmatmul.mubr.bf16.gmra.mrb[12].mxu1 %v7793_v50  ;;  %7371 = vmatmul.mubr.bf16.vlgmr.msra.gmra.mrb[0].mxu0 %v6490_v48  ;;  %v3041_v50 = vrot.slane %v3039_v51, 5  ;;  %v3108_v51 = vshrl.u32 %v2828_v11, 16  ;;  %v9890_v11 = vld [vmem:[#allocation4_spill] sm:$0xff] }
 0x187   : > { %7146 = vmatprep.mubr.bf16.mxu1 %v7795_v36  ;;  %7416 = vmatpush3.bf16.msra.mxu1 %v7863_v32  ;;  %v7799_v36 = vld [vmem:[#allocation2 + $0x9c] sm:$0xff]   ;;  %v3093_v32 = vshll.u32 %v7868_v13, 16 }
 0x188   : > { %7409 = vmatprep.subr.bf16.mxu1 %v7865_v54  ;;  %7374 = vmatprep.mubr.bf16.mxu0 %v6491_v60  ;;  %v3042_v1 = vor.u32 %v3041_v50, %v3038_v35  ;;  %v3053_v60 = vrot.slane %v3052_v17, 4  ;;  %v7870_v50 = vld [vmem:[#allocation2 + $0x94] sm:$0xf]  ;;  %v3145_v17 = vshrl.u32 %v7871_v52, 16 }
 0x189   : > { %v9649_v43 = vrot.slane %v3093_v32, 5  ;;  %v3117_v6 = vshll.u32 %v7870_v50, 16 }
 0x18a   : > { %v3043_v48 = vrot.slane %v3042_v1, 4  ;;  %v3058_v0 = vsel %vm7999_vm2, %v3053_v60, %v3057_v56  ;;  %v3141_v1 = vshll.u32 %v7871_v52, 16  ;;  %v9891_v60 = vld [vmem:[#allocation8_spill] sm:$0xff] }
 0x18b   : > { %7417 = vmatpush3.bf16.msra.mxu1 %v7865_v54  ;;  %v3086_v54 = vrot.slane %v3084_v23, 4  ;;  %v3100_v58 = vor.u32 %v3099_v8, %v9649_v43  ;;  %v3110_v23 = vrot.slane %v3108_v51, 4  ;;  %v9656_v40 = vrot.slane %v3117_v6, 5  ;;  %v7874_v6 = vld [vmem:[#allocation2 + $0xac] sm:$0xf] }
 0x18c   : > { %v3048_v26 = vsel %vm7999_vm2, %v3043_v48, %v3047_v39  ;;  %v3113_v39 = vrot.slane %v3111_v18, 5  ;;  %v9892_v56 = vcombine.low %v9890_v11, %v9891_v60  ;;  %v7873_v18 = vld [vmem:[#allocation2 + $0xa4] sm:$0x1]  ;;  %v3169_v14 = vshrl.u32 %v7874_v6, 16 }
 0x18d   : > { %v3090_v45 = vor.u32 %v3089_v27, %v3086_v54  ;;  %v6305_v13 = vcombine.low %v3048_v26, %v3058_v0  ;;  %v2834_v54 = vld [vmem:[#allocation2 + $0xa8] sm:$0xf] }
 0x18e   : > { %7147 = vmatmul.mubr.bf16.gmra.mrb[16].mxu1 %v7796_v4  ;;  %7375 = vmatmul.mubr.bf16.gmra.mrb[4].mxu0 %v6492_v33  ;;  %v9887_v4 = vld [vmem:[#allocation7_spill] sm:$0xff]  ;;  %v7869_v33 = vld [vmem:[#allocation2 + $0x8c] sm:$0x1]  ;;  %v3156_v26 = vshrl.u32 %v2834_v54, 16  ;;  %v3159_v0 = vshll.u32 %v2834_v54, 16  ;;  %v3171_v60 = vrot.slane %v3169_v14, 4 }
 0x18f   : > { %7150 = vmatprep.mubr.bf16.mxu1 %v7797_v41  ;;  %7378 = vmatprep.mubr.bf16.mxu0 %v9884_v3  ;;  %v9888_v41 = vld [vmem:[#allocation5_spill] sm:$0xff]  ;;  %v3103_v35 = vshll.u32 %v7869_v33, 16  ;;  %v3135_v3 = vshll.u32 %v2831_v46, 16  ;;  %v3091_v27 = vrot.slane %v3090_v45, 4  ;;  %v2837_v33 = vld [vmem:[#allocation2 + $0xb4] sm:$0xf] }
 0x190   : > { %v9889_v16 = vcombine.low %v9887_v4, %v9888_v41  ;;  %v3101_v4 = vrot.slane %v3100_v58, 4  ;;  %v3114_v41 = vor.u32 %v3113_v39, %v3110_v23  ;;  %v3180_v52 = vshrl.u32 %v2837_v33, 16  ;;  %v2840_v54 = vld [vmem:[#allocation2 + $0xc0] sm:$0xf] }
 0x191   : > { %v3105_v32 = vrot.slane %v3103_v35, 5  ;;  %v3137_v12 = vrot.slane %v3135_v3, 5  ;;  %v3096_v38 = vsel %vm7999_vm2, %v3091_v27, %v9649_v43 }
 0x196   : > { %7151 = vmatmul.mubr.bf16.gmra.mrb[20].mxu1 %v7798_v62  ;;  %7379 = vmatmul.mubr.bf16.gmra.mrb[8].mxu0 %v9886_v61  ;;  %v3121_v62 = vshrl.u32 %v7870_v50, 16  ;;  %v9661_v61 = vrot.slane %v3141_v1, 5  ;;  %v3183_v1 = vshll.u32 %v2837_v33, 16 }
 0x197   : > { %7154 = vmatprep.mubr.bf16.mxu1 %v7799_v36  ;;  %7382 = vmatprep.mubr.bf16.mxu0 %v9889_v16  ;;  %v3132_v36 = vshrl.u32 %v2831_v46, 16  ;;  %v7872_v16 = vld [vmem:[#allocation2 + $0x98] sm:$0x1]  ;;  %v3151_v46 = vshll.u32 %v7873_v18, 16 }
 0x198   : > { %v3123_v48 = vrot.slane %v3121_v62, 4  ;;  %v3127_v8 = vshll.u32 %v7872_v16, 16  ;;  %v3165_v62 = vshll.u32 %v7874_v6, 16  ;;  %v3207_v16 = vshll.u32 %v2840_v54, 16 }
 0x199   : > { %v3153_v39 = vrot.slane %v3151_v46, 5 }
 0x19a   : > { %v3124_v51 = vor.u32 %v3123_v48, %v9656_v40  ;;  %v3129_v3 = vrot.slane %v3127_v8, 5  ;;  %v3161_v48 = vrot.slane %v3159_v0, 5  ;;  %v3167_v11 = vrot.slane %v3165_v62, 5 }
 0x19b   : > { %v3209_v62 = vrot.slane %v3207_v16, 5 }
 0x19c   : > { %v3125_v23 = vrot.slane %v3124_v51, 4 }
 0x19e   : > { %7155 = vmatmul.mubr.bf16.gmra.mrb[24].mxu1 %v7800_v53  ;;  %7383 = vmatmul.mubr.bf16.gmra.mrb[12].mxu0 %v9892_v56  ;;  %v3134_v53 = vrot.slane %v3132_v36, 4  ;;  %v3115_v36 = vrot.slane %v3114_v41, 4  ;;  %v3182_v56 = vrot.slane %v3180_v52, 4  ;;  %v3130_v49 = vsel %vm7999_vm2, %v3125_v23, %v3129_v3 }
 0x19f   : > { %7158 = vmatprep.mubr.bf16.mxu1 %v7801_v31  ;;  %v3147_v31 = vrot.slane %v3145_v17, 4  ;;  %7386 = vmatprep.mubr.bf16.mxu0 %v6497_v42  ;;  %v3106_v42 = vsel %vm7999_vm2, %v3101_v4, %v3105_v32  ;;  %v7875_v17 = vld [vmem:[#allocation2 + $0xb8] sm:$0xf]  ;;  %v3172_v4 = vor.u32 %v3171_v60, %v3167_v11  ;;  %v3204_v41 = vshrl.u32 %v2840_v54, 16 }
 0x1a0   : > { %v3138_v35 = vor.u32 %v3137_v12, %v3134_v53  ;;  %v3189_v45 = vshll.u32 %v7875_v17, 16  ;;  %v3193_v58 = vshrl.u32 %v7875_v17, 16  ;;  %v6307_v32 = vcombine.low %v3096_v38, %v3106_v42 }
 0x1a1   : > { %v3148_v50 = vor.u32 %v3147_v31, %v9661_v61  ;;  %v3185_v53 = vrot.slane %v3183_v1, 5  ;;  %v3120_v27 = vsel %vm7999_vm2, %v3115_v36, %v9656_v40  ;;  %v7877_v40 = vld [vmem:[#allocation2 + $0xc4] sm:$0xf]  ;;  %v3206_v6 = vrot.slane %v3204_v41, 4  ;;  %v7879_v1 = vld [vmem:[#allocation2 + $0xc8] sm:$0x1] }
 0x1a2   : > { %v3191_v12 = vrot.slane %v3189_v45, 5  ;;  %v3195_v31 = vrot.slane %v3193_v58, 4  ;;  %v3213_v8 = vshll.u32 %v7877_v40, 16  ;;  %v3217_v51 = vshrl.u32 %v7877_v40, 16 }
 0x1a3   : > { %v3149_v43 = vrot.slane %v3148_v50, 4  ;;  %v3186_v18 = vor.u32 %v3185_v53, %v3182_v56  ;;  %v3223_v2 = vshll.u32 %v7879_v1, 16 }
 0x1a4   : > { %v3196_v46 = vor.u32 %v3195_v31, %v3191_v12  ;;  %v3215_v14 = vrot.slane %v3213_v8, 5  ;;  %v3219_v38 = vrot.slane %v3217_v51, 4 }
 0x1a5   : > { %v3154_v9 = vsel %vm7999_vm2, %v3149_v43, %v3153_v39  ;;  %v3187_v42 = vrot.slane %v3186_v18, 4  ;;  %v3225_v39 = vrot.slane %v3223_v2, 5 }
 0x1a6   : > { %7159 = vmatmul.mubr.bf16.gmra.mrb[28].mxu1 %v7802_v22  ;;  %v3158_v22 = vrot.slane %v3156_v26, 4  ;;  %7387 = vmatmul.mubr.bf16.gmra.mrb[16].mxu0 %v6498_v7  ;;  %v3175_v7 = vshll.u32 %v7876_v20, 16  ;;  %v7878_v26 = vld [vmem:[#allocation2 + $0xbc] sm:$0x1]  ;;  %v3197_v36 = vrot.slane %v3196_v46, 4  ;;  %v3220_v52 = vor.u32 %v3219_v38, %v3215_v14 }
 0x1a7   : > { %7194 = vmatprep.mubr.bf16.mxu1 %v6305_v13  ;;  %v3139_v13 = vrot.slane %v3138_v35, 4  ;;  %7390 = vmatprep.mubr.bf16.mxu0 %v6499_v10  ;;  %v3199_v0 = vshll.u32 %v7878_v26, 16  ;;  %v3173_v35 = vrot.slane %v3172_v4, 4  ;;  %v3192_v59 = vsel %vm7999_vm2, %v3187_v42, %v3191_v12 }
 0x1a8   : > { %v3162_v10 = vor.u32 %v3161_v48, %v3158_v22  ;;  %v3177_v50 = vrot.slane %v3175_v7, 5  ;;  %v3221_v23 = vrot.slane %v3220_v52, 4 }
 0x1a9   : > { %v3144_v44 = vsel %vm7999_vm2, %v3139_v13, %v9661_v61  ;;  %v3201_v3 = vrot.slane %v3199_v0, 5 }
 0x1aa   : > { %v6309_v61 = vcombine.low %v3144_v44, %v3154_v9  ;;  %v3163_v33 = vrot.slane %v3162_v10, 4  ;;  %v3178_v30 = vsel %vm7999_vm2, %v3173_v35, %v3177_v50  ;;  %v3226_v48 = vsel %vm7999_vm2, %v3221_v23, %v3225_v39 }
 0x1ac   : > { %v3168_v55 = vsel %vm7999_vm2, %v3163_v33, %v3167_v11 }
 0x1ad   : > { %v6310_v17 = vcombine.low %v3168_v55, %v3178_v30 }
 0x1ae   : > { %7195 = vmatmul.mubr.bf16.vlgmr.msra.gmra.mrb[16].mxu1 %v9456_v25  ;;  %v6308_v25 = vcombine.low %v3120_v27, %v3130_v49  ;;  %7391 = vmatmul.mubr.bf16.gmra.mrb[20].mxu0 %v6500_v5  ;;  %v3210_v5 = vor.u32 %v3209_v62, %v3206_v6 }
 0x1af   : > { %7198 = vmatprep.mubr.bf16.mxu1 %v6307_v32  ;;  %7394 = vmatprep.mubr.bf16.mxu0 %v6501_v15  ;;  %v3202_v15 = vsel %vm7999_vm2, %v3197_v36, %v3201_v3 }
 0x1b0   : > { %v6311_v45 = vcombine.low %v3192_v59, %v3202_v15  ;;  %v3211_v58 = vrot.slane %v3210_v5, 4 }
 0x1b2   : > { %v3216_v22 = vsel %vm7999_vm2, %v3211_v58, %v3215_v14 }
 0x1b3   : > { %v6312_v13 = vcombine.low %v3216_v22, %v3226_v48 }
 0x1b6   : > { %7199 = vmatmul.mubr.bf16.gmra.mrb[20].mxu1 %v6308_v25  ;;  %7395 = vmatmul.mubr.bf16.gmra.mrb[24].mxu0 %v6502_v37 }
 0x1b7   : > { %7202 = vmatprep.mubr.bf16.mxu1 %v6309_v61  ;;  %7398 = vmatprep.mubr.bf16.mxu0 %v6503_v19 }
 0x1be   : > { %7203 = vmatmul.mubr.bf16.gmra.mrb[24].mxu1 %v6310_v17  ;;  %7399 = vmatmul.mubr.bf16.gmra.mrb[28].mxu0 %v6504_v21 }
 0x1bf   : > { %7206 = vmatprep.mubr.bf16.mxu1 %v6311_v45 }
 0x1c6   : > { %7207 = vmatmul.mubr.bf16.gmra.mrb[28].mxu1 %v6312_v13 }
 0x241   : > { %v7132_v24 = vpop.f32.mrb[0].mxu1 }
 0x242   : > { %v2636_v57 = vpop.f32.mrb[1].mxu1 }
 0x243   : > { %v7133_v37 = vpop.f32.mrb[2].mxu1 }
 0x244   : > { %v2639_v28 = vpop.f32.mrb[3].mxu1 }
 0x249   : > { %v7136_v47 = vpop.f32.mrb[4].mxu1 }
 0x24a   : > { %v2652_v19 = vpop.f32.mrb[5].mxu1 }
 0x24b   : > { %v7137_v43 = vpop.f32.mrb[6].mxu1 }
 0x24c   : > { %v2655_v11 = vpop.f32.mrb[7].mxu1 }
 0x251   : > { %v7140_v60 = vpop.f32.mrb[8].mxu1 }
 0x252   : > { %v2668_v32 = vpop.f32.mrb[9].mxu1 }
 0x253   : > { %v7141_v56 = vpop.f32.mrb[10].mxu1 }
 0x254   : > { %v9718_v34 = vpop.f32.mrb[11].mxu1 }
 0x259   : > { %v9720_v53 = vpop.f32.mrb[12].mxu1  ;;  %v7372_v12 = vpop.f32.mrb[0].mxu0 }
 0x25a   : > { %v9722_v29 = vpop.f32.mrb[13].mxu1  ;;  %v7418_v31 = vadd.f32 %v7372_v12, %v7132_v24  ;;  %v5527_v54 = vpop.f32.mrb[1].mxu0 }
 0x25b   : > { %v9724_v63 = vpop.f32.mrb[14].mxu1  ;;  %v7419_v27 = vadd.f32 %v5527_v54, %v2636_v57  ;;  %v7373_v49 = vpop.f32.mrb[2].mxu0 }
 0x25c   : > { %v9726_v21 = vpop.f32.mrb[15].mxu1  ;;  %v7420_v20 = vadd.f32 %v7373_v49, %v7133_v37  ;;  %v5530_v7 = vpop.f32.mrb[3].mxu0  ;;  %v5886_v40 = vmul.f32 %v7418_v31, %v7418_v31 }
 0x25d   : > { %v7421_v44 = vadd.f32 %v5530_v7, %v2639_v28  ;;  %v5884_v10 = vmul.f32 %v7419_v27, %v7419_v27 }
 0x25e   : > { %v6652_v9 = vpack.c.bf16 %v7420_v20, %v7418_v31  ;;  %v5887_v0 = vmul.f32 %v7420_v20, %v7420_v20 }
 0x25f   : > { %v6647_v4 = vpack.c.bf16 %v7421_v44, %v7419_v27  ;;  %v5846_v41 = vadd.f32 %v7421_v44, %v7419_v27  ;;  %v5885_v16 = vmul.f32 %v7421_v44, %v7421_v44 }
 0x260   : > { %6739 = vst [vmem:[%s9731_s15 + $0x8] sm:$0xff] %v6652_v9  }
 0x261   : > { %6648 = vst [vmem:[%s9731_s15] sm:$0xff] %v6647_v4   ;;  %v5847_v8 = vadd.f32 %v7418_v31, %v5846_v41  ;;  %v5916_v51 = vadd.f32 %v5885_v16, %v5884_v10  ;;  %v7376_v18 = vpop.f32.mrb[4].mxu0 }
 0x262   : > { %v7422_v46 = vadd.f32 %v7376_v18, %v7136_v47  ;;  %v5543_v26 = vpop.f32.mrb[5].mxu0 }
 0x263   : > { %v5917_v25 = vadd.f32 %v5916_v51, %v5886_v40  ;;  %v7423_v61 = vadd.f32 %v5543_v26, %v2652_v19  ;;  %v5848_v33 = vadd.f32 %v7420_v20, %v5847_v8  ;;  %v7377_v35 = vpop.f32.mrb[6].mxu0 }
 0x264   : > { %v7424_v50 = vadd.f32 %v7377_v35, %v7137_v43  ;;  %v5546_v6 = vpop.f32.mrb[7].mxu0  ;;  %v5890_v52 = vmul.f32 %v7422_v46, %v7422_v46 }
 0x265   : > { %v5849_v62 = vadd.f32 %v7423_v61, %v5848_v33  ;;  %v5888_v14 = vmul.f32 %v7423_v61, %v7423_v61  ;;  %v5918_v38 = vadd.f32 %v5917_v25, %v5887_v0  ;;  %v7425_v42 = vadd.f32 %v5546_v6, %v2655_v11 }
 0x266   : > { %v6662_v36 = vpack.c.bf16 %v7424_v50, %v7422_v46  ;;  %v5891_v45 = vmul.f32 %v7424_v50, %v7424_v50 }
 0x267   : > { %v5919_v3 = vadd.f32 %v5918_v38, %v5888_v14  ;;  %v6657_v55 = vpack.c.bf16 %v7425_v42, %v7423_v61  ;;  %v5850_v30 = vadd.f32 %v7425_v42, %v5849_v62  ;;  %v5889_v5 = vmul.f32 %v7425_v42, %v7425_v42 }
 0x268   : > { %6741 = vst [vmem:[%s9731_s15 + $0x18] sm:$0xff] %v6662_v36  }
 0x269   : > { %6740 = vst [vmem:[%s9731_s15 + $0x10] sm:$0xff] %v6657_v55   ;;  %v5851_v1 = vadd.f32 %v7422_v46, %v5850_v30  ;;  %v5920_v2 = vadd.f32 %v5919_v3, %v5889_v5  ;;  %v7380_v59 = vpop.f32.mrb[8].mxu0 }
 0x26a   : > { %v7426_v15 = vadd.f32 %v7380_v59, %v7140_v60  ;;  %v5559_v17 = vpop.f32.mrb[9].mxu0 }
 0x26b   : > { %v5921_v58 = vadd.f32 %v5920_v2, %v5890_v52  ;;  %v7427_v23 = vadd.f32 %v5559_v17, %v2668_v32  ;;  %v5852_v39 = vadd.f32 %v7424_v50, %v5851_v1  ;;  %v7381_v22 = vpop.f32.mrb[10].mxu0 }
 0x26c   : > { %v7428_v48 = vadd.f32 %v7381_v22, %v7141_v56  ;;  %v5562_v13 = vpop.f32.mrb[11].mxu0  ;;  %v5894_v12 = vmul.f32 %v7426_v15, %v7426_v15 }
 0x26d   : > { %v5853_v24 = vadd.f32 %v7427_v23, %v5852_v39  ;;  %v5892_v57 = vmul.f32 %v7427_v23, %v7427_v23  ;;  %v5922_v37 = vadd.f32 %v5921_v58, %v5891_v45  ;;  %v7429_v28 = vadd.f32 %v5562_v13, %v9718_v34 }
 0x26e   : > { %v6672_v47 = vpack.c.bf16 %v7428_v48, %v7426_v15  ;;  %v5895_v49 = vmul.f32 %v7428_v48, %v7428_v48 }
 0x26f   : > { %v5923_v19 = vadd.f32 %v5922_v37, %v5892_v57  ;;  %v6667_v43 = vpack.c.bf16 %v7429_v28, %v7427_v23  ;;  %v5854_v11 = vadd.f32 %v7429_v28, %v5853_v24  ;;  %v5893_v60 = vmul.f32 %v7429_v28, %v7429_v28 }
 0x270   : > { %6743 = vst [vmem:[%s9731_s15 + $0x28] sm:$0xff] %v6672_v47  }
 0x271   : > { %6742 = vst [vmem:[%s9731_s15 + $0x20] sm:$0xff] %v6667_v43   ;;  %v5855_v31 = vadd.f32 %v7426_v15, %v5854_v11  ;;  %v5924_v32 = vadd.f32 %v5923_v19, %v5893_v60  ;;  %v7384_v54 = vpop.f32.mrb[12].mxu0 }
 0x272   : > { %v7430_v27 = vadd.f32 %v7384_v54, %v9720_v53  ;;  %v5575_v56 = vpop.f32.mrb[13].mxu0 }
 0x273   : > { %v5925_v20 = vadd.f32 %v5924_v32, %v5894_v12  ;;  %v7431_v7 = vadd.f32 %v5575_v56, %v9722_v29  ;;  %v5856_v34 = vadd.f32 %v7428_v48, %v5855_v31  ;;  %v7385_v44 = vpop.f32.mrb[14].mxu0 }
 0x274   : > { %v7432_v9 = vadd.f32 %v7385_v44, %v9724_v63  ;;  %v5578_v10 = vpop.f32.mrb[15].mxu0  ;;  %v5898_v26 = vmul.f32 %v7430_v27, %v7430_v27 }
 0x275   : > { %v5857_v4 = vadd.f32 %v7431_v7, %v5856_v34  ;;  %v5896_v41 = vmul.f32 %v7431_v7, %v7431_v7  ;;  %v5926_v16 = vadd.f32 %v5925_v20, %v5895_v49  ;;  %v7433_v40 = vadd.f32 %v5578_v10, %v9726_v21 }
 0x276   : > { %v6682_v8 = vpack.c.bf16 %v7432_v9, %v7430_v27  ;;  %v5899_v33 = vmul.f32 %v7432_v9, %v7432_v9 }
 0x277   : > { %v5927_v51 = vadd.f32 %v5926_v16, %v5896_v41  ;;  %v6677_v53 = vpack.c.bf16 %v7433_v40, %v7431_v7  ;;  %v5858_v18 = vadd.f32 %v7433_v40, %v5857_v4  ;;  %v5897_v46 = vmul.f32 %v7433_v40, %v7433_v40 }
 0x278   : > { %6745 = vst [vmem:[%s9731_s15 + $0x38] sm:$0xff] %v6682_v8  }
 0x279   : > { %6744 = vst [vmem:[%s9731_s15 + $0x30] sm:$0xff] %v6677_v53   ;;  %v5859_v29 = vadd.f32 %v7430_v27, %v5858_v18  ;;  %v5928_v0 = vadd.f32 %v5927_v51, %v5897_v46  ;;  %v7388_v25 = vpop.f32.mrb[16].mxu0 }
 0x27a   : > { %v5591_v61 = vpop.f32.mrb[17].mxu0 }
 0x27b   : > { %v5929_v63 = vadd.f32 %v5928_v0, %v5898_v26  ;;  %v5860_v35 = vadd.f32 %v7432_v9, %v5859_v29  ;;  %v7389_v50 = vpop.f32.mrb[18].mxu0 }
 0x27c   : > { %v5594_v6 = vpop.f32.mrb[19].mxu0 }
 0x27d   : > { %v5930_v14 = vadd.f32 %v5929_v63, %v5899_v33 }
 0x281   : > { %v7196_v62 = vpop.f32.mrb[16].mxu1  ;;  %v7392_v1 = vpop.f32.mrb[20].mxu0 }
 0x282   : > { %v3454_v21 = vpop.f32.mrb[17].mxu1  ;;  %v7434_v38 = vadd.f32 %v7388_v25, %v7196_v62  ;;  %v5607_v59 = vpop.f32.mrb[21].mxu0 }
 0x283   : > { %v7197_v42 = vpop.f32.mrb[18].mxu1  ;;  %v7435_v36 = vadd.f32 %v5591_v61, %v3454_v21  ;;  %v7393_v23 = vpop.f32.mrb[22].mxu0 }
 0x284   : > { %v3457_v3 = vpop.f32.mrb[19].mxu1  ;;  %v7436_v55 = vadd.f32 %v7389_v50, %v7197_v42  ;;  %v5610_v39 = vpop.f32.mrb[23].mxu0  ;;  %v5902_v22 = vmul.f32 %v7434_v38, %v7434_v38 }
 0x285   : > { %v5861_v30 = vadd.f32 %v7435_v36, %v5860_v35  ;;  %v5900_v5 = vmul.f32 %v7435_v36, %v7435_v36  ;;  %v7437_v52 = vadd.f32 %v5594_v6, %v3457_v3 }
 0x286   : > { %v6692_v2 = vpack.c.bf16 %v7436_v55, %v7434_v38  ;;  %v5903_v28 = vmul.f32 %v7436_v55, %v7436_v55 }
 0x287   : > { %v5931_v15 = vadd.f32 %v5930_v14, %v5900_v5  ;;  %v6687_v17 = vpack.c.bf16 %v7437_v52, %v7435_v36  ;;  %v5862_v45 = vadd.f32 %v7437_v52, %v5861_v30  ;;  %v5901_v58 = vmul.f32 %v7437_v52, %v7437_v52 }
 0x288   : > { %6747 = vst [vmem:[%s9731_s15 + $0x48] sm:$0xff] %v6692_v2  }
 0x289   : > { %6746 = vst [vmem:[%s9731_s15 + $0x40] sm:$0xff] %v6687_v17   ;;  %v5863_v48 = vadd.f32 %v7434_v38, %v5862_v45  ;;  %v5932_v13 = vadd.f32 %v5931_v15, %v5901_v58  ;;  %v7200_v24 = vpop.f32.mrb[20].mxu1  ;;  %v7396_v56 = vpop.f32.mrb[24].mxu0 }
 0x28a   : > { %v3470_v57 = vpop.f32.mrb[21].mxu1  ;;  %v7438_v37 = vadd.f32 %v7392_v1, %v7200_v24  ;;  %v5623_v20 = vpop.f32.mrb[25].mxu0 }
 0x28b   : > { %v5933_v47 = vadd.f32 %v5932_v13, %v5902_v22  ;;  %v7201_v19 = vpop.f32.mrb[22].mxu1  ;;  %v7439_v43 = vadd.f32 %v5607_v59, %v3470_v57  ;;  %v5864_v11 = vadd.f32 %v7436_v55, %v5863_v48  ;;  %v7397_v10 = vpop.f32.mrb[26].mxu0 }
 0x28c   : > { %v3473_v60 = vpop.f32.mrb[23].mxu1  ;;  %v7440_v12 = vadd.f32 %v7393_v23, %v7201_v19  ;;  %v5626_v4 = vpop.f32.mrb[27].mxu0  ;;  %v5906_v41 = vmul.f32 %v7438_v37, %v7438_v37 }
 0x28d   : > { %v5865_v31 = vadd.f32 %v7439_v43, %v5864_v11  ;;  %v5904_v32 = vmul.f32 %v7439_v43, %v7439_v43  ;;  %v5934_v54 = vadd.f32 %v5933_v47, %v5903_v28  ;;  %v7441_v27 = vadd.f32 %v5610_v39, %v3473_v60 }
 0x28e   : > { %v6702_v49 = vpack.c.bf16 %v7440_v12, %v7438_v37  ;;  %v5907_v18 = vmul.f32 %v7440_v12, %v7440_v12 }
 0x28f   : > { %v5935_v7 = vadd.f32 %v5934_v54, %v5904_v32  ;;  %v6697_v34 = vpack.c.bf16 %v7441_v27, %v7439_v43  ;;  %v5866_v44 = vadd.f32 %v7441_v27, %v5865_v31  ;;  %v5905_v9 = vmul.f32 %v7441_v27, %v7441_v27 }
 0x290   : > { %6749 = vst [vmem:[%s9731_s15 + $0x58] sm:$0xff] %v6702_v49  }
 0x291   : > { %6748 = vst [vmem:[%s9731_s15 + $0x50] sm:$0xff] %v6697_v34   ;;  %v5867_v16 = vadd.f32 %v7438_v37, %v5866_v44  ;;  %v5936_v40 = vadd.f32 %v5935_v7, %v5905_v9  ;;  %v7204_v8 = vpop.f32.mrb[24].mxu1  ;;  %v7400_v6 = vpop.f32.mrb[28].mxu0 }
 0x292   : > { %v3486_v51 = vpop.f32.mrb[25].mxu1  ;;  %v7442_v53 = vadd.f32 %v7396_v56, %v7204_v8  ;;  %v5639_v14 = vpop.f32.mrb[29].mxu0 }
 0x293   : > { %v5937_v46 = vadd.f32 %v5936_v40, %v5906_v41  ;;  %v7205_v26 = vpop.f32.mrb[26].mxu1  ;;  %v7443_v29 = vadd.f32 %v5623_v20, %v3486_v51  ;;  %v5868_v0 = vadd.f32 %v7440_v12, %v5867_v16  ;;  %v7401_v3 = vpop.f32.mrb[30].mxu0 }
 0x294   : > { %v3489_v25 = vpop.f32.mrb[27].mxu1  ;;  %v7444_v61 = vadd.f32 %v7397_v10, %v7205_v26  ;;  %v5642_v55 = vpop.f32.mrb[31].mxu0  ;;  %v5910_v30 = vmul.f32 %v7442_v53, %v7442_v53 }
 0x295   : > { %v5869_v33 = vadd.f32 %v7443_v29, %v5868_v0  ;;  %v5908_v63 = vmul.f32 %v7443_v29, %v7443_v29  ;;  %v5938_v35 = vadd.f32 %v5937_v46, %v5907_v18  ;;  %v7445_v50 = vadd.f32 %v5626_v4, %v3489_v25 }
 0x296   : > { %v6712_v62 = vpack.c.bf16 %v7444_v61, %v7442_v53  ;;  %v5911_v15 = vmul.f32 %v7444_v61, %v7444_v61 }
 0x297   : > { %v5939_v21 = vadd.f32 %v5938_v35, %v5908_v63  ;;  %v6707_v38 = vpack.c.bf16 %v7445_v50, %v7443_v29  ;;  %v5870_v42 = vadd.f32 %v7445_v50, %v5869_v33  ;;  %v5909_v36 = vmul.f32 %v7445_v50, %v7445_v50 }
 0x298   : > { %6751 = vst [vmem:[%s9731_s15 + $0x68] sm:$0xff] %v6712_v62  }
 0x299   : > { %6750 = vst [vmem:[%s9731_s15 + $0x60] sm:$0xff] %v6707_v38   ;;  %v5871_v5 = vadd.f32 %v7442_v53, %v5870_v42  ;;  %v5940_v52 = vadd.f32 %v5939_v21, %v5909_v36  ;;  %v7208_v1 = vpop.f32.mrb[28].mxu1 }
 0x29a   : > { %v3502_v2 = vpop.f32.mrb[29].mxu1  ;;  %v7446_v59 = vadd.f32 %v7400_v6, %v7208_v1 }
 0x29b   : > { %v5941_v17 = vadd.f32 %v5940_v52, %v5910_v30  ;;  %v7209_v45 = vpop.f32.mrb[30].mxu1  ;;  %v7447_v58 = vadd.f32 %v5639_v14, %v3502_v2  ;;  %v5872_v23 = vadd.f32 %v7444_v61, %v5871_v5 }
 0x29c   : > { %v3505_v39 = vpop.f32.mrb[31].mxu1  ;;  %v7448_v22 = vadd.f32 %v7401_v3, %v7209_v45  ;;  %v5914_v11 = vmul.f32 %v7446_v59, %v7446_v59 }
 0x29d   : > { %v5873_v48 = vadd.f32 %v7447_v58, %v5872_v23  ;;  %v5912_v13 = vmul.f32 %v7447_v58, %v7447_v58  ;;  %v5942_v24 = vadd.f32 %v5941_v17, %v5911_v15  ;;  %v7449_v57 = vadd.f32 %v5642_v55, %v3505_v39 }
 0x29e   : > { %v6722_v37 = vpack.c.bf16 %v7448_v22, %v7446_v59  ;;  %v5915_v31 = vmul.f32 %v7448_v22, %v7448_v22 }
 0x29f   : > { %v5943_v28 = vadd.f32 %v5942_v24, %v5912_v13  ;;  %v6717_v47 = vpack.c.bf16 %v7449_v57, %v7447_v58  ;;  %v5874_v19 = vadd.f32 %v7449_v57, %v5873_v48  ;;  %v5913_v43 = vmul.f32 %v7449_v57, %v7449_v57 }
 0x2a0   : > { %6753 = vst [vmem:[%s9731_s15 + $0x78] sm:$0xff] %v6722_v37  }
 0x2a1   : > { %6752 = vst [vmem:[%s9731_s15 + $0x70] sm:$0xff] %v6717_v47   ;;  %v5875_v60 = vadd.f32 %v7446_v59, %v5874_v19  ;;  %v5944_v12 = vadd.f32 %v5943_v28, %v5913_v43 }
 0x2a3   : > { %v5876_v32 = vadd.f32 %v7448_v22, %v5875_v60  ;;  %v5945_v54 = vadd.f32 %v5944_v12, %v5914_v11 }
 0x2a5   : > { %v5877_v27 = vrot.slane %v5876_v32, 4  ;;  %v5946_v56 = vadd.f32 %v5945_v54, %v5915_v31 }
 0x2a7   : > { %v5878_v49 = vadd.f32 %v5877_v27, %v5876_v32  ;;  %v5947_v20 = vrot.slane %v5946_v56, 4 }
 0x2a9   : > { %v5879_v7 = vrot.slane %v5878_v49, 2  ;;  %v5948_v34 = vadd.f32 %v5947_v20, %v5946_v56 }
 0x2ab   : > { %v5880_v44 = vadd.f32 %v5879_v7, %v5878_v49  ;;  %v5949_v9 = vrot.slane %v5948_v34, 2 }
 0x2ad   : > { %v5881_v10 = vrot.slane %v5880_v44, 1  ;;  %v5950_v4 = vadd.f32 %v5949_v9, %v5948_v34 }
 0x2af   : > { %v5882_v41 = vadd.f32 %v5881_v10, %v5880_v44  ;;  %v5951_v16 = vrot.slane %v5950_v4, 1 }
 0x2b1   : > { %5883 = vst [vmem:[%s266_s18] sm:$0x1] %v5882_v41  ;;  %v5952_v40 = vadd.f32 %v5951_v16, %v5950_v4 }
 0x2b3   : > { %5953 = vst [vmem:[%s269_s23] sm:$0x1] %v5952_v40 }
 0x2b4 PF: > { %s17_s21 = sadd.s32 1, %s7886_s21  }
 0x2b5   : > { %p14_p5 = scmp.ge.s32.totalorder %s17_s21, 4  }
 0x2b7   :  { %16 = sbr.rel (!%p14_p5) target bundleno = 1 (0x1), region = 100 }

</bundles_post_ra>
